<compile_context>
chip_gen: v7x
topology: tpu7x:2x2x1
jax: 0.10.0
libtpu: 0.0.40
codegen_flags: <defaults>
</compile_context>

<pallas_src>
import math
import numpy as np

import jax
import jax.numpy as jnp
from jax.experimental import pallas as pl
from jax.experimental.pallas import tpu as pltpu  # noqa: F401  (TPU backend registration)

# ---- model / example configuration (small, consistent with the module) ----
B = 2            # batch
S = 8            # event sequence length
BS = B * S       # flattened token count
E_DIM = 16       # event_feature_dim
F_DIM = 8        # static_feature_dim
D = 32           # d_model
NHEAD = 4
HD = D // NHEAD  # head dim
HID = 64         # d_hid (feed-forward)
NLAYERS = 2
OUT = 34         # NUM_TILE_TYPES
EPS = 1e-5
NEG_INF = -1e9
LANES = 128
ATTN_SCALE = 1.0 / math.sqrt(HD)
F32 = jnp.float32
BF16 = jnp.bfloat16


# ----------------------------- slab layouts (static, shared by packer & kernel) ----------
class SlabLayout:
    """Row layout for packing many small tensors into one (rows, 128) slab."""

    def __init__(self, row_align):
        self.row_align = row_align
        self.slots = {}          # name -> (row_offset, rows, cols)
        self.rows = 0

    def add(self, name, rows, cols):
        assert cols <= LANES
        self.slots[name] = (self.rows, rows, cols)
        padded = ((rows + self.row_align - 1) // self.row_align) * self.row_align
        self.rows += padded

    def total_rows(self):
        return self.rows


def _build_layouts():
    # bf16 weight slab: 16-row alignment (bf16 packs 2 rows / sublane -> (16,128) tiles)
    wl = SlabLayout(row_align=16)
    wl.add("ew", E_DIM, D)
    for l in range(NLAYERS):
        wl.add(f"wq{l}", D, D)
        wl.add(f"wk{l}", D, D)
        wl.add(f"wv{l}", D, D)
        wl.add(f"wo{l}", D, D)
        wl.add(f"w1{l}", D, HID)
        wl.add(f"w2{l}", HID, D)
    wl.add("sw1", F_DIM, D)
    wl.add("sw2", D, D)
    wl.add("hw1a", D, D)     # rows [:D]  of output_head.Linear(2D, D)  (context half)
    wl.add("hw1b", D, D)     # rows [D:]  of output_head.Linear(2D, D)  (static half)
    wl.add("hw2", D, D // 2)
    wl.add("hw3", D // 2, OUT)

    # f32 constant slab: 8-row alignment (f32 (8,128) tiles)
    cl = SlabLayout(row_align=8)
    cl.add("cos", BS, D)            # RoPE cos table tiled to flattened (B*S, D) tokens
    cl.add("sin", BS, D)            # RoPE "alternating" sin table (signs baked in)
    cl.add("attn_bias", BS, BS)     # 0 within a sample, -1e9 across samples
    cl.add("hmask", NHEAD, D)       # 0/1 lane mask per attention head
    cl.add("perm", D, D)            # even<->odd lane swap permutation
    cl.add("sel", B, BS)            # 0/1 per-sample token selector for pooling
    cl.add("wp_row", 1, D)          # attention_pool Linear(D,1) weight as a row
    cl.add("bp", 1, 1)
    cl.add("ev_b", 1, D)
    cl.add("ev_g", 1, D)
    cl.add("ev_beta", 1, D)
    for l in range(NLAYERS):
        cl.add(f"bq{l}", 1, D)
        cl.add(f"bk{l}", 1, D)
        cl.add(f"bv{l}", 1, D)
        cl.add(f"bo{l}", 1, D)
        cl.add(f"ln1g{l}", 1, D)
        cl.add(f"ln1b{l}", 1, D)
        cl.add(f"ln2g{l}", 1, D)
        cl.add(f"ln2b{l}", 1, D)
        cl.add(f"b1{l}", 1, HID)
        cl.add(f"b2{l}", 1, D)
    cl.add("sb1", 1, D)
    cl.add("sg1", 1, D)
    cl.add("sbe1", 1, D)
    cl.add("sb2", 1, D)
    cl.add("sg2", 1, D)
    cl.add("sbe2", 1, D)
    cl.add("hb1", 1, D)
    cl.add("hg1", 1, D)
    cl.add("hbe1", 1, D)
    cl.add("hb2", 1, D // 2)
    cl.add("hg2", 1, D // 2)
    cl.add("hbe2", 1, D // 2)
    cl.add("hb3", 1, OUT)
    return wl, cl


W_LAY, C_LAY = _build_layouts()
W_ROWS = W_LAY.total_rows()
C_ROWS = C_LAY.total_rows()


def _slab_load(ref, layout, name):
    off, rows, cols = layout.slots[name]
    return ref[pl.ds(off, rows), pl.ds(0, cols)]


# ----------------------------- in-kernel helpers -----------------------------
def _ln(x, g, b):
    """LayerNorm over last dim (PyTorch semantics, eps=1e-5, biased variance), f32."""
    mu = jnp.mean(x, axis=-1, keepdims=True)
    var = jnp.mean(jnp.square(x - mu), axis=-1, keepdims=True)
    return (x - mu) * jax.lax.rsqrt(var + EPS) * g + b


def _gelu(x):
    """Exact (erf-based) GELU, matching torch.nn.GELU() default, f32."""
    return 0.5 * x * (1.0 + jax.lax.erf(x * (1.0 / math.sqrt(2.0))))


# ----------------------------- the single fused kernel -----------------------------
def fused_forward_kernel(ev_ref, st_ref, w_ref, c_ref, o_ref):
    getw = lambda name: _slab_load(w_ref, W_LAY, name)   # bf16 matmul weights
    getc = lambda name: _slab_load(c_ref, C_LAY, name)   # f32 biases / LN / constants

    def bdot(x, w_bf16):
        # bf16 x bf16 MXU matmul, f32 accumulation
        return jnp.dot(x.astype(BF16), w_bf16, preferred_element_type=F32)

    # ---- event_encoder: Linear + LayerNorm, all B*S tokens at once ----
    x = bdot(ev_ref[...], getw("ew")) + getc("ev_b")
    x = _ln(x, getc("ev_g"), getc("ev_beta"))                       # (BS, D) f32

    # ---- RoPE on the embedding (as in the PyTorch model): x*cos + swap(x)*sin_alt ----
    swap = jnp.dot(x, getc("perm"), preferred_element_type=F32)     # even<->odd lane swap
    x = x * getc("cos") + swap * getc("sin")

    attn_bias = getc("attn_bias")                                   # (BS, BS)
    hmask = getc("hmask")                                           # (NHEAD, D) 0/1

    # ---- NLAYERS pre-LN TransformerEncoder layers (MHA + ReLU FFN), unrolled ----
    for l in range(NLAYERS):
        # self-attention block (norm_first). 1/sqrt(HD) is folded into wq/bq at pack time.
        h = _ln(x, getc(f"ln1g{l}"), getc(f"ln1b{l}"))
        hb = h.astype(BF16)
        q = jnp.dot(hb, getw(f"wq{l}"), preferred_element_type=F32) + getc(f"bq{l}")
        k = jnp.dot(hb, getw(f"wk{l}"), preferred_element_type=F32) + getc(f"bk{l}")
        v = jnp.dot(hb, getw(f"wv{l}"), preferred_element_type=F32) + getc(f"bv{l}")
        kb = k.astype(BF16)

        acc = jnp.zeros((BS, D), F32)
        for hh in range(NHEAD):
            mrow = hmask[hh:hh + 1, :]                              # (1, D) 0/1 lane mask
            qh = (q * mrow).astype(BF16)                            # only head hh lanes live
            vh = (v * mrow).astype(BF16)
            # scores over ALL flattened tokens, masked to the block diagonal
            sc = jax.lax.dot_general(qh, kb, (((1,), (1,)), ((), ())),
                                     preferred_element_type=F32)    # (BS, BS)
            sc = sc + attn_bias
            sc = sc - jnp.max(sc, axis=-1, keepdims=True)
            p = jnp.exp(sc)
            p = p * pl.reciprocal(jnp.sum(p, axis=-1, keepdims=True), approx=True)
            acc = acc + jnp.dot(p.astype(BF16), vh, preferred_element_type=F32)
        x = x + bdot(acc, getw(f"wo{l}")) + getc(f"bo{l}")

        # feed-forward block (norm_first, ReLU)
        h2 = _ln(x, getc(f"ln2g{l}"), getc(f"ln2b{l}"))
        ff = jnp.maximum(bdot(h2, getw(f"w1{l}")) + getc(f"b1{l}"), 0.0)
        x = x + bdot(ff, getw(f"w2{l}")) + getc(f"b2{l}")

    # ---- attention_pool: per-sample softmax over seq as ONE selector matmul ----
    logit = jnp.sum(x * getc("wp_row"), axis=-1, keepdims=True) + getc("bp")     # (BS, 1)
    # softmax is shift-invariant: subtract the global max; the -60 floor keeps the result
    # exact for any realistic logit spread and guarantees a nonzero denominator (no NaN).
    e = jnp.exp(jnp.maximum(logit - jnp.max(logit, axis=0, keepdims=True), -60.0))
    sel = getc("sel")                                                # (B, BS) 0/1
    num = jnp.dot(sel, e * x, preferred_element_type=F32)            # (B, D)
    den = jnp.dot(sel, e, preferred_element_type=F32)                # (B, 1)
    ctx = num * pl.reciprocal(den, approx=True)

    # ---- static_encoder: Linear -> LN -> GELU -> Linear -> LN ----
    st = bdot(st_ref[...], getw("sw1")) + getc("sb1")
    st = _gelu(_ln(st, getc("sg1"), getc("sbe1")))
    st = bdot(st, getw("sw2")) + getc("sb2")
    st = _ln(st, getc("sg2"), getc("sbe2"))                          # (B, D)

    # ---- output_head on combined = concat([ctx, st], axis=1), as a split matmul ----
    hc = bdot(ctx, getw("hw1a")) + bdot(st, getw("hw1b")) + getc("hb1")
    hc = _gelu(_ln(hc, getc("hg1"), getc("hbe1")))
    hc = bdot(hc, getw("hw2")) + getc("hb2")
    hc = _gelu(_ln(hc, getc("hg2"), getc("hbe2")))
    o_ref[...] = bdot(hc, getw("hw3")) + getc("hb3")                 # (B, OUT)


# ----------------------------- parameter init (f32 "reference" params) -------------------
def init_params(key):
    keys = iter(jax.random.split(key, 64))

    def xavier(shape):
        fan_in, fan_out = shape[-2], shape[-1]
        std = math.sqrt(2.0 / (fan_in + fan_out))
        return (std * jax.random.normal(next(keys), shape)).astype(F32)

    zeros = lambda shape: jnp.zeros(shape, F32)
    ones = lambda shape: jnp.ones(shape, F32)

    layers = []
    for _ in range(NLAYERS):
        layers.append({
            "wq": xavier((D, D)), "bq": zeros((1, D)),
            "wk": xavier((D, D)), "bk": zeros((1, D)),
            "wv": xavier((D, D)), "bv": zeros((1, D)),
            "wo": xavier((D, D)), "bo": zeros((1, D)),
            "ln1g": ones((1, D)), "ln1b": zeros((1, D)),
            "ln2g": ones((1, D)), "ln2b": zeros((1, D)),
            "w1": xavier((D, HID)), "b1": zeros((1, HID)),
            "w2": xavier((HID, D)), "b2": zeros((1, D)),
        })
    return {
        "event": {"w": xavier((E_DIM, D)), "b": zeros((1, D)),
                  "g": ones((1, D)), "beta": zeros((1, D))},
        "layers": layers,
        "static": {"w1": xavier((F_DIM, D)), "b1": zeros((1, D)),
                   "g1": ones((1, D)), "be1": zeros((1, D)),
                   "w2": xavier((D, D)), "b2": zeros((1, D)),
                   "g2": ones((1, D)), "be2": zeros((1, D))},
        "pool": {"wp": xavier((D, 1)), "bp": zeros((1, 1))},
        "head": {"w1": xavier((2 * D, D)), "b1": zeros((1, D)),
                 "g1": ones((1, D)), "be1": zeros((1, D)),
                 "w2": xavier((D, D // 2)), "b2": zeros((1, D // 2)),
                 "g2": ones((1, D // 2)), "be2": zeros((1, D // 2)),
                 "w3": xavier((D // 2, OUT)), "b3": zeros((1, OUT))},
    }


# ----------------------------- host-side packing into two lane-dense slabs ----------------
def pack_params(params):
    wnp = np.zeros((W_ROWS, LANES), np.float32)
    cnp = np.zeros((C_ROWS, LANES), np.float32)

    def putw(name, mat):
        off, r, cc = W_LAY.slots[name]
        wnp[off:off + r, :cc] = np.asarray(mat, np.float32).reshape(r, cc)

    def putc(name, mat):
        off, r, cc = C_LAY.slots[name]
        cnp[off:off + r, :cc] = np.asarray(mat, np.float32).reshape(r, cc)

    # --- RoPE tables (tiled to the flattened (B*S, D) token layout, row = b*S + s) ---
    half = D // 2
    freqs = 1.0 / (10000.0 ** (np.arange(half, dtype=np.float64) / half))
    ang = np.arange(S, dtype=np.float64)[:, None] * freqs[None, :]
    cos_full = np.repeat(np.cos(ang), 2, axis=1)                  # [c0,c0,c1,c1,...]
    sin_alt = np.zeros((S, D))
    sin_alt[:, 0::2] = -np.sin(ang)
    sin_alt[:, 1::2] = np.sin(ang)
    putc("cos", np.tile(cos_full, (B, 1)))
    putc("sin", np.tile(sin_alt, (B, 1)))

    # --- block-diagonal attention bias / head lane masks / pooling selector / perm ---
    seg = np.arange(BS) // S
    putc("attn_bias", np.where(seg[:, None] == seg[None, :], 0.0, NEG_INF))
    lane_head = np.arange(D) // HD
    putc("hmask", (lane_head[None, :] == np.arange(NHEAD)[:, None]).astype(np.float32))
    putc("sel", (seg[None, :] == np.arange(B)[:, None]).astype(np.float32))
    perm = np.zeros((D, D))
    idx = np.arange(half)
    perm[2 * idx + 1, 2 * idx] = 1.0
    perm[2 * idx, 2 * idx + 1] = 1.0
    putc("perm", perm)

    # --- weights / biases ---
    p = params
    putw("ew", p["event"]["w"])
    putc("ev_b", p["event"]["b"]); putc("ev_g", p["event"]["g"]); putc("ev_beta", p["event"]["beta"])
    for l, lp in enumerate(p["layers"]):
        putw(f"wq{l}", np.asarray(lp["wq"], np.float32) * ATTN_SCALE)   # fold 1/sqrt(HD)
        putc(f"bq{l}", np.asarray(lp["bq"], np.float32) * ATTN_SCALE)
        putw(f"wk{l}", lp["wk"]); putc(f"bk{l}", lp["bk"])
        putw(f"wv{l}", lp["wv"]); putc(f"bv{l}", lp["bv"])
        putw(f"wo{l}", lp["wo"]); putc(f"bo{l}", lp["bo"])
        putc(f"ln1g{l}", lp["ln1g"]); putc(f"ln1b{l}", lp["ln1b"])
        putc(f"ln2g{l}", lp["ln2g"]); putc(f"ln2b{l}", lp["ln2b"])
        putw(f"w1{l}", lp["w1"]); putc(f"b1{l}", lp["b1"])
        putw(f"w2{l}", lp["w2"]); putc(f"b2{l}", lp["b2"])
    putc("wp_row", np.asarray(p["pool"]["wp"], np.float32).reshape(1, D))
    putc("bp", p["pool"]["bp"])
    putw("sw1", p["static"]["w1"]); putc("sb1", p["static"]["b1"])
    putc("sg1", p["static"]["g1"]); putc("sbe1", p["static"]["be1"])
    putw("sw2", p["static"]["w2"]); putc("sb2", p["static"]["b2"])
    putc("sg2", p["static"]["g2"]); putc("sbe2", p["static"]["be2"])
    hw1 = np.asarray(p["head"]["w1"], np.float32)
    putw("hw1a", hw1[:D, :]); putw("hw1b", hw1[D:, :])
    putc("hb1", p["head"]["b1"]); putc("hg1", p["head"]["g1"]); putc("hbe1", p["head"]["be1"])
    putw("hw2", p["head"]["w2"])
    putc("hb2", p["head"]["b2"]); putc("hg2", p["head"]["g2"]); putc("hbe2", p["head"]["be2"])
    putw("hw3", p["head"]["w3"]); putc("hb3", p["head"]["b3"])

    return jnp.asarray(wnp, dtype=BF16), jnp.asarray(cnp, dtype=F32)


# ----------------------------- full forward (one pallas_call, jitted) -------------------
@jax.jit
def mahjong_transformer_forward(event_seq, static_feat, wslab, cslab):
    return pl.pallas_call(
        fused_forward_kernel,
        out_shape=jax.ShapeDtypeStruct((B, OUT), F32),
    )(event_seq.reshape(BS, E_DIM), static_feat, wslab, cslab)


if __name__ == "__main__":
    key = jax.random.PRNGKey(0)
    k_ev, k_st, k_p = jax.random.split(key, 3)
    event_seq = jax.random.normal(k_ev, (B, S, E_DIM), dtype=F32)
    static_feat = jax.random.normal(k_st, (B, F_DIM), dtype=F32)

    params = init_params(k_p)
    wslab, cslab = pack_params(params)       # packed once on the host, reused every call

    logits = mahjong_transformer_forward(event_seq, static_feat, wslab, cslab)
    logits = jax.block_until_ready(logits)
    assert logits.shape == (B, OUT) and logits.dtype == F32
    assert bool(jnp.all(jnp.isfinite(logits)))
    print("KERNEL_OK")
</pallas_src>

<mosaic_0001>
module attributes {stable_mosaic.version = 11 : i64} {
  func.func @fused_forward_kernel(%arg0: memref<16x16xf32, #tpu.memory_space<vmem>>, %arg1: memref<2x8xf32, #tpu.memory_space<vmem>>, %arg2: memref<624x128xbf16, #tpu.memory_space<vmem>>, %arg3: memref<400x128xf32, #tpu.memory_space<vmem>>, %arg4: memref<2x34xf32, #tpu.memory_space<vmem>>) attributes {dimension_semantics = [], scalar_prefetch = 0 : i64, scratch_operands = 0 : i64, tpu.core_type = #tpu.core_type<tc>} {
    %c0 = arith.constant 0 : index
    %c0_0 = arith.constant 0 : index
    %0 = vector.load %arg0[%c0, %c0_0] : memref<16x16xf32, #tpu.memory_space<vmem>>, vector<16x16xf32>
    %c0_1 = arith.constant 0 : index
    %c0_2 = arith.constant 0 : index
    %1 = vector.load %arg2[%c0_1, %c0_2] : memref<624x128xbf16, #tpu.memory_space<vmem>>, vector<16x32xbf16>
    %2 = arith.truncf %0 : vector<16x16xf32> to vector<16x16xbf16>
    %cst = arith.constant dense<0.000000e+00> : vector<16x32xf32>
    %3 = tpu.matmul %2, %1, %cst {dimension_numbers = #tpu.dot_dimension_numbers<[1], [0], [0], [1], [0, 0, 1, 1], [], []>} : vector<16x16xbf16>, vector<16x32xbf16>, vector<16x32xf32> -> vector<16x32xf32>
    %c112 = arith.constant 112 : index
    %c0_3 = arith.constant 0 : index
    %4 = vector.load %arg3[%c112, %c0_3] : memref<400x128xf32, #tpu.memory_space<vmem>>, vector<1x32xf32>
    %5 = vector.broadcast %4 : vector<1x32xf32> to vector<16x32xf32>
    %6 = arith.addf %3, %5 : vector<16x32xf32>
    %c120 = arith.constant 120 : index
    %c0_4 = arith.constant 0 : index
    %7 = vector.load %arg3[%c120, %c0_4] : memref<400x128xf32, #tpu.memory_space<vmem>>, vector<1x32xf32>
    %c128 = arith.constant 128 : index
    %c0_5 = arith.constant 0 : index
    %8 = vector.load %arg3[%c128, %c0_5] : memref<400x128xf32, #tpu.memory_space<vmem>>, vector<1x32xf32>
    %cst_6 = arith.constant dense<0.000000e+00> : vector<16xf32>
    %9 = vector.multi_reduction <add>, %6, %cst_6 [1] : vector<16x32xf32> to vector<16xf32>
    %10 = vector.shape_cast %9 : vector<16xf32> to vector<16x1xf32>
    %cst_7 = arith.constant 3.200000e+01 : f32
    %11 = vector.broadcast %cst_7 : f32 to vector<16x1xf32>
    %12 = arith.divf %10, %11 : vector<16x1xf32>
    %13 = vector.broadcast %12 : vector<16x1xf32> to vector<16x32xf32>
    %14 = arith.subf %6, %13 : vector<16x32xf32>
    %15 = arith.mulf %14, %14 : vector<16x32xf32>
    %cst_8 = arith.constant dense<0.000000e+00> : vector<16xf32>
    %16 = vector.multi_reduction <add>, %15, %cst_8 [1] : vector<16x32xf32> to vector<16xf32>
    %17 = vector.shape_cast %16 : vector<16xf32> to vector<16x1xf32>
    %cst_9 = arith.constant 3.200000e+01 : f32
    %18 = vector.broadcast %cst_9 : f32 to vector<16x1xf32>
    %19 = arith.divf %17, %18 : vector<16x1xf32>
    %20 = vector.broadcast %12 : vector<16x1xf32> to vector<16x32xf32>
    %21 = arith.subf %6, %20 : vector<16x32xf32>
    %cst_10 = arith.constant 9.99999974E-6 : f32
    %22 = vector.broadcast %cst_10 : f32 to vector<16x1xf32>
    %23 = arith.addf %19, %22 : vector<16x1xf32>
    %24 = math.rsqrt %23 : vector<16x1xf32>
    %25 = vector.broadcast %24 : vector<16x1xf32> to vector<16x32xf32>
    %26 = arith.mulf %21, %25 : vector<16x32xf32>
    %27 = vector.broadcast %7 : vector<1x32xf32> to vector<16x32xf32>
    %28 = arith.mulf %26, %27 : vector<16x32xf32>
    %29 = vector.broadcast %8 : vector<1x32xf32> to vector<16x32xf32>
    %30 = arith.addf %28, %29 : vector<16x32xf32>
    %c56 = arith.constant 56 : index
    %c0_11 = arith.constant 0 : index
    %31 = vector.load %arg3[%c56, %c0_11] : memref<400x128xf32, #tpu.memory_space<vmem>>, vector<32x32xf32>
    %cst_12 = arith.constant dense<0.000000e+00> : vector<16x32xf32>
    %32 = tpu.matmul %30, %31, %cst_12 {dimension_numbers = #tpu.dot_dimension_numbers<[1], [0], [0], [1], [0, 0, 1, 1], [], []>} : vector<16x32xf32>, vector<32x32xf32>, vector<16x32xf32> -> vector<16x32xf32>
    %c0_13 = arith.constant 0 : index
    %c0_14 = arith.constant 0 : index
    %33 = vector.load %arg3[%c0_13, %c0_14] : memref<400x128xf32, #tpu.memory_space<vmem>>, vector<16x32xf32>
    %34 = arith.mulf %30, %33 : vector<16x32xf32>
    %c16 = arith.constant 16 : index
    %c0_15 = arith.constant 0 : index
    %35 = vector.load %arg3[%c16, %c0_15] : memref<400x128xf32, #tpu.memory_space<vmem>>, vector<16x32xf32>
    %36 = arith.mulf %32, %35 : vector<16x32xf32>
    %37 = arith.addf %34, %36 : vector<16x32xf32>
    %c32 = arith.constant 32 : index
    %c0_16 = arith.constant 0 : index
    %38 = vector.load %arg3[%c32, %c0_16] : memref<400x128xf32, #tpu.memory_space<vmem>>, vector<16x16xf32>
    %c48 = arith.constant 48 : index
    %c0_17 = arith.constant 0 : index
    %39 = vector.load %arg3[%c48, %c0_17] : memref<400x128xf32, #tpu.memory_space<vmem>>, vector<4x32xf32>
    %c168 = arith.constant 168 : index
    %c0_18 = arith.constant 0 : index
    %40 = vector.load %arg3[%c168, %c0_18] : memref<400x128xf32, #tpu.memory_space<vmem>>, vector<1x32xf32>
    %c176 = arith.constant 176 : index
    %c0_19 = arith.constant 0 : index
    %41 = vector.load %arg3[%c176, %c0_19] : memref<400x128xf32, #tpu.memory_space<vmem>>, vector<1x32xf32>
    %cst_20 = arith.constant dense<0.000000e+00> : vector<16xf32>
    %42 = vector.multi_reduction <add>, %37, %cst_20 [1] : vector<16x32xf32> to vector<16xf32>
    %43 = vector.shape_cast %42 : vector<16xf32> to vector<16x1xf32>
    %cst_21 = arith.constant 3.200000e+01 : f32
    %44 = vector.broadcast %cst_21 : f32 to vector<16x1xf32>
    %45 = arith.divf %43, %44 : vector<16x1xf32>
    %46 = vector.broadcast %45 : vector<16x1xf32> to vector<16x32xf32>
    %47 = arith.subf %37, %46 : vector<16x32xf32>
    %48 = arith.mulf %47, %47 : vector<16x32xf32>
    %cst_22 = arith.constant dense<0.000000e+00> : vector<16xf32>
    %49 = vector.multi_reduction <add>, %48, %cst_22 [1] : vector<16x32xf32> to vector<16xf32>
    %50 = vector.shape_cast %49 : vector<16xf32> to vector<16x1xf32>
    %cst_23 = arith.constant 3.200000e+01 : f32
    %51 = vector.broadcast %cst_23 : f32 to vector<16x1xf32>
    %52 = arith.divf %50, %51 : vector<16x1xf32>
    %53 = vector.broadcast %45 : vector<16x1xf32> to vector<16x32xf32>
    %54 = arith.subf %37, %53 : vector<16x32xf32>
    %cst_24 = arith.constant 9.99999974E-6 : f32
    %55 = vector.broadcast %cst_24 : f32 to vector<16x1xf32>
    %56 = arith.addf %52, %55 : vector<16x1xf32>
    %57 = math.rsqrt %56 : vector<16x1xf32>
    %58 = vector.broadcast %57 : vector<16x1xf32> to vector<16x32xf32>
    %59 = arith.mulf %54, %58 : vector<16x32xf32>
    %60 = vector.broadcast %40 : vector<1x32xf32> to vector<16x32xf32>
    %61 = arith.mulf %59, %60 : vector<16x32xf32>
    %62 = vector.broadcast %41 : vector<1x32xf32> to vector<16x32xf32>
    %63 = arith.addf %61, %62 : vector<16x32xf32>
    %64 = arith.truncf %63 : vector<16x32xf32> to vector<16x32xbf16>
    %c16_25 = arith.constant 16 : index
    %c0_26 = arith.constant 0 : index
    %65 = vector.load %arg2[%c16_25, %c0_26] : memref<624x128xbf16, #tpu.memory_space<vmem>>, vector<32x32xbf16>
    %cst_27 = arith.constant dense<0.000000e+00> : vector<16x32xf32>
    %66 = tpu.matmul %64, %65, %cst_27 {dimension_numbers = #tpu.dot_dimension_numbers<[1], [0], [0], [1], [0, 0, 1, 1], [], []>} : vector<16x32xbf16>, vector<32x32xbf16>, vector<16x32xf32> -> vector<16x32xf32>
    %c136 = arith.constant 136 : index
    %c0_28 = arith.constant 0 : index
    %67 = vector.load %arg3[%c136, %c0_28] : memref<400x128xf32, #tpu.memory_space<vmem>>, vector<1x32xf32>
    %68 = vector.broadcast %67 : vector<1x32xf32> to vector<16x32xf32>
    %69 = arith.addf %66, %68 : vector<16x32xf32>
    %c48_29 = arith.constant 48 : index
    %c0_30 = arith.constant 0 : index
    %70 = vector.load %arg2[%c48_29, %c0_30] : memref<624x128xbf16, #tpu.memory_space<vmem>>, vector<32x32xbf16>
    %cst_31 = arith.constant dense<0.000000e+00> : vector<16x32xf32>
    %71 = tpu.matmul %64, %70, %cst_31 {dimension_numbers = #tpu.dot_dimension_numbers<[1], [0], [0], [1], [0, 0, 1, 1], [], []>} : vector<16x32xbf16>, vector<32x32xbf16>, vector<16x32xf32> -> vector<16x32xf32>
    %c144 = arith.constant 144 : index
    %c0_32 = arith.constant 0 : index
    %72 = vector.load %arg3[%c144, %c0_32] : memref<400x128xf32, #tpu.memory_space<vmem>>, vector<1x32xf32>
    %73 = vector.broadcast %72 : vector<1x32xf32> to vector<16x32xf32>
    %74 = arith.addf %71, %73 : vector<16x32xf32>
    %c80 = arith.constant 80 : index
    %c0_33 = arith.constant 0 : index
    %75 = vector.load %arg2[%c80, %c0_33] : memref<624x128xbf16, #tpu.memory_space<vmem>>, vector<32x32xbf16>
    %cst_34 = arith.constant dense<0.000000e+00> : vector<16x32xf32>
    %76 = tpu.matmul %64, %75, %cst_34 {dimension_numbers = #tpu.dot_dimension_numbers<[1], [0], [0], [1], [0, 0, 1, 1], [], []>} : vector<16x32xbf16>, vector<32x32xbf16>, vector<16x32xf32> -> vector<16x32xf32>
    %c152 = arith.constant 152 : index
    %c0_35 = arith.constant 0 : index
    %77 = vector.load %arg3[%c152, %c0_35] : memref<400x128xf32, #tpu.memory_space<vmem>>, vector<1x32xf32>
    %78 = vector.broadcast %77 : vector<1x32xf32> to vector<16x32xf32>
    %79 = arith.addf %76, %78 : vector<16x32xf32>
    %80 = arith.truncf %74 : vector<16x32xf32> to vector<16x32xbf16>
    %cst_36 = arith.constant 0.000000e+00 : f32
    %81 = vector.broadcast %cst_36 : f32 to vector<16x32xf32>
    %82 = vector.extract_strided_slice %39 {offsets = [0, 0], sizes = [1, 32], strides = [1, 1]} : vector<4x32xf32> to vector<1x32xf32>
    %83 = vector.broadcast %82 : vector<1x32xf32> to vector<16x32xf32>
    %84 = arith.mulf %69, %83 : vector<16x32xf32>
    %85 = arith.truncf %84 : vector<16x32xf32> to vector<16x32xbf16>
    %86 = vector.broadcast %82 : vector<1x32xf32> to vector<16x32xf32>
    %87 = arith.mulf %79, %86 : vector<16x32xf32>
    %88 = arith.truncf %87 : vector<16x32xf32> to vector<16x32xbf16>
    %cst_37 = arith.constant dense<0.000000e+00> : vector<16x16xf32>
    %89 = tpu.matmul %85, %80, %cst_37 {dimension_numbers = #tpu.dot_dimension_numbers<[1], [1], [0], [0], [0, 0, 1, 0], [], []>} : vector<16x32xbf16>, vector<16x32xbf16>, vector<16x16xf32> -> vector<16x16xf32>
    %90 = arith.addf %89, %38 : vector<16x16xf32>
    %cst_38 = arith.constant dense<0xFF800000> : vector<16xf32>
    %91 = vector.multi_reduction <maximumf>, %90, %cst_38 [1] : vector<16x16xf32> to vector<16xf32>
    %92 = vector.shape_cast %91 : vector<16xf32> to vector<16x1xf32>
    %93 = vector.broadcast %92 : vector<16x1xf32> to vector<16x16xf32>
    %94 = arith.subf %90, %93 : vector<16x16xf32>
    %95 = math.exp %94 : vector<16x16xf32>
    %cst_39 = arith.constant dense<0.000000e+00> : vector<16xf32>
    %96 = vector.multi_reduction <add>, %95, %cst_39 [1] : vector<16x16xf32> to vector<16xf32>
    %97 = vector.shape_cast %96 : vector<16xf32> to vector<16x1xf32>
    %98 = tpu.reciprocal %97 {approx = true} : vector<16x1xf32> -> vector<16x1xf32>
    %99 = vector.broadcast %98 : vector<16x1xf32> to vector<16x16xf32>
    %100 = arith.mulf %95, %99 : vector<16x16xf32>
    %101 = arith.truncf %100 : vector<16x16xf32> to vector<16x16xbf16>
    %cst_40 = arith.constant dense<0.000000e+00> : vector<16x32xf32>
    %102 = tpu.matmul %101, %88, %cst_40 {dimension_numbers = #tpu.dot_dimension_numbers<[1], [0], [0], [1], [0, 0, 1, 1], [], []>} : vector<16x16xbf16>, vector<16x32xbf16>, vector<16x32xf32> -> vector<16x32xf32>
    %103 = arith.addf %81, %102 : vector<16x32xf32>
    %104 = vector.extract_strided_slice %39 {offsets = [1, 0], sizes = [1, 32], strides = [1, 1]} : vector<4x32xf32> to vector<1x32xf32>
    %105 = vector.broadcast %104 : vector<1x32xf32> to vector<16x32xf32>
    %106 = arith.mulf %69, %105 : vector<16x32xf32>
    %107 = arith.truncf %106 : vector<16x32xf32> to vector<16x32xbf16>
    %108 = vector.broadcast %104 : vector<1x32xf32> to vector<16x32xf32>
    %109 = arith.mulf %79, %108 : vector<16x32xf32>
    %110 = arith.truncf %109 : vector<16x32xf32> to vector<16x32xbf16>
    %cst_41 = arith.constant dense<0.000000e+00> : vector<16x16xf32>
    %111 = tpu.matmul %107, %80, %cst_41 {dimension_numbers = #tpu.dot_dimension_numbers<[1], [1], [0], [0], [0, 0, 1, 0], [], []>} : vector<16x32xbf16>, vector<16x32xbf16>, vector<16x16xf32> -> vector<16x16xf32>
    %112 = arith.addf %111, %38 : vector<16x16xf32>
    %cst_42 = arith.constant dense<0xFF800000> : vector<16xf32>
    %113 = vector.multi_reduction <maximumf>, %112, %cst_42 [1] : vector<16x16xf32> to vector<16xf32>
    %114 = vector.shape_cast %113 : vector<16xf32> to vector<16x1xf32>
    %115 = vector.broadcast %114 : vector<16x1xf32> to vector<16x16xf32>
    %116 = arith.subf %112, %115 : vector<16x16xf32>
    %117 = math.exp %116 : vector<16x16xf32>
    %cst_43 = arith.constant dense<0.000000e+00> : vector<16xf32>
    %118 = vector.multi_reduction <add>, %117, %cst_43 [1] : vector<16x16xf32> to vector<16xf32>
    %119 = vector.shape_cast %118 : vector<16xf32> to vector<16x1xf32>
    %120 = tpu.reciprocal %119 {approx = true} : vector<16x1xf32> -> vector<16x1xf32>
    %121 = vector.broadcast %120 : vector<16x1xf32> to vector<16x16xf32>
    %122 = arith.mulf %117, %121 : vector<16x16xf32>
    %123 = arith.truncf %122 : vector<16x16xf32> to vector<16x16xbf16>
    %cst_44 = arith.constant dense<0.000000e+00> : vector<16x32xf32>
    %124 = tpu.matmul %123, %110, %cst_44 {dimension_numbers = #tpu.dot_dimension_numbers<[1], [0], [0], [1], [0, 0, 1, 1], [], []>} : vector<16x16xbf16>, vector<16x32xbf16>, vector<16x32xf32> -> vector<16x32xf32>
    %125 = arith.addf %103, %124 : vector<16x32xf32>
    %126 = vector.extract_strided_slice %39 {offsets = [2, 0], sizes = [1, 32], strides = [1, 1]} : vector<4x32xf32> to vector<1x32xf32>
    %127 = vector.broadcast %126 : vector<1x32xf32> to vector<16x32xf32>
    %128 = arith.mulf %69, %127 : vector<16x32xf32>
    %129 = arith.truncf %128 : vector<16x32xf32> to vector<16x32xbf16>
    %130 = vector.broadcast %126 : vector<1x32xf32> to vector<16x32xf32>
    %131 = arith.mulf %79, %130 : vector<16x32xf32>
    %132 = arith.truncf %131 : vector<16x32xf32> to vector<16x32xbf16>
    %cst_45 = arith.constant dense<0.000000e+00> : vector<16x16xf32>
    %133 = tpu.matmul %129, %80, %cst_45 {dimension_numbers = #tpu.dot_dimension_numbers<[1], [1], [0], [0], [0, 0, 1, 0], [], []>} : vector<16x32xbf16>, vector<16x32xbf16>, vector<16x16xf32> -> vector<16x16xf32>
    %134 = arith.addf %133, %38 : vector<16x16xf32>
    %cst_46 = arith.constant dense<0xFF800000> : vector<16xf32>
    %135 = vector.multi_reduction <maximumf>, %134, %cst_46 [1] : vector<16x16xf32> to vector<16xf32>
    %136 = vector.shape_cast %135 : vector<16xf32> to vector<16x1xf32>
    %137 = vector.broadcast %136 : vector<16x1xf32> to vector<16x16xf32>
    %138 = arith.subf %134, %137 : vector<16x16xf32>
    %139 = math.exp %138 : vector<16x16xf32>
    %cst_47 = arith.constant dense<0.000000e+00> : vector<16xf32>
    %140 = vector.multi_reduction <add>, %139, %cst_47 [1] : vector<16x16xf32> to vector<16xf32>
    %141 = vector.shape_cast %140 : vector<16xf32> to vector<16x1xf32>
    %142 = tpu.reciprocal %141 {approx = true} : vector<16x1xf32> -> vector<16x1xf32>
    %143 = vector.broadcast %142 : vector<16x1xf32> to vector<16x16xf32>
    %144 = arith.mulf %139, %143 : vector<16x16xf32>
    %145 = arith.truncf %144 : vector<16x16xf32> to vector<16x16xbf16>
    %cst_48 = arith.constant dense<0.000000e+00> : vector<16x32xf32>
    %146 = tpu.matmul %145, %132, %cst_48 {dimension_numbers = #tpu.dot_dimension_numbers<[1], [0], [0], [1], [0, 0, 1, 1], [], []>} : vector<16x16xbf16>, vector<16x32xbf16>, vector<16x32xf32> -> vector<16x32xf32>
    %147 = arith.addf %125, %146 : vector<16x32xf32>
    %148 = vector.extract_strided_slice %39 {offsets = [3, 0], sizes = [1, 32], strides = [1, 1]} : vector<4x32xf32> to vector<1x32xf32>
    %149 = vector.broadcast %148 : vector<1x32xf32> to vector<16x32xf32>
    %150 = arith.mulf %69, %149 : vector<16x32xf32>
    %151 = arith.truncf %150 : vector<16x32xf32> to vector<16x32xbf16>
    %152 = vector.broadcast %148 : vector<1x32xf32> to vector<16x32xf32>
    %153 = arith.mulf %79, %152 : vector<16x32xf32>
    %154 = arith.truncf %153 : vector<16x32xf32> to vector<16x32xbf16>
    %cst_49 = arith.constant dense<0.000000e+00> : vector<16x16xf32>
    %155 = tpu.matmul %151, %80, %cst_49 {dimension_numbers = #tpu.dot_dimension_numbers<[1], [1], [0], [0], [0, 0, 1, 0], [], []>} : vector<16x32xbf16>, vector<16x32xbf16>, vector<16x16xf32> -> vector<16x16xf32>
    %156 = arith.addf %155, %38 : vector<16x16xf32>
    %cst_50 = arith.constant dense<0xFF800000> : vector<16xf32>
    %157 = vector.multi_reduction <maximumf>, %156, %cst_50 [1] : vector<16x16xf32> to vector<16xf32>
    %158 = vector.shape_cast %157 : vector<16xf32> to vector<16x1xf32>
    %159 = vector.broadcast %158 : vector<16x1xf32> to vector<16x16xf32>
    %160 = arith.subf %156, %159 : vector<16x16xf32>
    %161 = math.exp %160 : vector<16x16xf32>
    %cst_51 = arith.constant dense<0.000000e+00> : vector<16xf32>
    %162 = vector.multi_reduction <add>, %161, %cst_51 [1] : vector<16x16xf32> to vector<16xf32>
    %163 = vector.shape_cast %162 : vector<16xf32> to vector<16x1xf32>
    %164 = tpu.reciprocal %163 {approx = true} : vector<16x1xf32> -> vector<16x1xf32>
    %165 = vector.broadcast %164 : vector<16x1xf32> to vector<16x16xf32>
    %166 = arith.mulf %161, %165 : vector<16x16xf32>
    %167 = arith.truncf %166 : vector<16x16xf32> to vector<16x16xbf16>
    %cst_52 = arith.constant dense<0.000000e+00> : vector<16x32xf32>
    %168 = tpu.matmul %167, %154, %cst_52 {dimension_numbers = #tpu.dot_dimension_numbers<[1], [0], [0], [1], [0, 0, 1, 1], [], []>} : vector<16x16xbf16>, vector<16x32xbf16>, vector<16x32xf32> -> vector<16x32xf32>
    %169 = arith.addf %147, %168 : vector<16x32xf32>
    %c112_53 = arith.constant 112 : index
    %c0_54 = arith.constant 0 : index
    %170 = vector.load %arg2[%c112_53, %c0_54] : memref<624x128xbf16, #tpu.memory_space<vmem>>, vector<32x32xbf16>
    %171 = arith.truncf %169 : vector<16x32xf32> to vector<16x32xbf16>
    %cst_55 = arith.constant dense<0.000000e+00> : vector<16x32xf32>
    %172 = tpu.matmul %171, %170, %cst_55 {dimension_numbers = #tpu.dot_dimension_numbers<[1], [0], [0], [1], [0, 0, 1, 1], [], []>} : vector<16x32xbf16>, vector<32x32xbf16>, vector<16x32xf32> -> vector<16x32xf32>
    %173 = arith.addf %37, %172 : vector<16x32xf32>
    %c160 = arith.constant 160 : index
    %c0_56 = arith.constant 0 : index
    %174 = vector.load %arg3[%c160, %c0_56] : memref<400x128xf32, #tpu.memory_space<vmem>>, vector<1x32xf32>
    %175 = vector.broadcast %174 : vector<1x32xf32> to vector<16x32xf32>
    %176 = arith.addf %173, %175 : vector<16x32xf32>
    %c184 = arith.constant 184 : index
    %c0_57 = arith.constant 0 : index
    %177 = vector.load %arg3[%c184, %c0_57] : memref<400x128xf32, #tpu.memory_space<vmem>>, vector<1x32xf32>
    %c192 = arith.constant 192 : index
    %c0_58 = arith.constant 0 : index
    %178 = vector.load %arg3[%c192, %c0_58] : memref<400x128xf32, #tpu.memory_space<vmem>>, vector<1x32xf32>
    %cst_59 = arith.constant dense<0.000000e+00> : vector<16xf32>
    %179 = vector.multi_reduction <add>, %176, %cst_59 [1] : vector<16x32xf32> to vector<16xf32>
    %180 = vector.shape_cast %179 : vector<16xf32> to vector<16x1xf32>
    %cst_60 = arith.constant 3.200000e+01 : f32
    %181 = vector.broadcast %cst_60 : f32 to vector<16x1xf32>
    %182 = arith.divf %180, %181 : vector<16x1xf32>
    %183 = vector.broadcast %182 : vector<16x1xf32> to vector<16x32xf32>
    %184 = arith.subf %176, %183 : vector<16x32xf32>
    %185 = arith.mulf %184, %184 : vector<16x32xf32>
    %cst_61 = arith.constant dense<0.000000e+00> : vector<16xf32>
    %186 = vector.multi_reduction <add>, %185, %cst_61 [1] : vector<16x32xf32> to vector<16xf32>
    %187 = vector.shape_cast %186 : vector<16xf32> to vector<16x1xf32>
    %cst_62 = arith.constant 3.200000e+01 : f32
    %188 = vector.broadcast %cst_62 : f32 to vector<16x1xf32>
    %189 = arith.divf %187, %188 : vector<16x1xf32>
    %190 = vector.broadcast %182 : vector<16x1xf32> to vector<16x32xf32>
    %191 = arith.subf %176, %190 : vector<16x32xf32>
    %cst_63 = arith.constant 9.99999974E-6 : f32
    %192 = vector.broadcast %cst_63 : f32 to vector<16x1xf32>
    %193 = arith.addf %189, %192 : vector<16x1xf32>
    %194 = math.rsqrt %193 : vector<16x1xf32>
    %195 = vector.broadcast %194 : vector<16x1xf32> to vector<16x32xf32>
    %196 = arith.mulf %191, %195 : vector<16x32xf32>
    %197 = vector.broadcast %177 : vector<1x32xf32> to vector<16x32xf32>
    %198 = arith.mulf %196, %197 : vector<16x32xf32>
    %199 = vector.broadcast %178 : vector<1x32xf32> to vector<16x32xf32>
    %200 = arith.addf %198, %199 : vector<16x32xf32>
    %c144_64 = arith.constant 144 : index
    %c0_65 = arith.constant 0 : index
    %201 = vector.load %arg2[%c144_64, %c0_65] : memref<624x128xbf16, #tpu.memory_space<vmem>>, vector<32x64xbf16>
    %202 = arith.truncf %200 : vector<16x32xf32> to vector<16x32xbf16>
    %cst_66 = arith.constant dense<0.000000e+00> : vector<16x64xf32>
    %203 = tpu.matmul %202, %201, %cst_66 {dimension_numbers = #tpu.dot_dimension_numbers<[1], [0], [0], [1], [0, 0, 1, 1], [], []>} : vector<16x32xbf16>, vector<32x64xbf16>, vector<16x64xf32> -> vector<16x64xf32>
    %c200 = arith.constant 200 : index
    %c0_67 = arith.constant 0 : index
    %204 = vector.load %arg3[%c200, %c0_67] : memref<400x128xf32, #tpu.memory_space<vmem>>, vector<1x64xf32>
    %205 = vector.broadcast %204 : vector<1x64xf32> to vector<16x64xf32>
    %206 = arith.addf %203, %205 : vector<16x64xf32>
    %cst_68 = arith.constant 0.000000e+00 : f32
    %207 = vector.broadcast %cst_68 : f32 to vector<16x64xf32>
    %208 = arith.maximumf %206, %207 : vector<16x64xf32>
    %c176_69 = arith.constant 176 : index
    %c0_70 = arith.constant 0 : index
    %209 = vector.load %arg2[%c176_69, %c0_70] : memref<624x128xbf16, #tpu.memory_space<vmem>>, vector<64x32xbf16>
    %210 = arith.truncf %208 : vector<16x64xf32> to vector<16x64xbf16>
    %cst_71 = arith.constant dense<0.000000e+00> : vector<16x32xf32>
    %211 = tpu.matmul %210, %209, %cst_71 {dimension_numbers = #tpu.dot_dimension_numbers<[1], [0], [0], [1], [0, 0, 1, 1], [], []>} : vector<16x64xbf16>, vector<64x32xbf16>, vector<16x32xf32> -> vector<16x32xf32>
    %212 = arith.addf %176, %211 : vector<16x32xf32>
    %c208 = arith.constant 208 : index
    %c0_72 = arith.constant 0 : index
    %213 = vector.load %arg3[%c208, %c0_72] : memref<400x128xf32, #tpu.memory_space<vmem>>, vector<1x32xf32>
    %214 = vector.broadcast %213 : vector<1x32xf32> to vector<16x32xf32>
    %215 = arith.addf %212, %214 : vector<16x32xf32>
    %c248 = arith.constant 248 : index
    %c0_73 = arith.constant 0 : index
    %216 = vector.load %arg3[%c248, %c0_73] : memref<400x128xf32, #tpu.memory_space<vmem>>, vector<1x32xf32>
    %c256 = arith.constant 256 : index
    %c0_74 = arith.constant 0 : index
    %217 = vector.load %arg3[%c256, %c0_74] : memref<400x128xf32, #tpu.memory_space<vmem>>, vector<1x32xf32>
    %cst_75 = arith.constant dense<0.000000e+00> : vector<16xf32>
    %218 = vector.multi_reduction <add>, %215, %cst_75 [1] : vector<16x32xf32> to vector<16xf32>
    %219 = vector.shape_cast %218 : vector<16xf32> to vector<16x1xf32>
    %cst_76 = arith.constant 3.200000e+01 : f32
    %220 = vector.broadcast %cst_76 : f32 to vector<16x1xf32>
    %221 = arith.divf %219, %220 : vector<16x1xf32>
    %222 = vector.broadcast %221 : vector<16x1xf32> to vector<16x32xf32>
    %223 = arith.subf %215, %222 : vector<16x32xf32>
    %224 = arith.mulf %223, %223 : vector<16x32xf32>
    %cst_77 = arith.constant dense<0.000000e+00> : vector<16xf32>
    %225 = vector.multi_reduction <add>, %224, %cst_77 [1] : vector<16x32xf32> to vector<16xf32>
    %226 = vector.shape_cast %225 : vector<16xf32> to vector<16x1xf32>
    %cst_78 = arith.constant 3.200000e+01 : f32
    %227 = vector.broadcast %cst_78 : f32 to vector<16x1xf32>
    %228 = arith.divf %226, %227 : vector<16x1xf32>
    %229 = vector.broadcast %221 : vector<16x1xf32> to vector<16x32xf32>
    %230 = arith.subf %215, %229 : vector<16x32xf32>
    %cst_79 = arith.constant 9.99999974E-6 : f32
    %231 = vector.broadcast %cst_79 : f32 to vector<16x1xf32>
    %232 = arith.addf %228, %231 : vector<16x1xf32>
    %233 = math.rsqrt %232 : vector<16x1xf32>
    %234 = vector.broadcast %233 : vector<16x1xf32> to vector<16x32xf32>
    %235 = arith.mulf %230, %234 : vector<16x32xf32>
    %236 = vector.broadcast %216 : vector<1x32xf32> to vector<16x32xf32>
    %237 = arith.mulf %235, %236 : vector<16x32xf32>
    %238 = vector.broadcast %217 : vector<1x32xf32> to vector<16x32xf32>
    %239 = arith.addf %237, %238 : vector<16x32xf32>
    %240 = arith.truncf %239 : vector<16x32xf32> to vector<16x32xbf16>
    %c240 = arith.constant 240 : index
    %c0_80 = arith.constant 0 : index
    %241 = vector.load %arg2[%c240, %c0_80] : memref<624x128xbf16, #tpu.memory_space<vmem>>, vector<32x32xbf16>
    %cst_81 = arith.constant dense<0.000000e+00> : vector<16x32xf32>
    %242 = tpu.matmul %240, %241, %cst_81 {dimension_numbers = #tpu.dot_dimension_numbers<[1], [0], [0], [1], [0, 0, 1, 1], [], []>} : vector<16x32xbf16>, vector<32x32xbf16>, vector<16x32xf32> -> vector<16x32xf32>
    %c216 = arith.constant 216 : index
    %c0_82 = arith.constant 0 : index
    %243 = vector.load %arg3[%c216, %c0_82] : memref<400x128xf32, #tpu.memory_space<vmem>>, vector<1x32xf32>
    %244 = vector.broadcast %243 : vector<1x32xf32> to vector<16x32xf32>
    %245 = arith.addf %242, %244 : vector<16x32xf32>
    %c272 = arith.constant 272 : index
    %c0_83 = arith.constant 0 : index
    %246 = vector.load %arg2[%c272, %c0_83] : memref<624x128xbf16, #tpu.memory_space<vmem>>, vector<32x32xbf16>
    %cst_84 = arith.constant dense<0.000000e+00> : vector<16x32xf32>
    %247 = tpu.matmul %240, %246, %cst_84 {dimension_numbers = #tpu.dot_dimension_numbers<[1], [0], [0], [1], [0, 0, 1, 1], [], []>} : vector<16x32xbf16>, vector<32x32xbf16>, vector<16x32xf32> -> vector<16x32xf32>
    %c224 = arith.constant 224 : index
    %c0_85 = arith.constant 0 : index
    %248 = vector.load %arg3[%c224, %c0_85] : memref<400x128xf32, #tpu.memory_space<vmem>>, vector<1x32xf32>
    %249 = vector.broadcast %248 : vector<1x32xf32> to vector<16x32xf32>
    %250 = arith.addf %247, %249 : vector<16x32xf32>
    %c304 = arith.constant 304 : index
    %c0_86 = arith.constant 0 : index
    %251 = vector.load %arg2[%c304, %c0_86] : memref<624x128xbf16, #tpu.memory_space<vmem>>, vector<32x32xbf16>
    %cst_87 = arith.constant dense<0.000000e+00> : vector<16x32xf32>
    %252 = tpu.matmul %240, %251, %cst_87 {dimension_numbers = #tpu.dot_dimension_numbers<[1], [0], [0], [1], [0, 0, 1, 1], [], []>} : vector<16x32xbf16>, vector<32x32xbf16>, vector<16x32xf32> -> vector<16x32xf32>
    %c232 = arith.constant 232 : index
    %c0_88 = arith.constant 0 : index
    %253 = vector.load %arg3[%c232, %c0_88] : memref<400x128xf32, #tpu.memory_space<vmem>>, vector<1x32xf32>
    %254 = vector.broadcast %253 : vector<1x32xf32> to vector<16x32xf32>
    %255 = arith.addf %252, %254 : vector<16x32xf32>
    %256 = arith.truncf %250 : vector<16x32xf32> to vector<16x32xbf16>
    %cst_89 = arith.constant 0.000000e+00 : f32
    %257 = vector.broadcast %cst_89 : f32 to vector<16x32xf32>
    %258 = vector.extract_strided_slice %39 {offsets = [0, 0], sizes = [1, 32], strides = [1, 1]} : vector<4x32xf32> to vector<1x32xf32>
    %259 = vector.broadcast %258 : vector<1x32xf32> to vector<16x32xf32>
    %260 = arith.mulf %245, %259 : vector<16x32xf32>
    %261 = arith.truncf %260 : vector<16x32xf32> to vector<16x32xbf16>
    %262 = vector.broadcast %258 : vector<1x32xf32> to vector<16x32xf32>
    %263 = arith.mulf %255, %262 : vector<16x32xf32>
    %264 = arith.truncf %263 : vector<16x32xf32> to vector<16x32xbf16>
    %cst_90 = arith.constant dense<0.000000e+00> : vector<16x16xf32>
    %265 = tpu.matmul %261, %256, %cst_90 {dimension_numbers = #tpu.dot_dimension_numbers<[1], [1], [0], [0], [0, 0, 1, 0], [], []>} : vector<16x32xbf16>, vector<16x32xbf16>, vector<16x16xf32> -> vector<16x16xf32>
    %266 = arith.addf %265, %38 : vector<16x16xf32>
    %cst_91 = arith.constant dense<0xFF800000> : vector<16xf32>
    %267 = vector.multi_reduction <maximumf>, %266, %cst_91 [1] : vector<16x16xf32> to vector<16xf32>
    %268 = vector.shape_cast %267 : vector<16xf32> to vector<16x1xf32>
    %269 = vector.broadcast %268 : vector<16x1xf32> to vector<16x16xf32>
    %270 = arith.subf %266, %269 : vector<16x16xf32>
    %271 = math.exp %270 : vector<16x16xf32>
    %cst_92 = arith.constant dense<0.000000e+00> : vector<16xf32>
    %272 = vector.multi_reduction <add>, %271, %cst_92 [1] : vector<16x16xf32> to vector<16xf32>
    %273 = vector.shape_cast %272 : vector<16xf32> to vector<16x1xf32>
    %274 = tpu.reciprocal %273 {approx = true} : vector<16x1xf32> -> vector<16x1xf32>
    %275 = vector.broadcast %274 : vector<16x1xf32> to vector<16x16xf32>
    %276 = arith.mulf %271, %275 : vector<16x16xf32>
    %277 = arith.truncf %276 : vector<16x16xf32> to vector<16x16xbf16>
    %cst_93 = arith.constant dense<0.000000e+00> : vector<16x32xf32>
    %278 = tpu.matmul %277, %264, %cst_93 {dimension_numbers = #tpu.dot_dimension_numbers<[1], [0], [0], [1], [0, 0, 1, 1], [], []>} : vector<16x16xbf16>, vector<16x32xbf16>, vector<16x32xf32> -> vector<16x32xf32>
    %279 = arith.addf %257, %278 : vector<16x32xf32>
    %280 = vector.extract_strided_slice %39 {offsets = [1, 0], sizes = [1, 32], strides = [1, 1]} : vector<4x32xf32> to vector<1x32xf32>
    %281 = vector.broadcast %280 : vector<1x32xf32> to vector<16x32xf32>
    %282 = arith.mulf %245, %281 : vector<16x32xf32>
    %283 = arith.truncf %282 : vector<16x32xf32> to vector<16x32xbf16>
    %284 = vector.broadcast %280 : vector<1x32xf32> to vector<16x32xf32>
    %285 = arith.mulf %255, %284 : vector<16x32xf32>
    %286 = arith.truncf %285 : vector<16x32xf32> to vector<16x32xbf16>
    %cst_94 = arith.constant dense<0.000000e+00> : vector<16x16xf32>
    %287 = tpu.matmul %283, %256, %cst_94 {dimension_numbers = #tpu.dot_dimension_numbers<[1], [1], [0], [0], [0, 0, 1, 0], [], []>} : vector<16x32xbf16>, vector<16x32xbf16>, vector<16x16xf32> -> vector<16x16xf32>
    %288 = arith.addf %287, %38 : vector<16x16xf32>
    %cst_95 = arith.constant dense<0xFF800000> : vector<16xf32>
    %289 = vector.multi_reduction <maximumf>, %288, %cst_95 [1] : vector<16x16xf32> to vector<16xf32>
    %290 = vector.shape_cast %289 : vector<16xf32> to vector<16x1xf32>
    %291 = vector.broadcast %290 : vector<16x1xf32> to vector<16x16xf32>
    %292 = arith.subf %288, %291 : vector<16x16xf32>
    %293 = math.exp %292 : vector<16x16xf32>
    %cst_96 = arith.constant dense<0.000000e+00> : vector<16xf32>
    %294 = vector.multi_reduction <add>, %293, %cst_96 [1] : vector<16x16xf32> to vector<16xf32>
    %295 = vector.shape_cast %294 : vector<16xf32> to vector<16x1xf32>
    %296 = tpu.reciprocal %295 {approx = true} : vector<16x1xf32> -> vector<16x1xf32>
    %297 = vector.broadcast %296 : vector<16x1xf32> to vector<16x16xf32>
    %298 = arith.mulf %293, %297 : vector<16x16xf32>
    %299 = arith.truncf %298 : vector<16x16xf32> to vector<16x16xbf16>
    %cst_97 = arith.constant dense<0.000000e+00> : vector<16x32xf32>
    %300 = tpu.matmul %299, %286, %cst_97 {dimension_numbers = #tpu.dot_dimension_numbers<[1], [0], [0], [1], [0, 0, 1, 1], [], []>} : vector<16x16xbf16>, vector<16x32xbf16>, vector<16x32xf32> -> vector<16x32xf32>
    %301 = arith.addf %279, %300 : vector<16x32xf32>
    %302 = vector.extract_strided_slice %39 {offsets = [2, 0], sizes = [1, 32], strides = [1, 1]} : vector<4x32xf32> to vector<1x32xf32>
    %303 = vector.broadcast %302 : vector<1x32xf32> to vector<16x32xf32>
    %304 = arith.mulf %245, %303 : vector<16x32xf32>
    %305 = arith.truncf %304 : vector<16x32xf32> to vector<16x32xbf16>
    %306 = vector.broadcast %302 : vector<1x32xf32> to vector<16x32xf32>
    %307 = arith.mulf %255, %306 : vector<16x32xf32>
    %308 = arith.truncf %307 : vector<16x32xf32> to vector<16x32xbf16>
    %cst_98 = arith.constant dense<0.000000e+00> : vector<16x16xf32>
    %309 = tpu.matmul %305, %256, %cst_98 {dimension_numbers = #tpu.dot_dimension_numbers<[1], [1], [0], [0], [0, 0, 1, 0], [], []>} : vector<16x32xbf16>, vector<16x32xbf16>, vector<16x16xf32> -> vector<16x16xf32>
    %310 = arith.addf %309, %38 : vector<16x16xf32>
    %cst_99 = arith.constant dense<0xFF800000> : vector<16xf32>
    %311 = vector.multi_reduction <maximumf>, %310, %cst_99 [1] : vector<16x16xf32> to vector<16xf32>
    %312 = vector.shape_cast %311 : vector<16xf32> to vector<16x1xf32>
    %313 = vector.broadcast %312 : vector<16x1xf32> to vector<16x16xf32>
    %314 = arith.subf %310, %313 : vector<16x16xf32>
    %315 = math.exp %314 : vector<16x16xf32>
    %cst_100 = arith.constant dense<0.000000e+00> : vector<16xf32>
    %316 = vector.multi_reduction <add>, %315, %cst_100 [1] : vector<16x16xf32> to vector<16xf32>
    %317 = vector.shape_cast %316 : vector<16xf32> to vector<16x1xf32>
    %318 = tpu.reciprocal %317 {approx = true} : vector<16x1xf32> -> vector<16x1xf32>
    %319 = vector.broadcast %318 : vector<16x1xf32> to vector<16x16xf32>
    %320 = arith.mulf %315, %319 : vector<16x16xf32>
    %321 = arith.truncf %320 : vector<16x16xf32> to vector<16x16xbf16>
    %cst_101 = arith.constant dense<0.000000e+00> : vector<16x32xf32>
    %322 = tpu.matmul %321, %308, %cst_101 {dimension_numbers = #tpu.dot_dimension_numbers<[1], [0], [0], [1], [0, 0, 1, 1], [], []>} : vector<16x16xbf16>, vector<16x32xbf16>, vector<16x32xf32> -> vector<16x32xf32>
    %323 = arith.addf %301, %322 : vector<16x32xf32>
    %324 = vector.extract_strided_slice %39 {offsets = [3, 0], sizes = [1, 32], strides = [1, 1]} : vector<4x32xf32> to vector<1x32xf32>
    %325 = vector.broadcast %324 : vector<1x32xf32> to vector<16x32xf32>
    %326 = arith.mulf %245, %325 : vector<16x32xf32>
    %327 = arith.truncf %326 : vector<16x32xf32> to vector<16x32xbf16>
    %328 = vector.broadcast %324 : vector<1x32xf32> to vector<16x32xf32>
    %329 = arith.mulf %255, %328 : vector<16x32xf32>
    %330 = arith.truncf %329 : vector<16x32xf32> to vector<16x32xbf16>
    %cst_102 = arith.constant dense<0.000000e+00> : vector<16x16xf32>
    %331 = tpu.matmul %327, %256, %cst_102 {dimension_numbers = #tpu.dot_dimension_numbers<[1], [1], [0], [0], [0, 0, 1, 0], [], []>} : vector<16x32xbf16>, vector<16x32xbf16>, vector<16x16xf32> -> vector<16x16xf32>
    %332 = arith.addf %331, %38 : vector<16x16xf32>
    %cst_103 = arith.constant dense<0xFF800000> : vector<16xf32>
    %333 = vector.multi_reduction <maximumf>, %332, %cst_103 [1] : vector<16x16xf32> to vector<16xf32>
    %334 = vector.shape_cast %333 : vector<16xf32> to vector<16x1xf32>
    %335 = vector.broadcast %334 : vector<16x1xf32> to vector<16x16xf32>
    %336 = arith.subf %332, %335 : vector<16x16xf32>
    %337 = math.exp %336 : vector<16x16xf32>
    %cst_104 = arith.constant dense<0.000000e+00> : vector<16xf32>
    %338 = vector.multi_reduction <add>, %337, %cst_104 [1] : vector<16x16xf32> to vector<16xf32>
    %339 = vector.shape_cast %338 : vector<16xf32> to vector<16x1xf32>
    %340 = tpu.reciprocal %339 {approx = true} : vector<16x1xf32> -> vector<16x1xf32>
    %341 = vector.broadcast %340 : vector<16x1xf32> to vector<16x16xf32>
    %342 = arith.mulf %337, %341 : vector<16x16xf32>
    %343 = arith.truncf %342 : vector<16x16xf32> to vector<16x16xbf16>
    %cst_105 = arith.constant dense<0.000000e+00> : vector<16x32xf32>
    %344 = tpu.matmul %343, %330, %cst_105 {dimension_numbers = #tpu.dot_dimension_numbers<[1], [0], [0], [1], [0, 0, 1, 1], [], []>} : vector<16x16xbf16>, vector<16x32xbf16>, vector<16x32xf32> -> vector<16x32xf32>
    %345 = arith.addf %323, %344 : vector<16x32xf32>
    %c336 = arith.constant 336 : index
    %c0_106 = arith.constant 0 : index
    %346 = vector.load %arg2[%c336, %c0_106] : memref<624x128xbf16, #tpu.memory_space<vmem>>, vector<32x32xbf16>
    %347 = arith.truncf %345 : vector<16x32xf32> to vector<16x32xbf16>
    %cst_107 = arith.constant dense<0.000000e+00> : vector<16x32xf32>
    %348 = tpu.matmul %347, %346, %cst_107 {dimension_numbers = #tpu.dot_dimension_numbers<[1], [0], [0], [1], [0, 0, 1, 1], [], []>} : vector<16x32xbf16>, vector<32x32xbf16>, vector<16x32xf32> -> vector<16x32xf32>
    %349 = arith.addf %215, %348 : vector<16x32xf32>
    %c240_108 = arith.constant 240 : index
    %c0_109 = arith.constant 0 : index
    %350 = vector.load %arg3[%c240_108, %c0_109] : memref<400x128xf32, #tpu.memory_space<vmem>>, vector<1x32xf32>
    %351 = vector.broadcast %350 : vector<1x32xf32> to vector<16x32xf32>
    %352 = arith.addf %349, %351 : vector<16x32xf32>
    %c264 = arith.constant 264 : index
    %c0_110 = arith.constant 0 : index
    %353 = vector.load %arg3[%c264, %c0_110] : memref<400x128xf32, #tpu.memory_space<vmem>>, vector<1x32xf32>
    %c272_111 = arith.constant 272 : index
    %c0_112 = arith.constant 0 : index
    %354 = vector.load %arg3[%c272_111, %c0_112] : memref<400x128xf32, #tpu.memory_space<vmem>>, vector<1x32xf32>
    %cst_113 = arith.constant dense<0.000000e+00> : vector<16xf32>
    %355 = vector.multi_reduction <add>, %352, %cst_113 [1] : vector<16x32xf32> to vector<16xf32>
    %356 = vector.shape_cast %355 : vector<16xf32> to vector<16x1xf32>
    %cst_114 = arith.constant 3.200000e+01 : f32
    %357 = vector.broadcast %cst_114 : f32 to vector<16x1xf32>
    %358 = arith.divf %356, %357 : vector<16x1xf32>
    %359 = vector.broadcast %358 : vector<16x1xf32> to vector<16x32xf32>
    %360 = arith.subf %352, %359 : vector<16x32xf32>
    %361 = arith.mulf %360, %360 : vector<16x32xf32>
    %cst_115 = arith.constant dense<0.000000e+00> : vector<16xf32>
    %362 = vector.multi_reduction <add>, %361, %cst_115 [1] : vector<16x32xf32> to vector<16xf32>
    %363 = vector.shape_cast %362 : vector<16xf32> to vector<16x1xf32>
    %cst_116 = arith.constant 3.200000e+01 : f32
    %364 = vector.broadcast %cst_116 : f32 to vector<16x1xf32>
    %365 = arith.divf %363, %364 : vector<16x1xf32>
    %366 = vector.broadcast %358 : vector<16x1xf32> to vector<16x32xf32>
    %367 = arith.subf %352, %366 : vector<16x32xf32>
    %cst_117 = arith.constant 9.99999974E-6 : f32
    %368 = vector.broadcast %cst_117 : f32 to vector<16x1xf32>
    %369 = arith.addf %365, %368 : vector<16x1xf32>
    %370 = math.rsqrt %369 : vector<16x1xf32>
    %371 = vector.broadcast %370 : vector<16x1xf32> to vector<16x32xf32>
    %372 = arith.mulf %367, %371 : vector<16x32xf32>
    %373 = vector.broadcast %353 : vector<1x32xf32> to vector<16x32xf32>
    %374 = arith.mulf %372, %373 : vector<16x32xf32>
    %375 = vector.broadcast %354 : vector<1x32xf32> to vector<16x32xf32>
    %376 = arith.addf %374, %375 : vector<16x32xf32>
    %c368 = arith.constant 368 : index
    %c0_118 = arith.constant 0 : index
    %377 = vector.load %arg2[%c368, %c0_118] : memref<624x128xbf16, #tpu.memory_space<vmem>>, vector<32x64xbf16>
    %378 = arith.truncf %376 : vector<16x32xf32> to vector<16x32xbf16>
    %cst_119 = arith.constant dense<0.000000e+00> : vector<16x64xf32>
    %379 = tpu.matmul %378, %377, %cst_119 {dimension_numbers = #tpu.dot_dimension_numbers<[1], [0], [0], [1], [0, 0, 1, 1], [], []>} : vector<16x32xbf16>, vector<32x64xbf16>, vector<16x64xf32> -> vector<16x64xf32>
    %c280 = arith.constant 280 : index
    %c0_120 = arith.constant 0 : index
    %380 = vector.load %arg3[%c280, %c0_120] : memref<400x128xf32, #tpu.memory_space<vmem>>, vector<1x64xf32>
    %381 = vector.broadcast %380 : vector<1x64xf32> to vector<16x64xf32>
    %382 = arith.addf %379, %381 : vector<16x64xf32>
    %cst_121 = arith.constant 0.000000e+00 : f32
    %383 = vector.broadcast %cst_121 : f32 to vector<16x64xf32>
    %384 = arith.maximumf %382, %383 : vector<16x64xf32>
    %c400 = arith.constant 400 : index
    %c0_122 = arith.constant 0 : index
    %385 = vector.load %arg2[%c400, %c0_122] : memref<624x128xbf16, #tpu.memory_space<vmem>>, vector<64x32xbf16>
    %386 = arith.truncf %384 : vector<16x64xf32> to vector<16x64xbf16>
    %cst_123 = arith.constant dense<0.000000e+00> : vector<16x32xf32>
    %387 = tpu.matmul %386, %385, %cst_123 {dimension_numbers = #tpu.dot_dimension_numbers<[1], [0], [0], [1], [0, 0, 1, 1], [], []>} : vector<16x64xbf16>, vector<64x32xbf16>, vector<16x32xf32> -> vector<16x32xf32>
    %388 = arith.addf %352, %387 : vector<16x32xf32>
    %c288 = arith.constant 288 : index
    %c0_124 = arith.constant 0 : index
    %389 = vector.load %arg3[%c288, %c0_124] : memref<400x128xf32, #tpu.memory_space<vmem>>, vector<1x32xf32>
    %390 = vector.broadcast %389 : vector<1x32xf32> to vector<16x32xf32>
    %391 = arith.addf %388, %390 : vector<16x32xf32>
    %c96 = arith.constant 96 : index
    %c0_125 = arith.constant 0 : index
    %392 = vector.load %arg3[%c96, %c0_125] : memref<400x128xf32, #tpu.memory_space<vmem>>, vector<1x32xf32>
    %393 = vector.broadcast %392 : vector<1x32xf32> to vector<16x32xf32>
    %394 = arith.mulf %391, %393 : vector<16x32xf32>
    %cst_126 = arith.constant dense<0.000000e+00> : vector<16xf32>
    %395 = vector.multi_reduction <add>, %394, %cst_126 [1] : vector<16x32xf32> to vector<16xf32>
    %396 = vector.shape_cast %395 : vector<16xf32> to vector<16x1xf32>
    %c104 = arith.constant 104 : index
    %c0_127 = arith.constant 0 : index
    %397 = vector.load %arg3[%c104, %c0_127] : memref<400x128xf32, #tpu.memory_space<vmem>>, vector<1x1xf32>
    %398 = vector.broadcast %397 : vector<1x1xf32> to vector<16x1xf32>
    %399 = arith.addf %396, %398 : vector<16x1xf32>
    %cst_128 = arith.constant dense<0xFF800000> : vector<1xf32>
    %400 = vector.multi_reduction <maximumf>, %399, %cst_128 [0] : vector<16x1xf32> to vector<1xf32>
    %401 = vector.shape_cast %400 : vector<1xf32> to vector<1x1xf32>
    %402 = vector.broadcast %401 : vector<1x1xf32> to vector<16x1xf32>
    %403 = arith.subf %399, %402 : vector<16x1xf32>
    %cst_129 = arith.constant -6.000000e+01 : f32
    %404 = vector.broadcast %cst_129 : f32 to vector<16x1xf32>
    %405 = arith.maximumf %403, %404 : vector<16x1xf32>
    %406 = math.exp %405 : vector<16x1xf32>
    %c88 = arith.constant 88 : index
    %c0_130 = arith.constant 0 : index
    %407 = vector.load %arg3[%c88, %c0_130] : memref<400x128xf32, #tpu.memory_space<vmem>>, vector<2x16xf32>
    %408 = vector.broadcast %406 : vector<16x1xf32> to vector<16x32xf32>
    %409 = arith.mulf %408, %391 : vector<16x32xf32>
    %cst_131 = arith.constant dense<0.000000e+00> : vector<2x32xf32>
    %410 = tpu.matmul %407, %409, %cst_131 {dimension_numbers = #tpu.dot_dimension_numbers<[1], [0], [0], [1], [0, 0, 1, 1], [], []>} : vector<2x16xf32>, vector<16x32xf32>, vector<2x32xf32> -> vector<2x32xf32>
    %cst_132 = arith.constant dense<0.000000e+00> : vector<2x1xf32>
    %411 = tpu.matmul %407, %406, %cst_132 {dimension_numbers = #tpu.dot_dimension_numbers<[1], [0], [0], [1], [0, 0, 1, 1], [], []>} : vector<2x16xf32>, vector<16x1xf32>, vector<2x1xf32> -> vector<2x1xf32>
    %412 = tpu.reciprocal %411 {approx = true} : vector<2x1xf32> -> vector<2x1xf32>
    %413 = vector.broadcast %412 : vector<2x1xf32> to vector<2x32xf32>
    %414 = arith.mulf %410, %413 : vector<2x32xf32>
    %c0_133 = arith.constant 0 : index
    %c0_134 = arith.constant 0 : index
    %415 = vector.load %arg1[%c0_133, %c0_134] : memref<2x8xf32, #tpu.memory_space<vmem>>, vector<2x8xf32>
    %c464 = arith.constant 464 : index
    %c0_135 = arith.constant 0 : index
    %416 = vector.load %arg2[%c464, %c0_135] : memref<624x128xbf16, #tpu.memory_space<vmem>>, vector<8x32xbf16>
    %417 = arith.truncf %415 : vector<2x8xf32> to vector<2x8xbf16>
    %cst_136 = arith.constant dense<0.000000e+00> : vector<2x32xf32>
    %418 = tpu.matmul %417, %416, %cst_136 {dimension_numbers = #tpu.dot_dimension_numbers<[1], [0], [0], [1], [0, 0, 1, 1], [], []>} : vector<2x8xbf16>, vector<8x32xbf16>, vector<2x32xf32> -> vector<2x32xf32>
    %c296 = arith.constant 296 : index
    %c0_137 = arith.constant 0 : index
    %419 = vector.load %arg3[%c296, %c0_137] : memref<400x128xf32, #tpu.memory_space<vmem>>, vector<1x32xf32>
    %420 = vector.broadcast %419 : vector<1x32xf32> to vector<2x32xf32>
    %421 = arith.addf %418, %420 : vector<2x32xf32>
    %c304_138 = arith.constant 304 : index
    %c0_139 = arith.constant 0 : index
    %422 = vector.load %arg3[%c304_138, %c0_139] : memref<400x128xf32, #tpu.memory_space<vmem>>, vector<1x32xf32>
    %c312 = arith.constant 312 : index
    %c0_140 = arith.constant 0 : index
    %423 = vector.load %arg3[%c312, %c0_140] : memref<400x128xf32, #tpu.memory_space<vmem>>, vector<1x32xf32>
    %cst_141 = arith.constant dense<0.000000e+00> : vector<2xf32>
    %424 = vector.multi_reduction <add>, %421, %cst_141 [1] : vector<2x32xf32> to vector<2xf32>
    %425 = vector.shape_cast %424 : vector<2xf32> to vector<2x1xf32>
    %cst_142 = arith.constant 3.200000e+01 : f32
    %426 = vector.broadcast %cst_142 : f32 to vector<2x1xf32>
    %427 = arith.divf %425, %426 : vector<2x1xf32>
    %428 = vector.broadcast %427 : vector<2x1xf32> to vector<2x32xf32>
    %429 = arith.subf %421, %428 : vector<2x32xf32>
    %430 = arith.mulf %429, %429 : vector<2x32xf32>
    %cst_143 = arith.constant dense<0.000000e+00> : vector<2xf32>
    %431 = vector.multi_reduction <add>, %430, %cst_143 [1] : vector<2x32xf32> to vector<2xf32>
    %432 = vector.shape_cast %431 : vector<2xf32> to vector<2x1xf32>
    %cst_144 = arith.constant 3.200000e+01 : f32
    %433 = vector.broadcast %cst_144 : f32 to vector<2x1xf32>
    %434 = arith.divf %432, %433 : vector<2x1xf32>
    %435 = vector.broadcast %427 : vector<2x1xf32> to vector<2x32xf32>
    %436 = arith.subf %421, %435 : vector<2x32xf32>
    %cst_145 = arith.constant 9.99999974E-6 : f32
    %437 = vector.broadcast %cst_145 : f32 to vector<2x1xf32>
    %438 = arith.addf %434, %437 : vector<2x1xf32>
    %439 = math.rsqrt %438 : vector<2x1xf32>
    %440 = vector.broadcast %439 : vector<2x1xf32> to vector<2x32xf32>
    %441 = arith.mulf %436, %440 : vector<2x32xf32>
    %442 = vector.broadcast %422 : vector<1x32xf32> to vector<2x32xf32>
    %443 = arith.mulf %441, %442 : vector<2x32xf32>
    %444 = vector.broadcast %423 : vector<1x32xf32> to vector<2x32xf32>
    %445 = arith.addf %443, %444 : vector<2x32xf32>
    %cst_146 = arith.constant 5.000000e-01 : f32
    %446 = vector.broadcast %cst_146 : f32 to vector<2x32xf32>
    %447 = arith.mulf %446, %445 : vector<2x32xf32>
    %cst_147 = arith.constant 0.707106769 : f32
    %448 = vector.broadcast %cst_147 : f32 to vector<2x32xf32>
    %449 = arith.mulf %445, %448 : vector<2x32xf32>
    %450 = math.erf %449 : vector<2x32xf32>
    %cst_148 = arith.constant 1.000000e+00 : f32
    %451 = vector.broadcast %cst_148 : f32 to vector<2x32xf32>
    %452 = arith.addf %451, %450 : vector<2x32xf32>
    %453 = arith.mulf %447, %452 : vector<2x32xf32>
    %c480 = arith.constant 480 : index
    %c0_149 = arith.constant 0 : index
    %454 = vector.load %arg2[%c480, %c0_149] : memref<624x128xbf16, #tpu.memory_space<vmem>>, vector<32x32xbf16>
    %455 = arith.truncf %453 : vector<2x32xf32> to vector<2x32xbf16>
    %cst_150 = arith.constant dense<0.000000e+00> : vector<2x32xf32>
    %456 = tpu.matmul %455, %454, %cst_150 {dimension_numbers = #tpu.dot_dimension_numbers<[1], [0], [0], [1], [0, 0, 1, 1], [], []>} : vector<2x32xbf16>, vector<32x32xbf16>, vector<2x32xf32> -> vector<2x32xf32>
    %c320 = arith.constant 320 : index
    %c0_151 = arith.constant 0 : index
    %457 = vector.load %arg3[%c320, %c0_151] : memref<400x128xf32, #tpu.memory_space<vmem>>, vector<1x32xf32>
    %458 = vector.broadcast %457 : vector<1x32xf32> to vector<2x32xf32>
    %459 = arith.addf %456, %458 : vector<2x32xf32>
    %c328 = arith.constant 328 : index
    %c0_152 = arith.constant 0 : index
    %460 = vector.load %arg3[%c328, %c0_152] : memref<400x128xf32, #tpu.memory_space<vmem>>, vector<1x32xf32>
    %c336_153 = arith.constant 336 : index
    %c0_154 = arith.constant 0 : index
    %461 = vector.load %arg3[%c336_153, %c0_154] : memref<400x128xf32, #tpu.memory_space<vmem>>, vector<1x32xf32>
    %cst_155 = arith.constant dense<0.000000e+00> : vector<2xf32>
    %462 = vector.multi_reduction <add>, %459, %cst_155 [1] : vector<2x32xf32> to vector<2xf32>
    %463 = vector.shape_cast %462 : vector<2xf32> to vector<2x1xf32>
    %cst_156 = arith.constant 3.200000e+01 : f32
    %464 = vector.broadcast %cst_156 : f32 to vector<2x1xf32>
    %465 = arith.divf %463, %464 : vector<2x1xf32>
    %466 = vector.broadcast %465 : vector<2x1xf32> to vector<2x32xf32>
    %467 = arith.subf %459, %466 : vector<2x32xf32>
    %468 = arith.mulf %467, %467 : vector<2x32xf32>
    %cst_157 = arith.constant dense<0.000000e+00> : vector<2xf32>
    %469 = vector.multi_reduction <add>, %468, %cst_157 [1] : vector<2x32xf32> to vector<2xf32>
    %470 = vector.shape_cast %469 : vector<2xf32> to vector<2x1xf32>
    %cst_158 = arith.constant 3.200000e+01 : f32
    %471 = vector.broadcast %cst_158 : f32 to vector<2x1xf32>
    %472 = arith.divf %470, %471 : vector<2x1xf32>
    %473 = vector.broadcast %465 : vector<2x1xf32> to vector<2x32xf32>
    %474 = arith.subf %459, %473 : vector<2x32xf32>
    %cst_159 = arith.constant 9.99999974E-6 : f32
    %475 = vector.broadcast %cst_159 : f32 to vector<2x1xf32>
    %476 = arith.addf %472, %475 : vector<2x1xf32>
    %477 = math.rsqrt %476 : vector<2x1xf32>
    %478 = vector.broadcast %477 : vector<2x1xf32> to vector<2x32xf32>
    %479 = arith.mulf %474, %478 : vector<2x32xf32>
    %480 = vector.broadcast %460 : vector<1x32xf32> to vector<2x32xf32>
    %481 = arith.mulf %479, %480 : vector<2x32xf32>
    %482 = vector.broadcast %461 : vector<1x32xf32> to vector<2x32xf32>
    %483 = arith.addf %481, %482 : vector<2x32xf32>
    %c512 = arith.constant 512 : index
    %c0_160 = arith.constant 0 : index
    %484 = vector.load %arg2[%c512, %c0_160] : memref<624x128xbf16, #tpu.memory_space<vmem>>, vector<32x32xbf16>
    %485 = arith.truncf %414 : vector<2x32xf32> to vector<2x32xbf16>
    %cst_161 = arith.constant dense<0.000000e+00> : vector<2x32xf32>
    %486 = tpu.matmul %485, %484, %cst_161 {dimension_numbers = #tpu.dot_dimension_numbers<[1], [0], [0], [1], [0, 0, 1, 1], [], []>} : vector<2x32xbf16>, vector<32x32xbf16>, vector<2x32xf32> -> vector<2x32xf32>
    %c544 = arith.constant 544 : index
    %c0_162 = arith.constant 0 : index
    %487 = vector.load %arg2[%c544, %c0_162] : memref<624x128xbf16, #tpu.memory_space<vmem>>, vector<32x32xbf16>
    %488 = arith.truncf %483 : vector<2x32xf32> to vector<2x32xbf16>
    %cst_163 = arith.constant dense<0.000000e+00> : vector<2x32xf32>
    %489 = tpu.matmul %488, %487, %cst_163 {dimension_numbers = #tpu.dot_dimension_numbers<[1], [0], [0], [1], [0, 0, 1, 1], [], []>} : vector<2x32xbf16>, vector<32x32xbf16>, vector<2x32xf32> -> vector<2x32xf32>
    %490 = arith.addf %486, %489 : vector<2x32xf32>
    %c344 = arith.constant 344 : index
    %c0_164 = arith.constant 0 : index
    %491 = vector.load %arg3[%c344, %c0_164] : memref<400x128xf32, #tpu.memory_space<vmem>>, vector<1x32xf32>
    %492 = vector.broadcast %491 : vector<1x32xf32> to vector<2x32xf32>
    %493 = arith.addf %490, %492 : vector<2x32xf32>
    %c352 = arith.constant 352 : index
    %c0_165 = arith.constant 0 : index
    %494 = vector.load %arg3[%c352, %c0_165] : memref<400x128xf32, #tpu.memory_space<vmem>>, vector<1x32xf32>
    %c360 = arith.constant 360 : index
    %c0_166 = arith.constant 0 : index
    %495 = vector.load %arg3[%c360, %c0_166] : memref<400x128xf32, #tpu.memory_space<vmem>>, vector<1x32xf32>
    %cst_167 = arith.constant dense<0.000000e+00> : vector<2xf32>
    %496 = vector.multi_reduction <add>, %493, %cst_167 [1] : vector<2x32xf32> to vector<2xf32>
    %497 = vector.shape_cast %496 : vector<2xf32> to vector<2x1xf32>
    %cst_168 = arith.constant 3.200000e+01 : f32
    %498 = vector.broadcast %cst_168 : f32 to vector<2x1xf32>
    %499 = arith.divf %497, %498 : vector<2x1xf32>
    %500 = vector.broadcast %499 : vector<2x1xf32> to vector<2x32xf32>
    %501 = arith.subf %493, %500 : vector<2x32xf32>
    %502 = arith.mulf %501, %501 : vector<2x32xf32>
    %cst_169 = arith.constant dense<0.000000e+00> : vector<2xf32>
    %503 = vector.multi_reduction <add>, %502, %cst_169 [1] : vector<2x32xf32> to vector<2xf32>
    %504 = vector.shape_cast %503 : vector<2xf32> to vector<2x1xf32>
    %cst_170 = arith.constant 3.200000e+01 : f32
    %505 = vector.broadcast %cst_170 : f32 to vector<2x1xf32>
    %506 = arith.divf %504, %505 : vector<2x1xf32>
    %507 = vector.broadcast %499 : vector<2x1xf32> to vector<2x32xf32>
    %508 = arith.subf %493, %507 : vector<2x32xf32>
    %cst_171 = arith.constant 9.99999974E-6 : f32
    %509 = vector.broadcast %cst_171 : f32 to vector<2x1xf32>
    %510 = arith.addf %506, %509 : vector<2x1xf32>
    %511 = math.rsqrt %510 : vector<2x1xf32>
    %512 = vector.broadcast %511 : vector<2x1xf32> to vector<2x32xf32>
    %513 = arith.mulf %508, %512 : vector<2x32xf32>
    %514 = vector.broadcast %494 : vector<1x32xf32> to vector<2x32xf32>
    %515 = arith.mulf %513, %514 : vector<2x32xf32>
    %516 = vector.broadcast %495 : vector<1x32xf32> to vector<2x32xf32>
    %517 = arith.addf %515, %516 : vector<2x32xf32>
    %cst_172 = arith.constant 5.000000e-01 : f32
    %518 = vector.broadcast %cst_172 : f32 to vector<2x32xf32>
    %519 = arith.mulf %518, %517 : vector<2x32xf32>
    %cst_173 = arith.constant 0.707106769 : f32
    %520 = vector.broadcast %cst_173 : f32 to vector<2x32xf32>
    %521 = arith.mulf %517, %520 : vector<2x32xf32>
    %522 = math.erf %521 : vector<2x32xf32>
    %cst_174 = arith.constant 1.000000e+00 : f32
    %523 = vector.broadcast %cst_174 : f32 to vector<2x32xf32>
    %524 = arith.addf %523, %522 : vector<2x32xf32>
    %525 = arith.mulf %519, %524 : vector<2x32xf32>
    %c576 = arith.constant 576 : index
    %c0_175 = arith.constant 0 : index
    %526 = vector.load %arg2[%c576, %c0_175] : memref<624x128xbf16, #tpu.memory_space<vmem>>, vector<32x16xbf16>
    %527 = arith.truncf %525 : vector<2x32xf32> to vector<2x32xbf16>
    %cst_176 = arith.constant dense<0.000000e+00> : vector<2x16xf32>
    %528 = tpu.matmul %527, %526, %cst_176 {dimension_numbers = #tpu.dot_dimension_numbers<[1], [0], [0], [1], [0, 0, 1, 1], [], []>} : vector<2x32xbf16>, vector<32x16xbf16>, vector<2x16xf32> -> vector<2x16xf32>
    %c368_177 = arith.constant 368 : index
    %c0_178 = arith.constant 0 : index
    %529 = vector.load %arg3[%c368_177, %c0_178] : memref<400x128xf32, #tpu.memory_space<vmem>>, vector<1x16xf32>
    %530 = vector.broadcast %529 : vector<1x16xf32> to vector<2x16xf32>
    %531 = arith.addf %528, %530 : vector<2x16xf32>
    %c376 = arith.constant 376 : index
    %c0_179 = arith.constant 0 : index
    %532 = vector.load %arg3[%c376, %c0_179] : memref<400x128xf32, #tpu.memory_space<vmem>>, vector<1x16xf32>
    %c384 = arith.constant 384 : index
    %c0_180 = arith.constant 0 : index
    %533 = vector.load %arg3[%c384, %c0_180] : memref<400x128xf32, #tpu.memory_space<vmem>>, vector<1x16xf32>
    %cst_181 = arith.constant dense<0.000000e+00> : vector<2xf32>
    %534 = vector.multi_reduction <add>, %531, %cst_181 [1] : vector<2x16xf32> to vector<2xf32>
    %535 = vector.shape_cast %534 : vector<2xf32> to vector<2x1xf32>
    %cst_182 = arith.constant 1.600000e+01 : f32
    %536 = vector.broadcast %cst_182 : f32 to vector<2x1xf32>
    %537 = arith.divf %535, %536 : vector<2x1xf32>
    %538 = vector.broadcast %537 : vector<2x1xf32> to vector<2x16xf32>
    %539 = arith.subf %531, %538 : vector<2x16xf32>
    %540 = arith.mulf %539, %539 : vector<2x16xf32>
    %cst_183 = arith.constant dense<0.000000e+00> : vector<2xf32>
    %541 = vector.multi_reduction <add>, %540, %cst_183 [1] : vector<2x16xf32> to vector<2xf32>
    %542 = vector.shape_cast %541 : vector<2xf32> to vector<2x1xf32>
    %cst_184 = arith.constant 1.600000e+01 : f32
    %543 = vector.broadcast %cst_184 : f32 to vector<2x1xf32>
    %544 = arith.divf %542, %543 : vector<2x1xf32>
    %545 = vector.broadcast %537 : vector<2x1xf32> to vector<2x16xf32>
    %546 = arith.subf %531, %545 : vector<2x16xf32>
    %cst_185 = arith.constant 9.99999974E-6 : f32
    %547 = vector.broadcast %cst_185 : f32 to vector<2x1xf32>
    %548 = arith.addf %544, %547 : vector<2x1xf32>
    %549 = math.rsqrt %548 : vector<2x1xf32>
    %550 = vector.broadcast %549 : vector<2x1xf32> to vector<2x16xf32>
    %551 = arith.mulf %546, %550 : vector<2x16xf32>
    %552 = vector.broadcast %532 : vector<1x16xf32> to vector<2x16xf32>
    %553 = arith.mulf %551, %552 : vector<2x16xf32>
    %554 = vector.broadcast %533 : vector<1x16xf32> to vector<2x16xf32>
    %555 = arith.addf %553, %554 : vector<2x16xf32>
    %cst_186 = arith.constant 5.000000e-01 : f32
    %556 = vector.broadcast %cst_186 : f32 to vector<2x16xf32>
    %557 = arith.mulf %556, %555 : vector<2x16xf32>
    %cst_187 = arith.constant 0.707106769 : f32
    %558 = vector.broadcast %cst_187 : f32 to vector<2x16xf32>
    %559 = arith.mulf %555, %558 : vector<2x16xf32>
    %560 = math.erf %559 : vector<2x16xf32>
    %cst_188 = arith.constant 1.000000e+00 : f32
    %561 = vector.broadcast %cst_188 : f32 to vector<2x16xf32>
    %562 = arith.addf %561, %560 : vector<2x16xf32>
    %563 = arith.mulf %557, %562 : vector<2x16xf32>
    %c608 = arith.constant 608 : index
    %c0_189 = arith.constant 0 : index
    %564 = vector.load %arg2[%c608, %c0_189] : memref<624x128xbf16, #tpu.memory_space<vmem>>, vector<16x34xbf16>
    %565 = arith.truncf %563 : vector<2x16xf32> to vector<2x16xbf16>
    %cst_190 = arith.constant dense<0.000000e+00> : vector<2x34xf32>
    %566 = tpu.matmul %565, %564, %cst_190 {dimension_numbers = #tpu.dot_dimension_numbers<[1], [0], [0], [1], [0, 0, 1, 1], [], []>} : vector<2x16xbf16>, vector<16x34xbf16>, vector<2x34xf32> -> vector<2x34xf32>
    %c392 = arith.constant 392 : index
    %c0_191 = arith.constant 0 : index
    %567 = vector.load %arg3[%c392, %c0_191] : memref<400x128xf32, #tpu.memory_space<vmem>>, vector<1x34xf32>
    %568 = vector.broadcast %567 : vector<1x34xf32> to vector<2x34xf32>
    %569 = arith.addf %566, %568 : vector<2x34xf32>
    %c0_192 = arith.constant 0 : index
    %c0_193 = arith.constant 0 : index
    %570 = vector.load %arg4[%c0_192, %c0_193] : memref<2x34xf32, #tpu.memory_space<vmem>>, vector<2x34xf32>
    tpu.vector_store %arg4[%c0_192, %c0_193], %569 {strides = array<i32>} : memref<2x34xf32, #tpu.memory_space<vmem>>, vector<2x34xf32>,
    return
  }
}

</mosaic_0001>

<bundles_post_ra>
// kernel: mahjong_transformer_forward.1
= control target key start
LH: loop header
LB: loop body
LE: loop exit
PB: predicated region body
PF: predicated region fallthrough
CT: control target
= control target key end

     0   :  { %9 = vsyncpa [#allocation3], 0  ;;  %s4178_s0 = inlined_call_operand.hbm [shape: f32[16,16], index: 0, kind: input, shape index: {}]   ;;  %s4179_s1 = inlined_call_operand.vmem [shape: f32[2,8], index: 1, kind: input, shape index: {}]   ;;  %s4180_s2 = inlined_call_operand.hbm [shape: bf16[624,128], index: 2, kind: input, shape index: {}]   ;;  %s4181_s3 = inlined_call_operand.hbm [shape: f32[400,128], index: 3, kind: input, shape index: {}]   ;;  %s4182_s4 = inlined_call_operand.hbm [shape: f32[2,34], index: 4, kind: output, shape index: {}]  }
   0x1   :  { %10 = vsyncpa [#allocation6], 0 }
   0x2   :  { %11 = vsyncpa [#allocation4], 0  ;;  %s3704_s15 = smov [#allocation5]   ;;  %s3610_s19 = scalar_lea.hbm %s4180_s2, 4992 }
   0x3   :  { %s31_s16 = sshll.u32 %s3704_s15, 4  ;;  %p3611_p0 = scmp.ne.s32.totalorder %s4180_s2, %s3610_s19  ;;  %s32_s16 = int_to_ptr.vmem [resolvable:$true] %s31_s16 }
   0x4   :  { %p3614_p1 = scmp.lt.u32.totalorder %s3610_s19, %s4180_s2 }
   0x6   :  { %p3616_p2 = pnand %p3614_p1, %p3611_p0 }
   0x8   :  { %3619 = shalt.err (!%p3616_p2)
}
   0x9   :  { %s3620_s24 = scalar_lea.vmem %s32_s16, 4992  ;;  %p3625_p4 = scmp.lt.s32.totalorder %s32_s16, %s32_s16 }
   0xa   :  { %p3621_p3 = scmp.ne.s32.totalorder %s32_s16, %s3620_s24  ;;  %p3626_p5 = scmp.lt.s32.totalorder %s3620_s24, %s3620_s24 }
   0xc   :  { %p3627_p6 = por %p3626_p5, %p3625_p4 }
   0xe   :  { %p3628_p7 = pnand %p3627_p6, %p3621_p3 }
  0x10   :  { %3631 = shalt.err (!%p3628_p7)
}
  0x11   :  { %s3705_s25 = smov 64   ;;  %s3706_s26 = smov 4  }
  0x12   :  { %37 = dma.hbm_to_vmem [thread:$0]  %s4180_s2, 4992, %s32_s16, [#allocation6], %s3705_s25, %s3705_s25, %s3706_s26  }
  0x13   :  { %s3707_s29 = smov [#allocation2]   ;;  %s3632_s7 = scalar_lea.hbm %s4178_s0, 256 }
  0x14   :  { %s17_s30 = sshll.u32 %s3707_s29, 4  ;;  %p3633_p8 = scmp.ne.s32.totalorder %s4178_s0, %s3632_s7  ;;  %s18_s30 = int_to_ptr.vmem [resolvable:$true] %s17_s30 }
  0x15   :  { %p3636_p9 = scmp.lt.u32.totalorder %s3632_s7, %s4178_s0 }
  0x17   :  { %p3638_p10 = pnand %p3636_p9, %p3633_p8 }
  0x19   :  { %3641 = shalt.err (!%p3638_p10)
}
  0x1a   :  { %s3642_s12 = scalar_lea.vmem %s18_s30, 256  ;;  %p3647_p12 = scmp.lt.s32.totalorder %s18_s30, %s18_s30 }
  0x1b   :  { %p3643_p11 = scmp.ne.s32.totalorder %s18_s30, %s3642_s12  ;;  %p3648_p13 = scmp.lt.s32.totalorder %s3642_s12, %s3642_s12 }
  0x1d   :  { %p3649_p0 = por %p3648_p13, %p3647_p12 }
  0x1f   :  { %p3650_p1 = pnand %p3649_p0, %p3643_p11 }
  0x21   :  { %3653 = shalt.err (!%p3650_p1)
}
  0x22   :  { %s3708_s2 = smov 128   ;;  %s3709_s13 = smov 8  }
  0x23   :  { %23 = dma.hbm_to_vmem [thread:$0]  %s4178_s0, 256, %s18_s30, [#allocation3], %s3708_s2, %s3708_s2, %s3709_s13  }
  0x24   :  { %s3710_s16 = smov [#allocation7]   ;;  %s3654_s20 = scalar_lea.hbm %s4181_s3, 6400 }
  0x25   :  { %s43_s17 = sshll.u32 %s3710_s16, 4  ;;  %p3655_p2 = scmp.ne.s32.totalorder %s4181_s3, %s3654_s20  ;;  %s44_s17 = int_to_ptr.vmem [resolvable:$true] %s43_s17 }
  0x26   :  { %p3658_p3 = scmp.lt.u32.totalorder %s3654_s20, %s4181_s3 }
  0x28   :  { %p3660_p4 = pnand %p3658_p3, %p3655_p2 }
  0x2a   :  { %3663 = shalt.err (!%p3660_p4)
}
  0x2b   :  { %s3664_s25 = scalar_lea.vmem %s44_s17, 6400  ;;  %p3669_p6 = scmp.lt.s32.totalorder %s44_s17, %s44_s17 }
  0x2c   :  { %p3665_p5 = scmp.ne.s32.totalorder %s44_s17, %s3664_s25  ;;  %p3670_p7 = scmp.lt.s32.totalorder %s3664_s25, %s3664_s25 }
  0x2e   :  { %p3671_p8 = por %p3670_p7, %p3669_p6 }
  0x30   :  { %p3672_p9 = pnand %p3671_p8, %p3665_p5 }
  0x32   :  { %3675 = shalt.err (!%p3672_p9)
}
  0x33   :  { %49 = dma.hbm_to_vmem [thread:$0]  %s4181_s3, 6400, %s44_s17, [#allocation6], %s3708_s2, %s3708_s2, %s3709_s13  }
  0x34   :  { %3698 = dma.done.wait [#allocation3], 256  }
  0x35   :  { %3699 = vsyncadd [#allocation3], 4294967040 }
  0x36   :  { %3700 = dma.done.wait [#allocation6], 11392  }
  0x37   :  { %3701 = vsyncadd [#allocation6], 4294955904  ;;  %v3711_v0 = vmov 0.0   ;;  %vm3712_vm0 = vmmov 0   ;;  %v3468_v1 = vld [vmem:[#allocation5] sm:$0xff]   ;;  %v60_v2 = vld [vmem:[#allocation2] sm:$0xff] }
  0x38   :  { %3141 = vmatprep.subr.bf16.mxu0 %v3711_v0  ;;  %3143 = vmatprep.mubr.msk.bf16.mxu0 %vm3712_vm0, %v3711_v0  ;;  %v61_v3 = vld [vmem:[#allocation2 + $0x8] sm:$0xff]  ;;  %vm76_vm1 = vcmask 130048   ;;  %v2924_v5 = vld [vmem:[#allocation7 + $0x70] ss:$0 sm:$0xff]  ;;  %vm123_vm2 = vcmask 261120   ;;  %v163_v24 = vld [vmem:[#allocation7 + $0x38] sm:$0xff] }
  0x39   :  { %3142 = vmatpush3.bf16.msra.mxu0 %v3468_v1  ;;  %v64_v4 = vpack.c.bf16 %v61_v3, %v60_v2  ;;  %v164_v25 = vld [vmem:[#allocation7 + $0x40] sm:$0xff]  ;;  %v165_v26 = vld [vmem:[#allocation7 + $0x48] sm:$0xff]  ;;  %v166_v28 = vld [vmem:[#allocation7 + $0x50] sm:$0xff]  ;;  %vm1194_vm3 = vcmask 523264   ;;  %vm2238_vm4 = vcmask 7168   ;;  %vm2431_vm5 = vcmask 1043456  }
  0x3a   :  { %3158 = vmatprep.subr.bf16.mxu0 %v3711_v0  ;;  %v3416_v27 = vpack.c.bf16 %v164_v25, %v163_v24  ;;  %v3420_v29 = vpack.c.bf16 %v166_v28, %v165_v26  ;;  %v2927_v37 = vld [vmem:[#allocation7 + $0x78] ss:$0 sm:$0xff]  ;;  %v2928_v39 = vld [vmem:[#allocation7 + $0x80] ss:$0 sm:$0xff]  ;;  %v249_v46 = vld [vmem:[#allocation7 + $0x8] sm:$0xff]  ;;  %vm2427_vm6 = vcmask 64512  }
  0x3b   :  { %v253_v47 = vld [vmem:[#allocation7 + $0x18] sm:$0xff]  ;;  %v248_v48 = vld [vmem:[#allocation7] sm:$0xff]  ;;  %v252_v49 = vld [vmem:[#allocation7 + $0x10] sm:$0xff]  ;;  %vm2477_vm7 = vcmask 254976   ;;  %vm2819_vm8 = vcmask 123904   ;;  %vm2906_vm9 = vcmask 271360  }
  0x3c   :  { %3144 = vmatmul.mubr.msk.bf16.vlgmr.msra.gmra.mrb[0].mxu0 %vm76_vm1, %v64_v4  ;;  %3417 = vmatprep.subr.bf16.mxu1 %v3416_v27 }
  0x3d   :  { %3162 = vmatprep.mubr.msk.bf16.mxu0 %vm3712_vm0, %v3711_v0  ;;  %3419 = vmatpush3.bf16.msra.mxu1 %v3416_v27  ;;  %v3473_v27 = vld [vmem:[#allocation5 + $0x28] sm:$0xff]  }
  0x3e   :  { %3421 = vmatprep.subr.bf16.mxu1 %v3420_v29 }
  0x41   :  { %3423 = vmatpush3.bf16.msra.mxu1 %v3420_v29  ;;  %v3474_v29 = vld [vmem:[#allocation5 + $0x30] sm:$0xff]  }
  0x42   :  { %3166 = vmatprep.subr.bf16.mxu1 %v3711_v0 }
 0x10f   :  { %v114_v6 = vpop.f32.mrb[0].mxu0 }
 0x110   :  { %v115_v7 = vadd.f32 %v2924_v5, %v114_v6  ;;  %v3145_v8 = vpop.f32.mrb[1].mxu0 }
 0x111   :  { %v117_v9 = vpop.f32.mrb[2].mxu0  ;;  %v3470_v8 = vld [vmem:[#allocation5 + $0x18] sm:$0xff]  }
 0x112   :  { %v118_v10 = vadd.f32 %v2924_v5, %v117_v9  ;;  %v3146_v11 = vpop.f32.mrb[3].mxu0  ;;  %v124_v12 = vsel %vm123_vm2, %v115_v7, 0.0  ;;  %v3471_v9 = vld [vmem:[#allocation5 + $0x10] sm:$0xff]  }
 0x113   :  { %125 = vadd.xlane.f32.xlu0 %v124_v12 }
 0x114   :  { %v127_v13 = vsel %vm123_vm2, %v118_v10, 0.0 }
 0x117   :  { %128 = vadd.xlane.f32.xlu0 %v127_v13 }
 0x1a0   :  { %v126_v14 = vpop.xlane.xlu0 %125 }
 0x1a1   :  { %v131_v15 = vmul.f32 0.03125, %v126_v14 }
 0x1a3   :  { %v133_v16 = vsub.f32 %v115_v7, %v131_v15  ;;  %v3469_v7 = vld [vmem:[#allocation5 + $0x8] sm:$0xff]  }
 0x1a4   :  { %v129_v17 = vpop.xlane.xlu0 %128  ;;  %3159 = vmatpush3.bf16.msra.mxu0 %v3469_v7 }
 0x1a5   :  { %v132_v18 = vmul.f32 0.03125, %v129_v17  ;;  %v135_v19 = vmul.f32 %v133_v16, %v133_v16  ;;  %3160 = vmatprep.subr.bf16.mxu0 %v3711_v0 }
 0x1a7   :  { %v134_v20 = vsub.f32 %v118_v10, %v132_v18  ;;  %v137_v21 = vsel %vm123_vm2, %v135_v19, 0.0  ;;  %v3472_v10 = vld [vmem:[#allocation5 + $0x20] sm:$0xff]  }
 0x1a8   :  { %138 = vadd.xlane.f32.xlu1 %v137_v21  ;;  %3161 = vmatpush3.bf16.msra.mxu0 %v3471_v9  ;;  %v2931_v18 = vld [vmem:[#allocation7 + $0xa8] ss:$0 sm:$0xff] }
 0x1a9   :  { %v136_v22 = vmul.f32 %v134_v20, %v134_v20  ;;  %3174 = vmatprep.subr.bf16.mxu0 %v3711_v0 }
 0x1ab   :  { %v140_v23 = vsel %vm123_vm2, %v136_v22, 0.0  ;;  %v2932_v22 = vld [vmem:[#allocation7 + $0xb0] ss:$0 sm:$0xff] }
 0x1ac   :  { %141 = vadd.xlane.f32.xlu1 %v140_v23 }
 0x235   :  { %v139_v30 = vpop.xlane.xlu1 %138 }
 0x236   :  { %v143_v31 = vmul.f32 0.03125, %v139_v30  ;;  %v492_v30 = vlaneseq }
 0x238   :  { %v145_v32 = vadd.f32 1e-05, %v143_v31  ;;  %v493_v31 = vshrl.u32 %v492_v30, 7  ;;  %v3882_v30 = vld [vmem:[#allocation7 + $0x28] sm:$0xff] }
 0x239   :  { %v142_v33 = vpop.xlane.xlu1 %141 }
 0x23a   :  { %3506 = vrsqrt.f32 %v145_v32  ;;  %v144_v34 = vmul.f32 0.03125, %v142_v33  ;;  %v494_v32 = vsub.s32 0, %v493_v31  ;;  %v260_v33 = vld [vmem:[#allocation7 + $0x30] sm:$0xf] }
 0x23c   :  { %v146_v35 = vadd.f32 1e-05, %v144_v34  ;;  %v574_v34 = vsub.s32 1, %v493_v31 }
 0x23e   :  { %3508 = vrsqrt.f32 %v146_v35  ;;  %v739_v35 = vsub.s32 2, %v493_v31 }
 0x244   :  { %v3507_v36 = vpop.eup %3506 }
 0x245   :  { %v149_v38 = vmul.f32 %v3507_v36, %v133_v16  ;;  %v862_v36 = vsub.s32 3, %v493_v31 }
 0x247   :  { %v155_v40 = vmul.f32 %v2927_v37, %v149_v38 }
 0x248   :  { %v3509_v41 = vpop.eup %3508 }
 0x249   :  { %v150_v42 = vmul.f32 %v3509_v41, %v134_v20  ;;  %v161_v43 = vadd.f32 %v2928_v39, %v155_v40 }
 0x24b   :  { %v156_v44 = vmul.f32 %v2927_v37, %v150_v42  ;;  %3155 = vmatprep.mubr.msk.f32.mxu1 %vm123_vm2, %v161_v43  ;;  %v250_v54 = vmul.f32 %v248_v48, %v161_v43  ;;  %v2933_v37 = vld [vmem:[#allocation7 + $0x88] ss:$0 sm:$0xff]  ;;  %v3822_v42 = vrot.slane %v260_v33, %v574_v34  ;;  %v3824_v43 = vrot.slane %v260_v33, %v739_v35 }
 0x24d   :  { %v162_v45 = vadd.f32 %v2928_v39, %v156_v44  ;;  %v3820_v39 = vrot.slane %v260_v33, %v494_v32  ;;  %v3826_v44 = vrot.slane %v260_v33, %v862_v36 }
 0x24f   :  { %3156 = vmatmul.mubr.msk.f32.vlgmr.msra.gmra.mrb[0].mxu1 %vm123_vm2, %v162_v45  ;;  %v251_v51 = vmul.f32 %v249_v46, %v162_v45  ;;  %v2937_v45 = vld [vmem:[#allocation7 + $0x90] ss:$0 sm:$0xff] }
 0x250   :  { %3170 = vmatprep.mubr.msk.bf16.mxu1 %vm3712_vm0, %v3711_v0  ;;  %3167 = vmatpush3.bf16.msra.mxu1 %v3470_v8 }
 0x251   :  { %3168 = vmatprep.subr.bf16.mxu1 %v3711_v0 }
 0x254   :  { %3169 = vmatpush3.bf16.msra.mxu1 %v3472_v10 }
 0x255   :  { %3182 = vmatprep.subr.bf16.mxu1 %v3711_v0 }
 0x322   :  { %v3157_v50 = vpop.f32.mrb[0].mxu1 }
 0x323   :  { %v255_v52 = vmul.f32 %v3157_v50, %v253_v47  ;;  %v239_v53 = vpop.f32.mrb[1].mxu1 }
 0x324   :  { %v254_v55 = vmul.f32 %v252_v49, %v239_v53 }
 0x325   :  { %v3793_v56 = vadd.f32 %v255_v52, %v251_v51 }
 0x326   :  { %v3795_v57 = vadd.f32 %v254_v55, %v250_v54 }
 0x327   :  { %v266_v58 = vsel %vm123_vm2, %v3793_v56, 0.0 }
 0x328   :  { %267 = vadd.xlane.f32.xlu1 %v266_v58  ;;  %v263_v59 = vsel %vm123_vm2, %v3795_v57, 0.0 }
 0x329   :  { %264 = vadd.xlane.f32.xlu0 %v263_v59 }
 0x3b5   :  { %v268_v60 = vpop.xlane.xlu1 %267 }
 0x3b6   :  { %v270_v61 = vmul.f32 0.03125, %v268_v60  ;;  %v265_v62 = vpop.xlane.xlu0 %264 }
 0x3b7   :  { %v269_v63 = vmul.f32 0.03125, %v265_v62 }
 0x3b8   :  { %v272_v1 = vsub.f32 %v3793_v56, %v270_v61 }
 0x3b9   :  { %v271_v2 = vsub.f32 %v3795_v57, %v269_v63 }
 0x3ba   :  { %v274_v3 = vmul.f32 %v272_v1, %v272_v1 }
 0x3bb   :  { %v273_v4 = vmul.f32 %v271_v2, %v271_v2 }
 0x3bc   :  { %v278_v5 = vsel %vm123_vm2, %v274_v3, 0.0 }
 0x3bd   :  { %279 = vadd.xlane.f32.xlu1 %v278_v5  ;;  %v275_v6 = vsel %vm123_vm2, %v273_v4, 0.0 }
 0x3be   :  { %276 = vadd.xlane.f32.xlu0 %v275_v6 }
 0x44a   :  { %v280_v11 = vpop.xlane.xlu1 %279 }
 0x44b   :  { %v282_v12 = vmul.f32 0.03125, %v280_v11  ;;  %v277_v13 = vpop.xlane.xlu0 %276 }
 0x44c   :  { %v281_v14 = vmul.f32 0.03125, %v277_v13 }
 0x44d   :  { %v284_v15 = vadd.f32 1e-05, %v282_v12 }
 0x44e   :  { %v283_v16 = vadd.f32 1e-05, %v281_v14 }
 0x44f   :  { %3510 = vrsqrt.f32 %v284_v15 }
 0x450   :  { %3512 = vrsqrt.f32 %v283_v16 }
 0x459   :  { %v3511_v17 = vpop.eup %3510 }
 0x45a   :  { %v3513_v19 = vpop.eup %3512  ;;  %v288_v20 = vmul.f32 %v3511_v17, %v272_v1 }
 0x45b   :  { %v287_v21 = vmul.f32 %v3513_v19, %v271_v2  ;;  %v2941_v2 = vld [vmem:[#allocation7 + $0x98] ss:$0 sm:$0xff] }
 0x45c   :  { %v294_v23 = vmul.f32 %v2931_v18, %v288_v20 }
 0x45d   :  { %v293_v24 = vmul.f32 %v2931_v18, %v287_v21 }
 0x45e   :  { %v300_v25 = vadd.f32 %v2932_v22, %v294_v23 }
 0x45f   :  { %v299_v26 = vadd.f32 %v2932_v22, %v293_v24 }
 0x461   :  { %v301_v28 = vpack.c.bf16 %v300_v25, %v299_v26 }
 0x463   :  { %3163 = vmatmul.mubr.msk.bf16.vlgmr.msra.gmra.mrb[4].mxu0 %vm123_vm2, %v301_v28  ;;  %3171 = vmatmul.mubr.msk.bf16.vlgmr.msra.gmra.mrb[4].mxu1 %vm123_vm2, %v301_v28 }
 0x464   :  { %3175 = vmatpush3.bf16.msra.mxu0 %v3473_v27  ;;  %3178 = vmatprep.mubr.msk.bf16.mxu0 %vm3712_vm0, %v3711_v0  ;;  %v3880_v27 = vld [vmem:[#allocation7 + $0x20] sm:$0xff] }
 0x465   :  { %3176 = vmatprep.subr.bf16.mxu0 %v3711_v0  ;;  %3184 = vmatprep.mubr.msk.bf16.mxu1 %vm3712_vm0, %v3711_v0 }
 0x468   :  { %3177 = vmatpush3.bf16.msra.mxu0 %v3474_v29 }
 0x469   :  { %3188 = vmatprep.subr.bf16.mxu0 %v3711_v0 }
 0x46b   :  { %3179 = vmatmul.mubr.msk.bf16.vlgmr.msra.gmra.mrb[8].mxu0 %vm123_vm2, %v301_v28 }
 0x46c   :  { %3190 = vmatprep.mubr.msk.bf16.mxu0 %vm3712_vm0, %v3711_v0 }
 0x536   :  { %v360_v38 = vpop.f32.mrb[4].mxu0  ;;  %v422_v40 = vpop.f32.mrb[4].mxu1 }
 0x537   :  { %v361_v41 = vadd.f32 %v2933_v37, %v360_v38  ;;  %v3164_v46 = vpop.f32.mrb[5].mxu0  ;;  %v3172_v47 = vpop.f32.mrb[5].mxu1  ;;  %v423_v52 = vadd.f32 %v2937_v45, %v422_v40 }
 0x538   :  { %v363_v48 = vpop.f32.mrb[6].mxu0  ;;  %v425_v49 = vpop.f32.mrb[6].mxu1 }
 0x539   :  { %v3165_v50 = vpop.f32.mrb[7].mxu0  ;;  %v3173_v51 = vpop.f32.mrb[7].mxu1  ;;  %v364_v53 = vadd.f32 %v2933_v37, %v363_v48  ;;  %v426_v54 = vadd.f32 %v2937_v45, %v425_v49  ;;  %v496_v55 = vmul.f32 %v3820_v39, %v361_v41  ;;  %v576_v58 = vmul.f32 %v3822_v42, %v361_v41 }
 0x53a   :  { %v741_v59 = vmul.f32 %v3824_v43, %v361_v41  ;;  %v864_v60 = vmul.f32 %v3826_v44, %v361_v41 }
 0x53b   :  { %v497_v61 = vmul.f32 %v3820_v39, %v364_v53  ;;  %v577_v62 = vmul.f32 %v3822_v42, %v364_v53  ;;  %v742_v63 = vmul.f32 %v3824_v43, %v364_v53  ;;  %v865_v1 = vmul.f32 %v3826_v44, %v364_v53 }
 0x53c   :  { %v491_v3 = vpack.c.bf16 %v426_v54, %v423_v52 }
 0x53d   :  { %v498_v4 = vpack.c.bf16 %v497_v61, %v496_v55  ;;  %v578_v5 = vpack.c.bf16 %v577_v62, %v576_v58  ;;  %v743_v6 = vpack.c.bf16 %v742_v63, %v741_v59  ;;  %v866_v7 = vpack.c.bf16 %v865_v1, %v864_v60 }
 0x53e   :  { %v484_v8 = vpop.f32.mrb[8].mxu0  ;;  %v506_v10 = vsel %vm123_vm2, %v491_v3, 0 }
 0x53f   :  { %v485_v9 = vadd.f32 %v2941_v2, %v484_v8  ;;  %v3180_v11 = vpop.f32.mrb[9].mxu0  ;;  %3183 = vmatpush3.bf16.xpose.msra.mxu1 %v506_v10  ;;  %3189 = vmatpush3.bf16.xpose.msra.mxu0 %v506_v10 }
 0x540   :  { %v487_v12 = vpop.f32.mrb[10].mxu0  ;;  %3206 = vmatprep.subr.bf16.mxu0 %v3711_v0  ;;  %3194 = vmatprep.subr.bf16.mxu1 %v3711_v0 }
 0x541   :  { %v3181_v13 = vpop.f32.mrb[11].mxu0  ;;  %v488_v14 = vadd.f32 %v2941_v2, %v487_v12  ;;  %v3840_v15 = vmul.f32 %v3820_v39, %v485_v9  ;;  %v579_v16 = vmul.f32 %v3822_v42, %v485_v9  ;;  %v3844_v17 = vmul.f32 %v3824_v43, %v485_v9 }
 0x542   :  { %v3847_v18 = vmul.f32 %v3826_v44, %v485_v9 }
 0x543   :  { %v3850_v19 = vmul.f32 %v3820_v39, %v488_v14  ;;  %v580_v20 = vmul.f32 %v3822_v42, %v488_v14  ;;  %v3854_v21 = vmul.f32 %v3824_v43, %v488_v14  ;;  %v3857_v22 = vmul.f32 %v3826_v44, %v488_v14 }
 0x545   :  { %v581_v23 = vpack.c.bf16 %v580_v20, %v579_v16  ;;  %v501_v24 = vpack.c.bf16 %v3850_v19, %v3840_v15  ;;  %v746_v25 = vpack.c.bf16 %v3854_v21, %v3844_v17  ;;  %v869_v26 = vpack.c.bf16 %v3857_v22, %v3847_v18 }
 0x546   :  { %3185 = vmatmul.mubr.msk.bf16.vlgmr.msra.gmra.mrb[8].mxu1 %vm123_vm2, %v498_v4  ;;  %3191 = vmatmul.mubr.msk.bf16.vlgmr.msra.gmra.mrb[12].mxu0 %vm123_vm2, %v578_v5 }
 0x547   :  { %3207 = vmatpush3.bf16.xpose.msra.mxu0 %v506_v10  ;;  %3195 = vmatpush3.bf16.msra.mxu1 %v581_v23 }
 0x548   :  { %3208 = vmatprep.mubr.msk.bf16.mxu0 %vm3712_vm0, %v3711_v0  ;;  %3218 = vmatprep.subr.bf16.mxu0 %v3711_v0 }
 0x549   :  { %3196 = vmatprep.mubr.msk.bf16.mxu1 %vm3712_vm0, %v3711_v0  ;;  %3200 = vmatprep.subr.bf16.mxu1 %v3711_v0 }
 0x54e   :  { %3209 = vmatmul.mubr.msk.bf16.vlgmr.msra.gmra.mrb[16].mxu0 %vm123_vm2, %v743_v6 }
 0x54f   :  { %3219 = vmatpush3.bf16.xpose.msra.mxu0 %v506_v10  ;;  %3220 = vmatprep.mubr.msk.bf16.mxu0 %vm3712_vm0, %v3711_v0 }
 0x550   :  { %3230 = vmatprep.subr.bf16.mxu0 %v3711_v0 }
 0x556   :  { %3221 = vmatmul.mubr.msk.bf16.vlgmr.msra.gmra.mrb[20].mxu0 %vm123_vm2, %v866_v7 }
 0x557   :  { %3234 = vmatprep.mubr.msk.bf16.mxu0 %vm3712_vm0, %v3711_v0 }
 0x619   :  { %v542_v28 = vpop.f32.mrb[8].mxu1  ;;  %v619_v29 = vpop.f32.mrb[12].mxu0 }
 0x61a   :  { %v620_v31 = vadd.f32 %v619_v29, %v3880_v27  ;;  %v3186_v32 = vpop.f32.mrb[9].mxu1  ;;  %v3192_v33 = vpop.f32.mrb[13].mxu0  ;;  %v543_v36 = vadd.f32 %v542_v28, %v3880_v27 }
 0x61b   :  { %v545_v34 = vpop.f32.mrb[10].mxu1  ;;  %v622_v35 = vpop.f32.mrb[14].mxu0 }
 0x61c   :  { %v623_v37 = vadd.f32 %v622_v35, %v3882_v30  ;;  %v3187_v38 = vpop.f32.mrb[11].mxu1  ;;  %v3193_v40 = vpop.f32.mrb[15].mxu0  ;;  %v626_v41 = vsel %vm76_vm1, %v620_v31, -inf  ;;  %v546_v45 = vadd.f32 %v545_v34, %v3882_v30  ;;  %v549_v47 = vsel %vm76_vm1, %v543_v36, -inf }
 0x61d   :  { %627 = vmax.xlane.f32.xlu0 %v626_v41 }
 0x61e   :  { %v629_v46 = vsel %vm76_vm1, %v623_v37, -inf  ;;  %v552_v51 = vsel %vm76_vm1, %v546_v45, -inf }
 0x61f   :  { %630 = vmax.xlane.f32.xlu1 %v629_v46 }
 0x621   :  { %550 = vmax.xlane.f32.xlu0 %v549_v47  ;;  %v784_v48 = vpop.f32.mrb[16].mxu0 }
 0x622   :  { %v785_v49 = vadd.f32 %v784_v48, %v3880_v27  ;;  %v3210_v50 = vpop.f32.mrb[17].mxu0 }
 0x623   :  { %553 = vmax.xlane.f32.xlu1 %v552_v51  ;;  %v787_v52 = vpop.f32.mrb[18].mxu0 }
 0x624   :  { %v788_v53 = vadd.f32 %v787_v52, %v3882_v30  ;;  %v3211_v54 = vpop.f32.mrb[19].mxu0  ;;  %v791_v55 = vsel %vm76_vm1, %v785_v49, -inf }
 0x625   :  { %792 = vmax.xlane.f32.xlu0 %v791_v55 }
 0x626   :  { %v794_v58 = vsel %vm76_vm1, %v788_v53, -inf }
 0x627   :  { %795 = vmax.xlane.f32.xlu1 %v794_v58 }
 0x629   :  { %v907_v59 = vpop.f32.mrb[20].mxu0 }
 0x62a   :  { %v908_v60 = vadd.f32 %v907_v59, %v3880_v27  ;;  %v3222_v61 = vpop.f32.mrb[21].mxu0 }
 0x62b   :  { %v910_v62 = vpop.f32.mrb[22].mxu0  ;;  %v3475_v61 = vld [vmem:[#allocation5 + $0x38] sm:$0xff]  }
 0x62c   :  { %v911_v63 = vadd.f32 %v910_v62, %v3882_v30  ;;  %v3223_v1 = vpop.f32.mrb[23].mxu0  ;;  %v914_v2 = vsel %vm76_vm1, %v908_v60, -inf  ;;  %3231 = vmatpush3.bf16.msra.mxu0 %v3475_v61  ;;  %v3478_v61 = vld [vmem:[#allocation5 + $0x50] sm:$0xff]  }
 0x62d   :  { %915 = vmax.xlane.f32.xlu0 %v914_v2  ;;  %3232 = vmatprep.subr.bf16.mxu0 %v3711_v0 }
 0x62e   :  { %v917_v3 = vsel %vm76_vm1, %v911_v63, -inf }
 0x62f   :  { %918 = vmax.xlane.f32.xlu1 %v917_v3 }
 0x6aa   :  { %v628_v4 = vpop.xlane.xlu0 %627 }
 0x6ab   :  { %v632_v5 = vsub.f32 %v620_v31, %v628_v4 }
 0x6ac   :  { %v631_v6 = vpop.xlane.xlu1 %630 }
 0x6ad   :  { %v634_v7 = vmul.f32 1.442695, %v632_v5  ;;  %v633_v8 = vsub.f32 %v623_v37, %v631_v6 }
 0x6ae   :  { %v551_v9 = vpop.xlane.xlu0 %550 }
 0x6af   :  { %3514 = vpow2.f32 %v634_v7  ;;  %v636_v10 = vmul.f32 1.442695, %v633_v8  ;;  %v555_v11 = vsub.f32 %v543_v36, %v551_v9 }
 0x6b0   :  { %v554_v12 = vpop.xlane.xlu1 %553 }
 0x6b1   :  { %3516 = vpow2.f32 %v636_v10  ;;  %v557_v13 = vmul.f32 1.442695, %v555_v11  ;;  %v556_v14 = vsub.f32 %v546_v45, %v554_v12 }
 0x6b2   :  { %v793_v16 = vpop.xlane.xlu0 %792 }
 0x6b3   :  { %3518 = vpow2.f32 %v557_v13  ;;  %v559_v20 = vmul.f32 1.442695, %v556_v14  ;;  %v797_v23 = vsub.f32 %v785_v49, %v793_v16 }
 0x6b4   :  { %v796_v28 = vpop.xlane.xlu1 %795 }
 0x6b5   :  { %3520 = vpow2.f32 %v559_v20  ;;  %v799_v29 = vmul.f32 1.442695, %v797_v23  ;;  %v798_v32 = vsub.f32 %v788_v53, %v796_v28 }
 0x6b7   :  { %3522 = vpow2.f32 %v799_v29  ;;  %v801_v31 = vmul.f32 1.442695, %v798_v32 }
 0x6b9   :  { %v3515_v33 = vpop.eup %3514  ;;  %3524 = vpow2.f32 %v801_v31  ;;  %v3476_v31 = vld [vmem:[#allocation5 + $0x40] sm:$0xff]  }
 0x6ba   :  { %v916_v34 = vpop.xlane.xlu0 %915  ;;  %v638_v35 = vsel %vm76_vm1, %v3515_v33, 0.0  ;;  %3233 = vmatpush3.bf16.msra.mxu0 %v3476_v31 }
 0x6bb   :  { %v3517_v36 = vpop.eup %3516  ;;  %v920_v37 = vsub.f32 %v908_v60, %v916_v34  ;;  %639 = vadd.xlane.f32.xlu0 %v638_v35  ;;  %3238 = vmatprep.subr.bf16.mxu0 %v3711_v0 }
 0x6bc   :  { %v919_v38 = vpop.xlane.xlu1 %918  ;;  %v641_v40 = vsel %vm76_vm1, %v3517_v36, 0.0 }
 0x6bd   :  { %v3519_v41 = vpop.eup %3518  ;;  %v922_v45 = vmul.f32 1.442695, %v920_v37  ;;  %v921_v46 = vsub.f32 %v911_v63, %v919_v38  ;;  %642 = vadd.xlane.f32.xlu1 %v641_v40 }
 0x6be   :  { %v561_v47 = vsel %vm76_vm1, %v3519_v41, 0.0 }
 0x6bf   :  { %v3521_v48 = vpop.eup %3520  ;;  %3526 = vpow2.f32 %v922_v45  ;;  %v924_v49 = vmul.f32 1.442695, %v921_v46  ;;  %562 = vadd.xlane.f32.xlu0 %v561_v47 }
 0x6c0   :  { %v564_v50 = vsel %vm76_vm1, %v3521_v48, 0.0 }
 0x6c1   :  { %v3523_v51 = vpop.eup %3522  ;;  %3528 = vpow2.f32 %v924_v49  ;;  %565 = vadd.xlane.f32.xlu1 %v564_v50 }
 0x6c2   :  { %v803_v52 = vsel %vm76_vm1, %v3523_v51, 0.0 }
 0x6c3   :  { %v3525_v53 = vpop.eup %3524  ;;  %804 = vadd.xlane.f32.xlu0 %v803_v52 }
 0x6c4   :  { %v806_v54 = vsel %vm76_vm1, %v3525_v53, 0.0 }
 0x6c5   :  { %807 = vadd.xlane.f32.xlu1 %v806_v54 }
 0x6c9   :  { %v3527_v55 = vpop.eup %3526 }
 0x6ca   :  { %v926_v58 = vsel %vm76_vm1, %v3527_v55, 0.0 }
 0x6cb   :  { %v3529_v59 = vpop.eup %3528  ;;  %927 = vadd.xlane.f32.xlu0 %v926_v58 }
 0x6cc   :  { %v929_v60 = vsel %vm76_vm1, %v3529_v59, 0.0 }
 0x6cd   :  { %930 = vadd.xlane.f32.xlu1 %v929_v60  ;;  %v3477_v60 = vld [vmem:[#allocation5 + $0x48] sm:$0xff]  }
 0x748   :  { %v640_v62 = vpop.xlane.xlu0 %639 }
 0x749   :  { %3530 = vrcp.f32 %v640_v62  ;;  %v3479_v62 = vld [vmem:[#allocation5 + $0x58] sm:$0xff]  }
 0x74a   :  { %v643_v63 = vpop.xlane.xlu1 %642 }
 0x74b   :  { %3532 = vrcp.f32 %v643_v63  ;;  %v3480_v63 = vld [vmem:[#allocation5 + $0x60] sm:$0xff]  }
 0x74c   :  { %v563_v2 = vpop.xlane.xlu0 %562 }
 0x74e   :  { %v566_v1 = vpop.xlane.xlu1 %565 }
 0x74f   :  { %3534 = vrcp.f32 %v566_v1 }
 0x750   :  { %3536 = vrcp.f32 %v563_v2  ;;  %v805_v10 = vpop.xlane.xlu0 %804 }
 0x752   :  { %v808_v8 = vpop.xlane.xlu1 %807 }
 0x753   :  { %v3531_v3 = vpop.eup %3530  ;;  %3538 = vrcp.f32 %v808_v8  ;;  %v2957_v8 = vld [vmem:[#allocation7 + $0xb8] ss:$0 sm:$0xff] }
 0x754   :  { %v646_v5 = vmul.f32 %v3531_v3, %v3515_v33  ;;  %3540 = vrcp.f32 %v805_v10 }
 0x755   :  { %v3533_v4 = vpop.eup %3532 }
 0x756   :  { %v647_v6 = vmul.f32 %v3533_v4, %v3517_v36  ;;  %v2956_v36 = vld [vmem:[#allocation7 + $0xa0] ss:$0 sm:$0xff] }
 0x758   :  { %v648_v7 = vpack.c.bf16 %v647_v6, %v646_v5 }
 0x759   :  { %v3535_v9 = vpop.eup %3534 }
 0x75a   :  { %3197 = vmatmul.mubr.msk.bf16.vlgmr.msra.gmra.mrb[12].mxu1 %vm76_vm1, %v648_v7  ;;  %v3537_v11 = vpop.eup %3536  ;;  %v570_v12 = vmul.f32 %v3535_v9, %v3521_v48  ;;  %v931_v15 = vpop.xlane.xlu1 %930 }
 0x75b   :  { %3201 = vmatpush3.bf16.msra.mxu1 %v501_v24  ;;  %3202 = vmatprep.mubr.msk.bf16.mxu1 %vm3712_vm0, %v3711_v0  ;;  %v569_v13 = vmul.f32 %v3537_v11, %v3519_v41  ;;  %v928_v24 = vpop.xlane.xlu0 %927  ;;  %3542 = vrcp.f32 %v931_v15 }
 0x75c   :  { %3212 = vmatprep.subr.bf16.mxu1 %v3711_v0  ;;  %3544 = vrcp.f32 %v928_v24 }
 0x75d   :  { %v571_v14 = vpack.c.bf16 %v570_v12, %v569_v13  ;;  %v3539_v19 = vpop.eup %3538  ;;  %v2958_v13 = vld [vmem:[#allocation7 + $0xc0] ss:$0 sm:$0xff] }
 0x75e   :  { %v3541_v16 = vpop.eup %3540  ;;  %v812_v20 = vmul.f32 %v3539_v19, %v3525_v53 }
 0x75f   :  { %v811_v23 = vmul.f32 %v3541_v16, %v3523_v51  ;;  %v3481_v16 = vld [vmem:[#allocation5 + $0x68] sm:$0xff]  }
 0x761   :  { %v813_v28 = vpack.c.bf16 %v812_v20, %v811_v23  ;;  %v3482_v20 = vld [vmem:[#allocation5 + $0x70] sm:$0xff]   ;;  %v2959_v23 = vld [vmem:[#allocation7 + $0xc8] ss:$0 sm:$0xff] }
 0x765   :  { %v3543_v17 = vpop.eup %3542 }
 0x766   :  { %3203 = vmatmul.mubr.msk.bf16.vlgmr.msra.gmra.mrb[12].mxu1 %vm76_vm1, %v571_v14  ;;  %v3545_v21 = vpop.eup %3544 }
 0x767   :  { %3213 = vmatpush3.bf16.msra.mxu1 %v746_v25  ;;  %3214 = vmatprep.mubr.msk.bf16.mxu1 %vm3712_vm0, %v3711_v0  ;;  %v935_v25 = vmul.f32 %v3543_v17, %v3529_v59  ;;  %v934_v29 = vmul.f32 %v3545_v21, %v3527_v55 }
 0x768   :  { %3224 = vmatprep.subr.bf16.mxu1 %v3711_v0 }
 0x769   :  { %v936_v32 = vpack.c.bf16 %v935_v25, %v934_v29 }
 0x772   :  { %3215 = vmatmul.mubr.msk.bf16.vlgmr.msra.gmra.mrb[12].mxu1 %vm76_vm1, %v813_v28 }
 0x773   :  { %3225 = vmatpush3.bf16.msra.mxu1 %v869_v26  ;;  %3226 = vmatprep.mubr.msk.bf16.mxu1 %vm3712_vm0, %v3711_v0 }
 0x774   :  { %3246 = vmatprep.subr.bf16.mxu1 %v3711_v0 }
 0x77e   :  { %3227 = vmatmul.mubr.msk.bf16.vlgmr.msra.gmra.mrb[12].mxu1 %vm76_vm1, %v936_v32 }
 0x77f   :  { %3254 = vmatprep.mubr.msk.bf16.mxu1 %vm3712_vm0, %v3711_v0  ;;  %3247 = vmatpush3.bf16.msra.mxu1 %v3479_v62 }
 0x780   :  { %3248 = vmatprep.subr.bf16.mxu1 %v3711_v0 }
 0x783   :  { %3249 = vmatpush3.bf16.msra.mxu1 %v3480_v63 }
 0x784   :  { %3250 = vmatprep.subr.bf16.mxu1 %v3711_v0 }
 0x787   :  { %3251 = vmatpush3.bf16.msra.mxu1 %v3481_v16  ;;  %v2979_v16 = vld [vmem:[#allocation7 + $0xe8] ss:$0 sm:$0xff] }
 0x788   :  { %3252 = vmatprep.subr.bf16.mxu1 %v3711_v0 }
 0x78b   :  { %3253 = vmatpush3.bf16.msra.mxu1 %v3482_v20 }
 0x78c   :  { %3274 = vmatprep.subr.bf16.mxu1 %v3711_v0 }
 0x851   :  { %v974_v18 = vpop.f32.mrb[12].mxu1 }
 0x852   :  { %v3228_v22 = vpop.f32.mrb[13].mxu1 }
 0x853   :  { %v977_v26 = vpop.f32.mrb[14].mxu1 }
 0x854   :  { %v987_v33 = vpack.c.bf16 %v977_v26, %v974_v18  ;;  %v3229_v34 = vpop.f32.mrb[15].mxu1 }
 0x856   :  { %3235 = vmatmul.mubr.msk.bf16.vlgmr.msra.gmra.mrb[24].mxu0 %vm123_vm2, %v987_v33  ;;  %v2968_v33 = vld [vmem:[#allocation7 + $0xd0] ss:$0 sm:$0xff] }
 0x857   :  { %3242 = vmatprep.mubr.msk.bf16.mxu0 %vm3712_vm0, %v3711_v0  ;;  %3239 = vmatpush3.bf16.msra.mxu0 %v3477_v60  ;;  %v3486_v60 = vld [vmem:[#allocation5 + $0xa0] sm:$0xff]  }
 0x858   :  { %3240 = vmatprep.subr.bf16.mxu0 %v3711_v0 }
 0x85b   :  { %3241 = vmatpush3.bf16.msra.mxu0 %v3478_v61 }
 0x85c   :  { %3258 = vmatprep.subr.bf16.mxu0 %v3711_v0 }
 0x929   :  { %v1037_v35 = vpop.f32.mrb[24].mxu0 }
 0x92a   :  { %v1044_v37 = vadd.f32 %v1037_v35, %v3795_v57  ;;  %v3236_v38 = vpop.f32.mrb[25].mxu0 }
 0x92b   :  { %v1040_v40 = vpop.f32.mrb[26].mxu0 }
 0x92c   :  { %v3938_v41 = vadd.f32 %v2956_v36, %v1044_v37  ;;  %v1045_v45 = vadd.f32 %v1040_v40, %v3793_v56  ;;  %v3237_v46 = vpop.f32.mrb[27].mxu0 }
 0x92e   :  { %v3941_v47 = vadd.f32 %v2956_v36, %v1045_v45  ;;  %v1055_v48 = vsel %vm123_vm2, %v3938_v41, 0.0 }
 0x92f   :  { %1056 = vadd.xlane.f32.xlu0 %v1055_v48 }
 0x930   :  { %v1058_v49 = vsel %vm123_vm2, %v3941_v47, 0.0 }
 0x931   :  { %1059 = vadd.xlane.f32.xlu1 %v1058_v49 }
 0x9bc   :  { %v1057_v50 = vpop.xlane.xlu0 %1056 }
 0x9bd   :  { %v1061_v51 = vmul.f32 0.03125, %v1057_v50 }
 0x9be   :  { %v1060_v57 = vpop.xlane.xlu1 %1059 }
 0x9bf   :  { %v1063_v52 = vsub.f32 %v3938_v41, %v1061_v51  ;;  %v1062_v53 = vmul.f32 0.03125, %v1060_v57 }
 0x9c1   :  { %v1064_v54 = vsub.f32 %v3941_v47, %v1062_v53  ;;  %v1065_v56 = vmul.f32 %v1063_v52, %v1063_v52 }
 0x9c3   :  { %v1067_v55 = vsel %vm123_vm2, %v1065_v56, 0.0  ;;  %v1066_v58 = vmul.f32 %v1064_v54, %v1064_v54 }
 0x9c4   :  { %1068 = vadd.xlane.f32.xlu0 %v1067_v55  ;;  %v3483_v55 = vld [vmem:[#allocation5 + $0x78] sm:$0xff]  }
 0x9c5   :  { %v1070_v59 = vsel %vm123_vm2, %v1066_v58, 0.0  ;;  %v3484_v58 = vld [vmem:[#allocation5 + $0x98] sm:$0xff]  }
 0x9c6   :  { %1071 = vadd.xlane.f32.xlu1 %v1070_v59  ;;  %v3485_v59 = vld [vmem:[#allocation5 + $0x80] sm:$0xff]  }
 0xa51   :  { %v1069_v1 = vpop.xlane.xlu0 %1068 }
 0xa52   :  { %v1073_v2 = vmul.f32 0.03125, %v1069_v1 }
 0xa53   :  { %v1072_v3 = vpop.xlane.xlu1 %1071 }
 0xa54   :  { %v1075_v4 = vadd.f32 1e-05, %v1073_v2  ;;  %v1074_v5 = vmul.f32 0.03125, %v1072_v3 }
 0xa56   :  { %3546 = vrsqrt.f32 %v1075_v4  ;;  %v1076_v6 = vadd.f32 1e-05, %v1074_v5  ;;  %v2969_v5 = vld [vmem:[#allocation7 + $0xf8] ss:$0 sm:$0xff] }
 0xa58   :  { %3548 = vrsqrt.f32 %v1076_v6 }
 0xa60   :  { %v3547_v7 = vpop.eup %3546 }
 0xa61   :  { %v1079_v9 = vmul.f32 %v3547_v7, %v1063_v52 }
 0xa62   :  { %v3549_v10 = vpop.eup %3548 }
 0xa63   :  { %v1085_v11 = vmul.f32 %v2957_v8, %v1079_v9  ;;  %v1080_v12 = vmul.f32 %v3549_v10, %v1064_v54  ;;  %v2970_v10 = vld [vmem:[#allocation7 + $0x100] ss:$0 sm:$0xff] }
 0xa65   :  { %v1086_v14 = vmul.f32 %v2957_v8, %v1080_v12  ;;  %v1091_v15 = vadd.f32 %v2958_v13, %v1085_v11 }
 0xa67   :  { %v1092_v19 = vadd.f32 %v2958_v13, %v1086_v14  ;;  %v3487_v14 = vld [vmem:[#allocation5 + $0x88] sm:$0xff]  }
 0xa69   :  { %v1097_v24 = vpack.c.bf16 %v1092_v19, %v1091_v15  ;;  %v3488_v19 = vld [vmem:[#allocation5 + $0x90] sm:$0xff]  }
 0xa6b   :  { %3243 = vmatmul.mubr.msk.bf16.vlgmr.msra.gmra.mrb[28].mxu0 %vm123_vm2, %v1097_v24  ;;  %v2971_v24 = vld [vmem:[#allocation7 + $0xd8] ss:$0 sm:$0xff] }
 0xa6c   :  { %3262 = vmatprep.mubr.msk.bf16.mxu0 %vm3712_vm0, %v3711_v0  ;;  %3259 = vmatpush3.bf16.msra.mxu0 %v3483_v55 }
 0xa6d   :  { %3260 = vmatprep.subr.bf16.mxu0 %v3711_v0 }
 0xa70   :  { %3261 = vmatpush3.bf16.msra.mxu0 %v3485_v59 }
 0xa71   :  { %3266 = vmatprep.subr.bf16.mxu0 %v3711_v0 }
 0xb3e   :  { %v1152_v28 = vpop.f32.mrb[28].mxu0 }
 0xb3f   :  { %v1153_v17 = vadd.f32 %v2959_v23, %v1152_v28  ;;  %v3244_v21 = vpop.f32.mrb[29].mxu0 }
 0xb40   :  { %v1155_v25 = vpop.f32.mrb[30].mxu0 }
 0xb41   :  { %v1156_v29 = vadd.f32 %v2959_v23, %v1155_v25  ;;  %v3245_v32 = vpop.f32.mrb[31].mxu0  ;;  %v1159_v31 = vmax.f32 %v1153_v17, 0.0 }
 0xb43   :  { %v1160_v18 = vmax.f32 %v1156_v29, 0.0 }
 0xb45   :  { %v1169_v22 = vpack.c.bf16 %v1160_v18, %v1159_v31 }
 0xb47   :  { %3255 = vmatmul.mubr.msk.bf16.vlgmr.msra.gmra.mrb[16].mxu1 %vm1194_vm3, %v1169_v22 }
 0xb48   :  { %3278 = vmatprep.mubr.msk.bf16.mxu1 %vm3712_vm0, %v3711_v0  ;;  %3275 = vmatpush3.bf16.msra.mxu1 %v3484_v58 }
 0xb49   :  { %3276 = vmatprep.subr.bf16.mxu1 %v3711_v0 }
 0xb4c   :  { %3277 = vmatpush3.bf16.msra.mxu1 %v3486_v60 }
 0xb4d   :  { %3288 = vmatprep.subr.bf16.mxu1 %v3711_v0 }
 0xc1a   :  { %v1232_v26 = vpop.f32.mrb[16].mxu1 }
 0xc1b   :  { %v1239_v34 = vadd.f32 %v1232_v26, %v3938_v41  ;;  %v3256_v35 = vpop.f32.mrb[17].mxu1 }
 0xc1c   :  { %v1235_v36 = vpop.f32.mrb[18].mxu1 }
 0xc1d   :  { %v3964_v37 = vadd.f32 %v2968_v33, %v1239_v34  ;;  %v1240_v38 = vadd.f32 %v1235_v36, %v3941_v47  ;;  %v3257_v40 = vpop.f32.mrb[19].mxu1 }
 0xc1f   :  { %v3967_v45 = vadd.f32 %v2968_v33, %v1240_v38  ;;  %v1250_v46 = vsel %vm123_vm2, %v3964_v37, 0.0 }
 0xc20   :  { %1251 = vadd.xlane.f32.xlu0 %v1250_v46 }
 0xc21   :  { %v1253_v48 = vsel %vm123_vm2, %v3967_v45, 0.0 }
 0xc22   :  { %1254 = vadd.xlane.f32.xlu1 %v1253_v48 }
 0xcad   :  { %v1252_v49 = vpop.xlane.xlu0 %1251 }
 0xcae   :  { %v1256_v50 = vmul.f32 0.03125, %v1252_v49 }
 0xcaf   :  { %v1255_v41 = vpop.xlane.xlu1 %1254 }
 0xcb0   :  { %v1258_v51 = vsub.f32 %v3964_v37, %v1256_v50  ;;  %v1257_v57 = vmul.f32 0.03125, %v1255_v41 }
 0xcb2   :  { %v1259_v52 = vsub.f32 %v3967_v45, %v1257_v57  ;;  %v1260_v47 = vmul.f32 %v1258_v51, %v1258_v51 }
 0xcb4   :  { %v1262_v53 = vsel %vm123_vm2, %v1260_v47, 0.0  ;;  %v1261_v54 = vmul.f32 %v1259_v52, %v1259_v52 }
 0xcb5   :  { %1263 = vadd.xlane.f32.xlu0 %v1262_v53 }
 0xcb6   :  { %v1265_v56 = vsel %vm123_vm2, %v1261_v54, 0.0  ;;  %v2975_v54 = vld [vmem:[#allocation7 + $0xe0] ss:$0 sm:$0xff] }
 0xcb7   :  { %1266 = vadd.xlane.f32.xlu1 %v1265_v56 }
 0xd42   :  { %v1264_v61 = vpop.xlane.xlu0 %1263 }
 0xd43   :  { %v1268_v62 = vmul.f32 0.03125, %v1264_v61 }
 0xd44   :  { %v1267_v63 = vpop.xlane.xlu1 %1266 }
 0xd45   :  { %v1270_v1 = vadd.f32 1e-05, %v1268_v62  ;;  %v1269_v2 = vmul.f32 0.03125, %v1267_v63 }
 0xd47   :  { %3550 = vrsqrt.f32 %v1270_v1  ;;  %v1271_v3 = vadd.f32 1e-05, %v1269_v2 }
 0xd49   :  { %3552 = vrsqrt.f32 %v1271_v3 }
 0xd51   :  { %v3551_v4 = vpop.eup %3550 }
 0xd52   :  { %v1274_v6 = vmul.f32 %v3551_v4, %v1258_v51 }
 0xd53   :  { %v3553_v7 = vpop.eup %3552 }
 0xd54   :  { %v1280_v8 = vmul.f32 %v2969_v5, %v1274_v6  ;;  %v1275_v9 = vmul.f32 %v3553_v7, %v1259_v52 }
 0xd56   :  { %v1281_v11 = vmul.f32 %v2969_v5, %v1275_v9  ;;  %v1286_v12 = vadd.f32 %v2970_v10, %v1280_v8 }
 0xd58   :  { %v1287_v13 = vadd.f32 %v2970_v10, %v1281_v11 }
 0xd5a   :  { %v1288_v15 = vpack.c.bf16 %v1287_v13, %v1286_v12 }
 0xd5c   :  { %3263 = vmatmul.mubr.msk.bf16.vlgmr.msra.gmra.mrb[32].mxu0 %vm123_vm2, %v1288_v15  ;;  %3279 = vmatmul.mubr.msk.bf16.vlgmr.msra.gmra.mrb[20].mxu1 %vm123_vm2, %v1288_v15 }
 0xd5d   :  { %3267 = vmatpush3.bf16.msra.mxu0 %v3487_v14  ;;  %3270 = vmatprep.mubr.msk.bf16.mxu0 %vm3712_vm0, %v3711_v0 }
 0xd5e   :  { %3268 = vmatprep.subr.bf16.mxu0 %v3711_v0  ;;  %3290 = vmatprep.mubr.msk.bf16.mxu1 %vm3712_vm0, %v3711_v0 }
 0xd61   :  { %3269 = vmatpush3.bf16.msra.mxu0 %v3488_v19 }
 0xd62   :  { %3282 = vmatprep.subr.bf16.mxu0 %v3711_v0 }
 0xd64   :  { %3271 = vmatmul.mubr.msk.bf16.vlgmr.msra.gmra.mrb[36].mxu0 %vm123_vm2, %v1288_v15 }
 0xd65   :  { %3284 = vmatprep.mubr.msk.bf16.mxu0 %vm3712_vm0, %v3711_v0 }
 0xe2f   :  { %v1347_v20 = vpop.f32.mrb[32].mxu0  ;;  %v1471_v23 = vpop.f32.mrb[20].mxu1 }
 0xe30   :  { %v1348_v28 = vadd.f32 %v2971_v24, %v1347_v20  ;;  %v3264_v17 = vpop.f32.mrb[33].mxu0  ;;  %v3280_v21 = vpop.f32.mrb[21].mxu1  ;;  %v1472_v25 = vadd.f32 %v2979_v16, %v1471_v23 }
 0xe31   :  { %v1350_v29 = vpop.f32.mrb[34].mxu0  ;;  %v1474_v32 = vpop.f32.mrb[22].mxu1 }
 0xe32   :  { %v3265_v31 = vpop.f32.mrb[35].mxu0  ;;  %v3281_v18 = vpop.f32.mrb[23].mxu1  ;;  %v1479_v22 = vmul.f32 %v1348_v28, %v3820_v39  ;;  %v1555_v26 = vmul.f32 %v1348_v28, %v3822_v42  ;;  %v1716_v33 = vmul.f32 %v1348_v28, %v3824_v43  ;;  %v1835_v34 = vmul.f32 %v1348_v28, %v3826_v44 }
 0xe33   :  { %v1351_v35 = vadd.f32 %v2971_v24, %v1350_v29  ;;  %v1475_v36 = vadd.f32 %v2979_v16, %v1474_v32  ;;  %v3997_v38 = vmul.f32 %v1472_v25, %v3820_v39  ;;  %v1558_v40 = vmul.f32 %v1472_v25, %v3822_v42 }
 0xe34   :  { %v4001_v46 = vmul.f32 %v1472_v25, %v3824_v43  ;;  %v4004_v48 = vmul.f32 %v1472_v25, %v3826_v44 }
 0xe35   :  { %v1480_v49 = vmul.f32 %v1351_v35, %v3820_v39  ;;  %v1556_v50 = vmul.f32 %v1351_v35, %v3822_v42  ;;  %v1717_v41 = vmul.f32 %v1351_v35, %v3824_v43  ;;  %v1836_v51 = vmul.f32 %v1351_v35, %v3826_v44 }
 0xe36   :  { %v4011_v57 = vmul.f32 %v1475_v36, %v3820_v39  ;;  %v1559_v52 = vmul.f32 %v1475_v36, %v3822_v42  ;;  %v4015_v47 = vmul.f32 %v1475_v36, %v3824_v43  ;;  %v4018_v53 = vmul.f32 %v1475_v36, %v3826_v44 }
 0xe37   :  { %v1409_v56 = vpop.f32.mrb[36].mxu0  ;;  %v1481_v55 = vpack.c.bf16 %v1480_v49, %v1479_v22  ;;  %v1557_v58 = vpack.c.bf16 %v1556_v50, %v1555_v26  ;;  %v1718_v59 = vpack.c.bf16 %v1717_v41, %v1716_v33  ;;  %v1837_v60 = vpack.c.bf16 %v1836_v51, %v1835_v34 }
 0xe38   :  { %v3272_v61 = vpop.f32.mrb[37].mxu0  ;;  %v1560_v63 = vpack.c.bf16 %v1559_v52, %v1558_v40  ;;  %v1484_v39 = vpack.c.bf16 %v4011_v57, %v3997_v38  ;;  %v1721_v42 = vpack.c.bf16 %v4015_v47, %v4001_v46  ;;  %v1410_v43 = vadd.f32 %v2975_v54, %v1409_v56 }
 0xe39   :  { %v1412_v62 = vpop.f32.mrb[38].mxu0  ;;  %v1840_v44 = vpack.c.bf16 %v4018_v53, %v4004_v48 }
 0xe3a   :  { %v1413_v1 = vadd.f32 %v2975_v54, %v1412_v62  ;;  %v3273_v2 = vpop.f32.mrb[39].mxu0 }
 0xe3c   :  { %v1478_v3 = vpack.c.bf16 %v1413_v1, %v1410_v43 }
 0xe3e   :  { %v1489_v4 = vsel %vm123_vm2, %v1478_v3, 0 }
 0xe3f   :  { %3283 = vmatpush3.bf16.xpose.msra.mxu0 %v1489_v4  ;;  %3289 = vmatpush3.bf16.xpose.msra.mxu1 %v1489_v4 }
 0xe40   :  { %3294 = vmatprep.subr.bf16.mxu0 %v3711_v0  ;;  %3306 = vmatprep.subr.bf16.mxu1 %v3711_v0 }
 0xe46   :  { %3285 = vmatmul.mubr.msk.bf16.vlgmr.msra.gmra.mrb[40].mxu0 %vm123_vm2, %v1481_v55  ;;  %3291 = vmatmul.mubr.msk.bf16.vlgmr.msra.gmra.mrb[24].mxu1 %vm123_vm2, %v1557_v58 }
 0xe47   :  { %3295 = vmatpush3.bf16.msra.mxu0 %v1560_v63  ;;  %3307 = vmatpush3.bf16.xpose.msra.mxu1 %v1489_v4 }
 0xe48   :  { %3308 = vmatprep.mubr.msk.bf16.mxu1 %vm3712_vm0, %v3711_v0  ;;  %3318 = vmatprep.subr.bf16.mxu1 %v3711_v0 }
 0xe49   :  { %3296 = vmatprep.mubr.msk.bf16.mxu0 %vm3712_vm0, %v3711_v0  ;;  %3300 = vmatprep.subr.bf16.mxu0 %v3711_v0 }
 0xe4e   :  { %3309 = vmatmul.mubr.msk.bf16.vlgmr.msra.gmra.mrb[28].mxu1 %vm123_vm2, %v1718_v59 }
 0xe4f   :  { %3319 = vmatpush3.bf16.xpose.msra.mxu1 %v1489_v4  ;;  %3320 = vmatprep.mubr.msk.bf16.mxu1 %vm3712_vm0, %v3711_v0 }
 0xe50   :  { %3330 = vmatprep.subr.bf16.mxu1 %v3711_v0 }
 0xe56   :  { %3321 = vmatmul.mubr.msk.bf16.vlgmr.msra.gmra.mrb[32].mxu1 %vm123_vm2, %v1837_v60 }
 0xe57   :  { %3334 = vmatprep.mubr.msk.bf16.mxu1 %vm3712_vm0, %v3711_v0 }
 0xf19   :  { %v1525_v5 = vpop.f32.mrb[40].mxu0  ;;  %v1598_v6 = vpop.f32.mrb[24].mxu1 }
 0xf1a   :  { %v1599_v7 = vadd.f32 %v1598_v6, %v3880_v27  ;;  %v3286_v8 = vpop.f32.mrb[41].mxu0  ;;  %v3292_v9 = vpop.f32.mrb[25].mxu1  ;;  %v1526_v12 = vadd.f32 %v1525_v5, %v3880_v27 }
 0xf1b   :  { %v1528_v10 = vpop.f32.mrb[42].mxu0  ;;  %v1601_v11 = vpop.f32.mrb[26].mxu1 }
 0xf1c   :  { %v1602_v13 = vadd.f32 %v1601_v11, %v3882_v30  ;;  %v3287_v14 = vpop.f32.mrb[43].mxu0  ;;  %v3293_v15 = vpop.f32.mrb[27].mxu1  ;;  %v1605_v19 = vsel %vm76_vm1, %v1599_v7, -inf  ;;  %v1529_v24 = vadd.f32 %v1528_v10, %v3882_v30  ;;  %v1532_v20 = vsel %vm76_vm1, %v1526_v12, -inf }
 0xf1d   :  { %1606 = vmax.xlane.f32.xlu0 %v1605_v19 }
 0xf1e   :  { %v1608_v16 = vsel %vm76_vm1, %v1602_v13, -inf  ;;  %v1535_v21 = vsel %vm76_vm1, %v1529_v24, -inf }
 0xf1f   :  { %1609 = vmax.xlane.f32.xlu1 %v1608_v16 }
 0xf21   :  { %v1759_v23 = vpop.f32.mrb[28].mxu1  ;;  %1533 = vmax.xlane.f32.xlu0 %v1532_v20 }
 0xf22   :  { %v1760_v28 = vadd.f32 %v1759_v23, %v3880_v27  ;;  %v3310_v17 = vpop.f32.mrb[29].mxu1 }
 0xf23   :  { %v1762_v25 = vpop.f32.mrb[30].mxu1  ;;  %1536 = vmax.xlane.f32.xlu1 %v1535_v21 }
 0xf24   :  { %v1763_v29 = vadd.f32 %v1762_v25, %v3882_v30  ;;  %v3311_v32 = vpop.f32.mrb[31].mxu1  ;;  %v1766_v31 = vsel %vm76_vm1, %v1760_v28, -inf }
 0xf25   :  { %1767 = vmax.xlane.f32.xlu0 %v1766_v31 }
 0xf26   :  { %v1769_v18 = vsel %vm76_vm1, %v1763_v29, -inf }
 0xf27   :  { %1770 = vmax.xlane.f32.xlu1 %v1769_v18 }
 0xf29   :  { %v1878_v22 = vpop.f32.mrb[32].mxu1 }
 0xf2a   :  { %v1879_v26 = vadd.f32 %v1878_v22, %v3880_v27  ;;  %v3322_v33 = vpop.f32.mrb[33].mxu1 }
 0xf2b   :  { %v1881_v34 = vpop.f32.mrb[34].mxu1 }
 0xf2c   :  { %v1882_v35 = vadd.f32 %v1881_v34, %v3882_v30  ;;  %v3323_v36 = vpop.f32.mrb[35].mxu1  ;;  %v1885_v40 = vsel %vm76_vm1, %v1879_v26, -inf }
 0xf2d   :  { %1886 = vmax.xlane.f32.xlu0 %v1885_v40 }
 0xf2e   :  { %v1888_v49 = vsel %vm76_vm1, %v1882_v35, -inf }
 0xf2f   :  { %1889 = vmax.xlane.f32.xlu1 %v1888_v49 }
 0xfaa   :  { %v1607_v50 = vpop.xlane.xlu0 %1606 }
 0xfab   :  { %v1611_v41 = vsub.f32 %v1599_v7, %v1607_v50 }
 0xfac   :  { %v1610_v51 = vpop.xlane.xlu1 %1609 }
 0xfad   :  { %v1613_v52 = vmul.f32 1.442695, %v1611_v41  ;;  %v1612_v54 = vsub.f32 %v1602_v13, %v1610_v51 }
 0xfae   :  { %v1534_v56 = vpop.xlane.xlu0 %1533 }
 0xfaf   :  { %3554 = vpow2.f32 %v1613_v52  ;;  %v1615_v55 = vmul.f32 1.442695, %v1612_v54  ;;  %v1538_v27 = vsub.f32 %v1526_v12, %v1534_v56 }
 0xfb0   :  { %v1537_v58 = vpop.xlane.xlu1 %1536 }
 0xfb1   :  { %3556 = vpow2.f32 %v1615_v55  ;;  %v1540_v59 = vmul.f32 1.442695, %v1538_v27  ;;  %v1539_v30 = vsub.f32 %v1529_v24, %v1537_v58 }
 0xfb2   :  { %v1768_v60 = vpop.xlane.xlu0 %1767 }
 0xfb3   :  { %3558 = vpow2.f32 %v1540_v59  ;;  %v1542_v61 = vmul.f32 1.442695, %v1539_v30  ;;  %v1772_v62 = vsub.f32 %v1760_v28, %v1768_v60  ;;  %v3490_v60 = vld [vmem:[#allocation5 + $0xb0] sm:$0xff]  }
 0xfb4   :  { %v1771_v63 = vpop.xlane.xlu1 %1770 }
 0xfb5   :  { %3560 = vpow2.f32 %v1542_v61  ;;  %v1774_v43 = vmul.f32 1.442695, %v1772_v62  ;;  %v1773_v1 = vsub.f32 %v1763_v29, %v1771_v63  ;;  %v3489_v29 = vld [vmem:[#allocation5 + $0xa8] sm:$0xff]  }
 0xfb6   :  { %3331 = vmatpush3.bf16.msra.mxu1 %v3489_v29 }
 0xfb7   :  { %3562 = vpow2.f32 %v1774_v43  ;;  %v1776_v2 = vmul.f32 1.442695, %v1773_v1  ;;  %3332 = vmatprep.subr.bf16.mxu1 %v3711_v0  ;;  %v2994_v43 = vld [vmem:[#allocation7 + $0xf0] ss:$0 sm:$0xff] }
 0xfb9   :  { %v3555_v3 = vpop.eup %3554  ;;  %3564 = vpow2.f32 %v1776_v2 }
 0xfba   :  { %v1887_v4 = vpop.xlane.xlu0 %1886  ;;  %v1617_v5 = vsel %vm76_vm1, %v3555_v3, 0.0  ;;  %3333 = vmatpush3.bf16.msra.mxu1 %v3490_v60 }
 0xfbb   :  { %v3557_v6 = vpop.eup %3556  ;;  %v1891_v7 = vsub.f32 %v1879_v26, %v1887_v4  ;;  %1618 = vadd.xlane.f32.xlu0 %v1617_v5  ;;  %3338 = vmatprep.subr.bf16.mxu1 %v3711_v0 }
 0xfbc   :  { %v1890_v8 = vpop.xlane.xlu1 %1889  ;;  %v1620_v9 = vsel %vm76_vm1, %v3557_v6, 0.0 }
 0xfbd   :  { %v3559_v10 = vpop.eup %3558  ;;  %v1893_v11 = vmul.f32 1.442695, %v1891_v7  ;;  %v1892_v12 = vsub.f32 %v1882_v35, %v1890_v8  ;;  %1621 = vadd.xlane.f32.xlu1 %v1620_v9 }
 0xfbe   :  { %v1544_v13 = vsel %vm76_vm1, %v3559_v10, 0.0 }
 0xfbf   :  { %v3561_v14 = vpop.eup %3560  ;;  %3566 = vpow2.f32 %v1893_v11  ;;  %v1895_v15 = vmul.f32 1.442695, %v1892_v12  ;;  %1545 = vadd.xlane.f32.xlu0 %v1544_v13 }
 0xfc0   :  { %v1547_v19 = vsel %vm76_vm1, %v3561_v14, 0.0 }
 0xfc1   :  { %v3563_v24 = vpop.eup %3562  ;;  %3568 = vpow2.f32 %v1895_v15  ;;  %1548 = vadd.xlane.f32.xlu1 %v1547_v19 }
 0xfc2   :  { %v1778_v16 = vsel %vm76_vm1, %v3563_v24, 0.0 }
 0xfc3   :  { %v3565_v20 = vpop.eup %3564  ;;  %1779 = vadd.xlane.f32.xlu0 %v1778_v16  ;;  %v3491_v16 = vld [vmem:[#allocation5 + $0xb8] sm:$0xff]  }
 0xfc4   :  { %v1781_v23 = vsel %vm76_vm1, %v3565_v20, 0.0 }
 0xfc5   :  { %1782 = vadd.xlane.f32.xlu1 %v1781_v23  ;;  %v3493_v23 = vld [vmem:[#allocation5 + $0xc8] sm:$0xff]  }
 0xfc9   :  { %v3567_v28 = vpop.eup %3566 }
 0xfca   :  { %v1897_v17 = vsel %vm76_vm1, %v3567_v28, 0.0 }
 0xfcb   :  { %v3569_v21 = vpop.eup %3568  ;;  %1898 = vadd.xlane.f32.xlu0 %v1897_v17 }
 0xfcc   :  { %v1900_v25 = vsel %vm76_vm1, %v3569_v21, 0.0 }
 0xfcd   :  { %1901 = vadd.xlane.f32.xlu1 %v1900_v25 }
0x1048   :  { %v1619_v32 = vpop.xlane.xlu0 %1618 }
0x1049   :  { %3570 = vrcp.f32 %v1619_v32 }
0x104a   :  { %v1622_v31 = vpop.xlane.xlu1 %1621 }
0x104b   :  { %3572 = vrcp.f32 %v1622_v31 }
0x104c   :  { %v1546_v22 = vpop.xlane.xlu0 %1545 }
0x104e   :  { %v1549_v18 = vpop.xlane.xlu1 %1548 }
0x104f   :  { %3574 = vrcp.f32 %v1549_v18 }
0x1050   :  { %3576 = vrcp.f32 %v1546_v22  ;;  %v1780_v50 = vpop.xlane.xlu0 %1779  ;;  %v2995_v22 = vld [vmem:[#allocation7 + $0x108] ss:$0 sm:$0xff] }
0x1052   :  { %v1783_v40 = vpop.xlane.xlu1 %1782 }
0x1053   :  { %v3571_v26 = vpop.eup %3570  ;;  %3578 = vrcp.f32 %v1783_v40 }
0x1054   :  { %v1625_v34 = vmul.f32 %v3571_v26, %v3555_v3  ;;  %3580 = vrcp.f32 %v1780_v50 }
0x1055   :  { %v3573_v33 = vpop.eup %3572 }
0x1056   :  { %v1626_v35 = vmul.f32 %v3573_v33, %v3557_v6 }
0x1058   :  { %v1627_v36 = vpack.c.bf16 %v1626_v35, %v1625_v34 }
0x1059   :  { %v3575_v49 = vpop.eup %3574 }
0x105a   :  { %3297 = vmatmul.mubr.msk.bf16.vlgmr.msra.gmra.mrb[44].mxu0 %vm76_vm1, %v1627_v36  ;;  %v3577_v41 = vpop.eup %3576  ;;  %v1553_v51 = vmul.f32 %v3575_v49, %v3561_v14  ;;  %v1902_v38 = vpop.xlane.xlu1 %1901  ;;  %v2996_v36 = vld [vmem:[#allocation7 + $0x110] ss:$0 sm:$0xff] }
0x105b   :  { %3301 = vmatpush3.bf16.msra.mxu0 %v1484_v39  ;;  %3302 = vmatprep.mubr.msk.bf16.mxu0 %vm3712_vm0, %v3711_v0  ;;  %v1552_v52 = vmul.f32 %v3577_v41, %v3559_v10  ;;  %v1899_v39 = vpop.xlane.xlu0 %1898  ;;  %3582 = vrcp.f32 %v1902_v38 }
0x105c   :  { %3312 = vmatprep.subr.bf16.mxu0 %v3711_v0  ;;  %3584 = vrcp.f32 %v1899_v39 }
0x105d   :  { %v1554_v54 = vpack.c.bf16 %v1553_v51, %v1552_v52  ;;  %v3579_v57 = vpop.eup %3578  ;;  %v3495_v51 = vld [vmem:[#allocation5 + $0xd8] sm:$0xff]   ;;  %v3496_v52 = vld [vmem:[#allocation5 + $0xe0] sm:$0xff]  }
0x105e   :  { %v3581_v56 = vpop.eup %3580  ;;  %v1787_v55 = vmul.f32 %v3579_v57, %v3565_v20  ;;  %v3492_v20 = vld [vmem:[#allocation5 + $0xc0] sm:$0xff]  }
0x105f   :  { %v1786_v27 = vmul.f32 %v3581_v56, %v3563_v24 }
0x1061   :  { %v1788_v58 = vpack.c.bf16 %v1787_v55, %v1786_v27 }
0x1065   :  { %v3583_v46 = vpop.eup %3582 }
0x1066   :  { %3303 = vmatmul.mubr.msk.bf16.vlgmr.msra.gmra.mrb[44].mxu0 %vm76_vm1, %v1554_v54  ;;  %v3585_v47 = vpop.eup %3584  ;;  %v2997_v54 = vld [vmem:[#allocation7 + $0x118] ss:$0 sm:$0xff] }
0x1067   :  { %3313 = vmatpush3.bf16.msra.mxu0 %v1721_v42  ;;  %3314 = vmatprep.mubr.msk.bf16.mxu0 %vm3712_vm0, %v3711_v0  ;;  %v1906_v42 = vmul.f32 %v3583_v46, %v3569_v21  ;;  %v1905_v59 = vmul.f32 %v3585_v47, %v3567_v28  ;;  %v3494_v28 = vld [vmem:[#allocation5 + $0xd0] sm:$0xff]  }
0x1068   :  { %3324 = vmatprep.subr.bf16.mxu0 %v3711_v0 }
0x1069   :  { %v1907_v30 = vpack.c.bf16 %v1906_v42, %v1905_v59  ;;  %v3006_v59 = vld [vmem:[#allocation7 + $0x120] ss:$0 sm:$0xff] }
0x1072   :  { %3315 = vmatmul.mubr.msk.bf16.vlgmr.msra.gmra.mrb[44].mxu0 %vm76_vm1, %v1788_v58 }
0x1073   :  { %3325 = vmatpush3.bf16.msra.mxu0 %v1840_v44  ;;  %3326 = vmatprep.mubr.msk.bf16.mxu0 %vm3712_vm0, %v3711_v0 }
0x1074   :  { %3346 = vmatprep.subr.bf16.mxu0 %v3711_v0 }
0x107e   :  { %3327 = vmatmul.mubr.msk.bf16.vlgmr.msra.gmra.mrb[44].mxu0 %vm76_vm1, %v1907_v30 }
0x107f   :  { %3354 = vmatprep.mubr.msk.bf16.mxu0 %vm3712_vm0, %v3711_v0  ;;  %3347 = vmatpush3.bf16.msra.mxu0 %v3493_v23 }
0x1080   :  { %3348 = vmatprep.subr.bf16.mxu0 %v3711_v0 }
0x1083   :  { %3349 = vmatpush3.bf16.msra.mxu0 %v3494_v28 }
0x1084   :  { %3350 = vmatprep.subr.bf16.mxu0 %v3711_v0 }
0x1087   :  { %3351 = vmatpush3.bf16.msra.mxu0 %v3495_v51 }
0x1088   :  { %3352 = vmatprep.subr.bf16.mxu0 %v3711_v0 }
0x108b   :  { %3353 = vmatpush3.bf16.msra.mxu0 %v3496_v52 }
0x108c   :  { %3378 = vmatprep.subr.bf16.mxu0 %v3711_v0 }
0x1151   :  { %v1945_v48 = vpop.f32.mrb[44].mxu0 }
0x1152   :  { %v3328_v53 = vpop.f32.mrb[45].mxu0 }
0x1153   :  { %v1948_v44 = vpop.f32.mrb[46].mxu0  ;;  %v3007_v53 = vld [vmem:[#allocation7 + $0x60] ss:$0 sm:$0xff] }
0x1154   :  { %v1958_v61 = vpack.c.bf16 %v1948_v44, %v1945_v48  ;;  %v3329_v62 = vpop.f32.mrb[47].mxu0 }
0x1156   :  { %3335 = vmatmul.mubr.msk.bf16.vlgmr.msra.gmra.mrb[36].mxu1 %vm123_vm2, %v1958_v61 }
0x1157   :  { %3342 = vmatprep.mubr.msk.bf16.mxu1 %vm3712_vm0, %v3711_v0  ;;  %3339 = vmatpush3.bf16.msra.mxu1 %v3491_v16 }
0x1158   :  { %3340 = vmatprep.subr.bf16.mxu1 %v3711_v0 }
0x115b   :  { %3341 = vmatpush3.bf16.msra.mxu1 %v3492_v20 }
0x1229   :  { %v2008_v63 = vpop.f32.mrb[36].mxu1 }
0x122a   :  { %v2015_v1 = vadd.f32 %v2008_v63, %v3964_v37  ;;  %v3336_v2 = vpop.f32.mrb[37].mxu1 }
0x122b   :  { %v2011_v3 = vpop.f32.mrb[38].mxu1 }
0x122c   :  { %v4098_v4 = vadd.f32 %v2994_v43, %v2015_v1  ;;  %v2016_v5 = vadd.f32 %v2011_v3, %v3967_v45  ;;  %v3337_v6 = vpop.f32.mrb[39].mxu1 }
0x122e   :  { %v4101_v7 = vadd.f32 %v2994_v43, %v2016_v5  ;;  %v2026_v8 = vsel %vm123_vm2, %v4098_v4, 0.0  ;;  %v3713_v5 = vmov 0  }
0x122f   :  { %2027 = vadd.xlane.f32.xlu0 %v2026_v8  ;;  %3467 = vset.pattern.permute.xlu1 %v3713_v5 }
0x1230   :  { %v2029_v9 = vsel %vm123_vm2, %v4101_v7, 0.0  ;;  %3466 = vset.pattern.permute.xlu0 %v3713_v5 }
0x1231   :  { %2030 = vadd.xlane.f32.xlu1 %v2029_v9 }
0x12bc   :  { %v2028_v10 = vpop.xlane.xlu0 %2027 }
0x12bd   :  { %v2032_v11 = vmul.f32 0.03125, %v2028_v10 }
0x12be   :  { %v2031_v37 = vpop.xlane.xlu1 %2030 }
0x12bf   :  { %v2034_v12 = vsub.f32 %v4098_v4, %v2032_v11  ;;  %v2033_v13 = vmul.f32 0.03125, %v2031_v37 }
0x12c1   :  { %v2035_v14 = vsub.f32 %v4101_v7, %v2033_v13  ;;  %v2036_v45 = vmul.f32 %v2034_v12, %v2034_v12 }
0x12c3   :  { %v2038_v15 = vsel %vm123_vm2, %v2036_v45, 0.0  ;;  %v2037_v19 = vmul.f32 %v2035_v14, %v2035_v14 }
0x12c4   :  { %2039 = vadd.xlane.f32.xlu0 %v2038_v15 }
0x12c5   :  { %v2041_v24 = vsel %vm123_vm2, %v2037_v19, 0.0 }
0x12c6   :  { %2042 = vadd.xlane.f32.xlu1 %v2041_v24 }
0x1351   :  { %v2040_v17 = vpop.xlane.xlu0 %2039 }
0x1352   :  { %v2044_v21 = vmul.f32 0.03125, %v2040_v17 }
0x1353   :  { %v2043_v25 = vpop.xlane.xlu1 %2042 }
0x1354   :  { %v2046_v29 = vadd.f32 1e-05, %v2044_v21  ;;  %v2045_v32 = vmul.f32 0.03125, %v2043_v25 }
0x1356   :  { %3586 = vrsqrt.f32 %v2046_v29  ;;  %v2047_v31 = vadd.f32 1e-05, %v2045_v32  ;;  %v3714_v32 = vmov 0.0|0.0  }
0x1357   :  { %3424 = vmatprep.subr.bf16.mxu1 %v3714_v32 }
0x1358   :  { %3588 = vrsqrt.f32 %v2047_v31 }
0x1360   :  { %v3587_v18 = vpop.eup %3586 }
0x1361   :  { %v2050_v26 = vmul.f32 %v3587_v18, %v2034_v12 }
0x1362   :  { %v3589_v33 = vpop.eup %3588 }
0x1363   :  { %v2056_v34 = vmul.f32 %v2995_v22, %v2050_v26  ;;  %v2051_v35 = vmul.f32 %v3589_v33, %v2035_v14 }
0x1365   :  { %v2057_v40 = vmul.f32 %v2995_v22, %v2051_v35  ;;  %v2062_v49 = vadd.f32 %v2996_v36, %v2056_v34  ;;  %v2256_v34 = vld [vmem:[#allocation7 + $0x58] sm:$0x3]  ;;  %v2420_v35 = vld [vmem:[#allocation5 + $0xe8] sm:$0xf] }
0x1367   :  { %v2063_v50 = vadd.f32 %v2996_v36, %v2057_v40  ;;  %v2419_v36 = vld [vmem:[%s4179_s1] sm:$0x3]  ;;  %v2433_v40 = vsel %vm2431_vm5, %v2420_v35, 0  ;;  %v3020_v35 = vld [vmem:[#allocation7 + $0x150] ss:$0 sm:$0xff]  ;;  %s3715_s1 = smov [#allocation8]  }
0x1368   :  { %s2914_s28 = sshll.u32 %s3715_s1, 4  ;;  %s2915_s28 = int_to_ptr.vmem [resolvable:$true] %s2914_s28 }
0x1369   :  { %v2068_v41 = vpack.c.bf16 %v2063_v50, %v2062_v49  ;;  %v2421_v49 = vpack.c.bf16 %v2419_v36, %v2419_v36  ;;  %s3676_s29 = scalar_lea.vmem %s2915_s28, 32  ;;  %p3681_p11 = scmp.lt.s32.totalorder %s2915_s28, %s2915_s28 }
0x136a   :  { %p3677_p10 = scmp.ne.s32.totalorder %s2915_s28, %s3676_s29  ;;  %p3682_p12 = scmp.lt.s32.totalorder %s3676_s29, %s3676_s29 }
0x136b   :  { %3343 = vmatmul.mubr.msk.bf16.vlgmr.msra.gmra.mrb[40].mxu1 %vm123_vm2, %v2068_v41 }
0x136c   :  { %3362 = vmatprep.mubr.msk.f32.mxu1 %vm3712_vm0, %v3711_v0  ;;  %p3683_p13 = por %p3682_p12, %p3681_p11 }
0x136e   :  { %p3684_p0 = pnand %p3683_p13, %p3677_p10 }
0x143e   :  { %v2123_v38 = vpop.f32.mrb[40].mxu1 }
0x143f   :  { %v2124_v57 = vadd.f32 %v2997_v54, %v2123_v38  ;;  %v3344_v39 = vpop.f32.mrb[41].mxu1 }
0x1440   :  { %v2126_v56 = vpop.f32.mrb[42].mxu1 }
0x1441   :  { %v2127_v55 = vadd.f32 %v2997_v54, %v2126_v56  ;;  %v3345_v27 = vpop.f32.mrb[43].mxu1  ;;  %v2130_v58 = vmax.f32 %v2124_v57, 0.0  ;;  %v3011_v54 = vld [vmem:[#allocation7 + $0x128] ss:$0 sm:$0xff] }
0x1443   :  { %v2131_v46 = vmax.f32 %v2127_v55, 0.0 }
0x1445   :  { %v2140_v47 = vpack.c.bf16 %v2131_v46, %v2130_v58 }
0x1447   :  { %3355 = vmatmul.mubr.msk.bf16.vlgmr.msra.gmra.mrb[48].mxu0 %vm1194_vm3, %v2140_v47 }
0x1448   :  { %3382 = vmatprep.mubr.msk.bf16.mxu0 %vm3712_vm0, %v3711_v0 }
0x151a   :  { %v2202_v42 = vpop.f32.mrb[48].mxu0 }
0x151b   :  { %v2209_v30 = vadd.f32 %v2202_v42, %v4098_v4  ;;  %v3356_v60 = vpop.f32.mrb[49].mxu0  ;;  %v3008_v4 = vld [vmem:[#allocation7 + $0x68] ss:$0 sm:$0xff] }
0x151c   :  { %v2205_v48 = vpop.f32.mrb[50].mxu0  ;;  %v3498_v60 = vld [vmem:[#allocation5 + $0xf8] sm:$0xff]  }
0x151d   :  { %v2216_v44 = vadd.f32 %v3006_v59, %v2209_v30  ;;  %v2210_v61 = vadd.f32 %v2205_v48, %v4101_v7  ;;  %v3357_v62 = vpop.f32.mrb[51].mxu0  ;;  %v3497_v30 = vld [vmem:[#allocation5 + $0xf0] sm:$0xff]  }
0x151e   :  { %3379 = vmatpush3.bf16.msra.mxu0 %v3497_v30  ;;  %v3013_v62 = vld [vmem:[#allocation7 + $0x130] ss:$0 sm:$0xff] }
0x151f   :  { %v2217_v63 = vadd.f32 %v3006_v59, %v2210_v61  ;;  %v2223_v43 = vmul.f32 %v3007_v53, %v2216_v44  ;;  %3380 = vmatprep.subr.bf16.mxu0 %v3711_v0 }
0x1521   :  { %v2225_v1 = vsel %vm123_vm2, %v2223_v43, 0.0  ;;  %v2224_v2 = vmul.f32 %v3007_v53, %v2217_v63  ;;  %v3014_v43 = vld [vmem:[#allocation7 + $0x138] ss:$0 sm:$0xff] }
0x1522   :  { %2226 = vadd.xlane.f32.xlu0 %v2225_v1  ;;  %3381 = vmatpush3.bf16.msra.mxu0 %v3498_v60  ;;  %v3503_v60 = vld [vmem:[#allocation5 + $0x120] sm:$0xff]  }
0x1523   :  { %v2228_v3 = vsel %vm123_vm2, %v2224_v2, 0.0  ;;  %3394 = vmatprep.subr.bf16.mxu0 %v3711_v0 }
0x1524   :  { %2229 = vadd.xlane.f32.xlu1 %v2228_v3 }
0x15af   :  { %v2227_v6 = vpop.xlane.xlu0 %2226 }
0x15b0   :  { %v2236_v8 = vadd.f32 %v3008_v4, %v2227_v6 }
0x15b1   :  { %v2230_v9 = vpop.xlane.xlu1 %2229 }
0x15b2   :  { %v2237_v10 = vadd.f32 %v3008_v4, %v2230_v9  ;;  %v2239_v7 = vsel %vm2238_vm4, %v2236_v8, -inf }
0x15b4   :  { %v2240_v11 = vsel %vm2238_vm4, %v2237_v10, -inf }
0x15b5   :  { %v2241_v37 = vmax.f32 %v2239_v7, %v2240_v11 }
0x15b7   :  { %v2242_v12 = vrot.slane %v2241_v37, 4 }
0x15b9   :  { %v2243_v13 = vmax.f32 %v2241_v37, %v2242_v12 }
0x15bb   :  { %v2244_v14 = vrot.slane %v2243_v13, 2 }
0x15bd   :  { %v2245_v45 = vmax.f32 %v2243_v13, %v2244_v14 }
0x15bf   :  { %v2246_v15 = vrot.slane %v2245_v45, 1 }
0x15c1   :  { %v2247_v19 = vmax.f32 %v2245_v45, %v2246_v15 }
0x15c3   :  { %v2248_v24 = vsub.f32 %v2236_v8, %v2247_v19  ;;  %v2249_v16 = vsub.f32 %v2237_v10, %v2247_v19  ;;  %v3015_v10 = vld [vmem:[#allocation7 + $0x140] ss:$0 sm:$0xff] }
0x15c5   :  { %v2250_v20 = vmax.f32 %v2248_v24, -60.0  ;;  %v2251_v23 = vmax.f32 %v2249_v16, -60.0 }
0x15c7   :  { %v2252_v28 = vmul.f32 1.442695, %v2250_v20  ;;  %v2254_v17 = vmul.f32 1.442695, %v2251_v23  ;;  %v3499_v23 = vld [vmem:[#allocation5 + $0x100] sm:$0xff]  }
0x15c9   :  { %3590 = vpow2.f32 %v2252_v28  ;;  %v3500_v28 = vld [vmem:[#allocation5 + $0x108] sm:$0xff]  }
0x15ca   :  { %3592 = vpow2.f32 %v2254_v17  ;;  %v3501_v17 = vld [vmem:[#allocation5 + $0x110] sm:$0xff]  }
0x15d3   :  { %v3591_v21 = vpop.eup %3590 }
0x15d4   :  { %v3593_v25 = vpop.eup %3592  ;;  %2259 = vperm.xlu0 %3466, %v3591_v21  }
0x15d5   :  { %2264 = vperm.xlu1 %3467, %v3593_v25   ;;  %v3428_v29 = vpack.c.bf16 %v3593_v25, %v3591_v21  ;;  %v3502_v21 = vld [vmem:[#allocation5 + $0x118] sm:$0xff]  }
0x1653   :  { %v2260_v31 = vpop.permute.xlu0 %2259 }
0x1654   :  { %v2265_v18 = vpop.permute.xlu1 %2264  ;;  %v2267_v22 = vmul.f32 %v2260_v31, %v2216_v44 }
0x1655   :  { %v2268_v26 = vmul.f32 %v2265_v18, %v2217_v63 }
0x1657   :  { %v3425_v33 = vpack.c.bf16 %v2268_v26, %v2267_v22 }
0x1659   :  { %3426 = vmatpush3.bf16.msra.mxu1 %v3425_v33  ;;  %v3019_v33 = vld [vmem:[#allocation7 + $0x148] ss:$0 sm:$0xff] }
0x165a   :  { %3427 = vmatprep.subr.bf16.mxu1 %v3714_v32 }
0x165c   :  { %3363 = vmatmul.mubr.msk.f32.vlgmr.msra.gmra.mrb[2].mxu1 %vm76_vm1, %v2256_v34 }
0x165d   :  { %3429 = vmatpush3.bf16.msra.mxu1 %v3428_v29  ;;  %3369 = vmatprep.mubr.msk.f32.mxu1 %vm3712_vm0, %v3711_v0 }
0x165e   :  { %3372 = vmatprep.subr.bf16.mxu1 %v3711_v0 }
0x1660   :  { %3370 = vmatmul.mubr.msk.f32.vlgmr.msra.gmra.mrb[44].mxu1 %vm76_vm1, %v2256_v34 }
0x1661   :  { %3373 = vmatpush3.bf16.msra.mxu1 %v2433_v40  ;;  %3374 = vmatprep.mubr.msk.bf16.mxu1 %vm3712_vm0, %v3711_v0 }
0x1662   :  { %3386 = vmatprep.subr.bf16.mxu1 %v3711_v0 }
0x1664   :  { %3375 = vmatmul.mubr.msk.bf16.vlgmr.msra.gmra.mrb[48].mxu1 %vm2427_vm6, %v2421_v49 }
0x1665   :  { %3390 = vmatprep.mubr.msk.bf16.mxu1 %vm3712_vm0, %v3711_v0  ;;  %3387 = vmatpush3.bf16.msra.mxu1 %v3501_v17 }
0x1666   :  { %3388 = vmatprep.subr.bf16.mxu1 %v3711_v0 }
0x1669   :  { %3389 = vmatpush3.bf16.msra.mxu1 %v3502_v21 }
0x166a   :  { %3402 = vmatprep.subr.bf16.mxu1 %v3711_v0 }
0x172f   :  { %v4139_v50 = vpop.f32.mrb[2].mxu1 }
0x1730   :  { %v3364_v41 = vpop.f32.mrb[3].mxu1 }
0x1733   :  { %v2408_v51 = vpop.f32.mrb[44].mxu1 }
0x1734   :  { %v3371_v52 = vpop.f32.mrb[45].mxu1 }
0x1737   :  { %v2469_v38 = vpop.f32.mrb[48].mxu1 }
0x1738   :  { %v2470_v57 = vadd.f32 %v3011_v54, %v2469_v38  ;;  %v3376_v39 = vpop.f32.mrb[49].mxu1  ;;  %v3027_v38 = vld [vmem:[#allocation7 + $0x158] ss:$0 sm:$0xff] }
0x1739   :  { %v2472_v56 = vpop.f32.mrb[50].mxu1 }
0x173a   :  { %v2478_v55 = vsel %vm2477_vm7, %v2470_v57, 0.0  ;;  %v3377_v27 = vpop.f32.mrb[51].mxu1 }
0x173b   :  { %2479 = vadd.xlane.f32.xlu1 %v2478_v55 }
0x17c8   :  { %v2480_v58 = vpop.xlane.xlu1 %2479 }
0x17c9   :  { %v2481_v46 = vmul.f32 0.03125, %v2480_v58 }
0x17cb   :  { %v2482_v47 = vsub.f32 %v2470_v57, %v2481_v46 }
0x17cd   :  { %v2483_v42 = vmul.f32 %v2482_v47, %v2482_v47 }
0x17cf   :  { %v2484_v59 = vsel %vm2477_vm7, %v2483_v42, 0.0 }
0x17d0   :  { %2485 = vadd.xlane.f32.xlu0 %v2484_v59 }
0x185d   :  { %v2486_v48 = vpop.xlane.xlu0 %2485 }
0x185e   :  { %v2487_v53 = vmul.f32 0.03125, %v2486_v48  ;;  %v3504_v48 = vld [vmem:[#allocation5 + $0x128] sm:$0xff]  }
0x1860   :  { %v2488_v44 = vadd.f32 1e-05, %v2487_v53 }
0x1862   :  { %3594 = vrsqrt.f32 %v2488_v44 }
0x186c   :  { %v3595_v61 = vpop.eup %3594 }
0x186d   :  { %v2490_v63 = vmul.f32 %v3595_v61, %v2482_v47 }
0x186f   :  { %v2495_v1 = vmul.f32 %v3013_v62, %v2490_v63  ;;  %v3028_v63 = vld [vmem:[#allocation7 + $0x160] ss:$0 sm:$0xff] }
0x1871   :  { %v2500_v2 = vadd.f32 %v3014_v43, %v2495_v1  ;;  %v3029_v1 = vld [vmem:[#allocation7 + $0x168] ss:$0 sm:$0xff] }
0x1873   :  { %v2502_v3 = vmul.f32 0.70710677, %v2500_v2  ;;  %v2501_v4 = vmul.f32 0.5, %v2500_v2 }
0x1875   :  { %3596 = verf.f32 %v2502_v3 }
0x1876   :  { %3598 = vrcp.f32 %v2408_v51 }
0x187f   :  { %v3597_v5 = vpop.eup %3596 }
0x1880   :  { %v2504_v6 = vadd.f32 1.0, %v3597_v5  ;;  %v3599_v20 = vpop.eup %3598 }
0x1882   :  { %v2505_v8 = vmul.f32 %v2504_v6, %v2501_v4 }
0x1884   :  { %v2510_v9 = vpack.c.bf16 %v2505_v8, %v2505_v8 }
0x1886   :  { %3383 = vmatmul.mubr.msk.bf16.vlgmr.msra.gmra.mrb[52].mxu0 %vm123_vm2, %v2510_v9 }
0x1887   :  { %3398 = vmatprep.mubr.msk.bf16.mxu0 %vm3712_vm0, %v3711_v0  ;;  %3395 = vmatpush3.bf16.msra.mxu0 %v3499_v23 }
0x1888   :  { %3396 = vmatprep.subr.bf16.mxu0 %v3711_v0 }
0x188b   :  { %3397 = vmatpush3.bf16.msra.mxu0 %v3500_v28 }
0x188c   :  { %3410 = vmatprep.subr.bf16.mxu0 %v3711_v0 }
0x1959   :  { %v2565_v7 = vpop.f32.mrb[52].mxu0 }
0x195a   :  { %v2566_v11 = vadd.f32 %v3015_v10, %v2565_v7  ;;  %v3384_v37 = vpop.f32.mrb[53].mxu0 }
0x195b   :  { %v2568_v12 = vpop.f32.mrb[54].mxu0 }
0x195c   :  { %v3385_v13 = vpop.f32.mrb[55].mxu0  ;;  %v2573_v14 = vsel %vm2477_vm7, %v2566_v11, 0.0 }
0x195d   :  { %2574 = vadd.xlane.f32.xlu1 %v2573_v14 }
0x19ea   :  { %v2575_v45 = vpop.xlane.xlu1 %2574 }
0x19eb   :  { %v2576_v15 = vmul.f32 0.03125, %v2575_v45 }
0x19ed   :  { %v2577_v19 = vsub.f32 %v2566_v11, %v2576_v15 }
0x19ef   :  { %v2578_v24 = vmul.f32 %v2577_v19, %v2577_v19 }
0x19f1   :  { %v2579_v16 = vsel %vm2477_vm7, %v2578_v24, 0.0 }
0x19f2   :  { %2580 = vadd.xlane.f32.xlu1 %v2579_v16 }
0x1a03   :  { %2415 = vperm.xlu1 %3467, %v3599_v20   ;;  %v3505_v20 = vld [vmem:[#allocation5 + $0x130] sm:$0xff]  }
0x1a7f   :  { %v2581_v25 = vpop.xlane.xlu1 %2580 }
0x1a80   :  { %v2582_v29 = vmul.f32 0.03125, %v2581_v25  ;;  %v3034_v25 = vld [vmem:[#allocation7 + $0x178] ss:$0 sm:$0xff] }
0x1a82   :  { %v2583_v32 = vadd.f32 1e-05, %v2582_v29 }
0x1a83   :  { %v2416_v31 = vpop.permute.xlu1 %2415 }
0x1a84   :  { %3600 = vrsqrt.f32 %v2583_v32  ;;  %v2418_v18 = vmul.f32 %v2416_v31, %v4139_v50  ;;  %v3035_v32 = vld [vmem:[#allocation7 + $0x180] ss:$0 sm:$0xff] }
0x1a86   :  { %v2600_v22 = vpack.c.bf16 %v2418_v18, %v2418_v18 }
0x1a88   :  { %3399 = vmatmul.mubr.msk.bf16.vlgmr.msra.gmra.mrb[56].mxu0 %vm123_vm2, %v2600_v22 }
0x1a89   :  { %3412 = vmatprep.mubr.msk.bf16.mxu0 %vm3712_vm0, %v3711_v0  ;;  %3411 = vmatpush3.bf16.msra.mxu0 %v3505_v20 }
0x1a8e   :  { %v3601_v26 = vpop.eup %3600 }
0x1a8f   :  { %v2585_v34 = vmul.f32 %v3601_v26, %v2577_v19 }
0x1a91   :  { %v2590_v36 = vmul.f32 %v3019_v33, %v2585_v34 }
0x1a93   :  { %v2595_v40 = vadd.f32 %v3020_v35, %v2590_v36 }
0x1a95   :  { %v2605_v49 = vpack.c.bf16 %v2595_v40, %v2595_v40  ;;  %v3036_v40 = vld [vmem:[#allocation7 + $0x188] ss:$0 sm:$0xff] }
0x1a97   :  { %3391 = vmatmul.mubr.msk.bf16.vlgmr.msra.gmra.mrb[52].mxu1 %vm123_vm2, %v2605_v49 }
0x1a98   :  { %3406 = vmatprep.mubr.msk.bf16.mxu1 %vm3712_vm0, %v3711_v0  ;;  %3403 = vmatpush3.bf16.msra.mxu1 %v3503_v60 }
0x1a99   :  { %3404 = vmatprep.subr.bf16.mxu1 %v3711_v0  ;;  %v3030_v0 = vld [vmem:[#allocation7 + $0x170] ss:$0 sm:$0xff] }
0x1a9c   :  { %3405 = vmatpush3.bf16.msra.mxu1 %v3504_v48 }
0x1b5b   :  { %v2710_v41 = vpop.f32.mrb[56].mxu0 }
0x1b5c   :  { %v3400_v50 = vpop.f32.mrb[57].mxu0 }
0x1b5d   :  { %v2713_v51 = vpop.f32.mrb[58].mxu0 }
0x1b5e   :  { %v3401_v52 = vpop.f32.mrb[59].mxu0 }
0x1b6a   :  { %v2655_v54 = vpop.f32.mrb[52].mxu1 }
0x1b6b   :  { %v2711_v57 = vadd.f32 %v2710_v41, %v2655_v54  ;;  %v3392_v39 = vpop.f32.mrb[53].mxu1 }
0x1b6c   :  { %v2658_v56 = vpop.f32.mrb[54].mxu1 }
0x1b6d   :  { %v3393_v55 = vpop.f32.mrb[55].mxu1  ;;  %v2721_v27 = vadd.f32 %v3027_v38, %v2711_v57 }
0x1b6f   :  { %v2724_v58 = vsel %vm2477_vm7, %v2721_v27, 0.0 }
0x1b70   :  { %2725 = vadd.xlane.f32.xlu0 %v2724_v58 }
0x1bfd   :  { %v2726_v46 = vpop.xlane.xlu0 %2725 }
0x1bfe   :  { %v2727_v47 = vmul.f32 0.03125, %v2726_v46 }
0x1c00   :  { %v2728_v42 = vsub.f32 %v2721_v27, %v2727_v47 }
0x1c02   :  { %v2729_v59 = vmul.f32 %v2728_v42, %v2728_v42 }
0x1c04   :  { %v2730_v30 = vsel %vm2477_vm7, %v2729_v59, 0.0 }
0x1c05   :  { %2731 = vadd.xlane.f32.xlu1 %v2730_v30 }
0x1c92   :  { %v2732_v53 = vpop.xlane.xlu1 %2731 }
0x1c93   :  { %v2733_v44 = vmul.f32 0.03125, %v2732_v53 }
0x1c95   :  { %v2734_v61 = vadd.f32 1e-05, %v2733_v44 }
0x1c97   :  { %3602 = vrsqrt.f32 %v2734_v61 }
0x1ca1   :  { %v3603_v62 = vpop.eup %3602 }
0x1ca2   :  { %v2736_v43 = vmul.f32 %v3603_v62, %v2728_v42 }
0x1ca4   :  { %v2741_v2 = vmul.f32 %v3028_v63, %v2736_v43 }
0x1ca6   :  { %v2746_v3 = vadd.f32 %v3029_v1, %v2741_v2 }
0x1ca8   :  { %v2748_v5 = vmul.f32 0.70710677, %v2746_v3  ;;  %v2747_v6 = vmul.f32 0.5, %v2746_v3 }
0x1caa   :  { %3604 = verf.f32 %v2748_v5 }
0x1cb4   :  { %v3605_v4 = vpop.eup %3604 }
0x1cb5   :  { %v2750_v8 = vadd.f32 1.0, %v3605_v4 }
0x1cb7   :  { %v2751_v9 = vmul.f32 %v2750_v8, %v2747_v6 }
0x1cb9   :  { %v2756_v10 = vpack.c.bf16 %v2751_v9, %v2751_v9 }
0x1cbb   :  { %3407 = vmatmul.mubr.msk.bf16.vlgmr.msra.gmra.mrb[56].mxu1 %vm123_vm2, %v2756_v10 }
0x1d8e   :  { %v2811_v7 = vpop.f32.mrb[56].mxu1 }
0x1d8f   :  { %v2812_v11 = vadd.f32 %v3030_v0, %v2811_v7  ;;  %v3408_v37 = vpop.f32.mrb[57].mxu1 }
0x1d90   :  { %v2814_v12 = vpop.f32.mrb[58].mxu1 }
0x1d91   :  { %v3409_v13 = vpop.f32.mrb[59].mxu1  ;;  %v2820_v14 = vsel %vm2819_vm8, %v2812_v11, 0.0 }
0x1d92   :  { %2821 = vadd.xlane.f32.xlu0 %v2820_v14 }
0x1e1f   :  { %v2822_v45 = vpop.xlane.xlu0 %2821 }
0x1e20   :  { %v2824_v15 = vmul.f32 0.0625, %v2822_v45 }
0x1e22   :  { %v2825_v19 = vsub.f32 %v2812_v11, %v2824_v15 }
0x1e24   :  { %v2826_v24 = vmul.f32 %v2825_v19, %v2825_v19 }
0x1e26   :  { %v2827_v16 = vsel %vm2819_vm8, %v2826_v24, 0.0 }
0x1e27   :  { %2828 = vadd.xlane.f32.xlu0 %v2827_v16 }
0x1eb4   :  { %v2829_v23 = vpop.xlane.xlu0 %2828 }
0x1eb5   :  { %v2830_v28 = vmul.f32 0.0625, %v2829_v23 }
0x1eb7   :  { %v2831_v17 = vadd.f32 1e-05, %v2830_v28 }
0x1eb9   :  { %3606 = vrsqrt.f32 %v2831_v17 }
0x1ec3   :  { %v3607_v21 = vpop.eup %3606 }
0x1ec4   :  { %v2833_v29 = vmul.f32 %v3607_v21, %v2825_v19 }
0x1ec6   :  { %v2838_v31 = vmul.f32 %v3034_v25, %v2833_v29 }
0x1ec8   :  { %v2843_v18 = vadd.f32 %v3035_v32, %v2838_v31 }
0x1eca   :  { %v2845_v22 = vmul.f32 0.70710677, %v2843_v18  ;;  %v2844_v33 = vmul.f32 0.5, %v2843_v18 }
0x1ecc   :  { %3608 = verf.f32 %v2845_v22 }
0x1ed6   :  { %v3609_v26 = vpop.eup %3608 }
0x1ed7   :  { %v2847_v34 = vadd.f32 1.0, %v3609_v26 }
0x1ed9   :  { %v2848_v35 = vmul.f32 %v2847_v34, %v2844_v33 }
0x1edb   :  { %v2851_v36 = vpack.c.bf16 %v2848_v35, %v2848_v35 }
0x1edd   :  { %3413 = vmatmul.mubr.msk.bf16.vlgmr.msra.gmra.mrb[60].mxu0 %vm76_vm1, %v2851_v36 }
0x1fb0   :  { %v2900_v49 = vpop.f32.mrb[60].mxu0 }
0x1fb1   :  { %v2901_v41 = vadd.f32 %v3036_v40, %v2900_v49  ;;  %v3414_v50 = vpop.f32.mrb[61].mxu0 }
0x1fb2   :  { %v2903_v51 = vpop.f32.mrb[62].mxu0 }
0x1fb3   :  { %v3415_v52 = vpop.f32.mrb[63].mxu0  ;;  %2907 = vst.msk [vmem:[#allocation8] sm:$0x3] %vm2906_vm9, %v2901_v41 }
0x1fb4   :  { %3687 = shalt.err (!%p3684_p0)
}
0x1fb5   :  { %s3688_s6 = scalar_lea.hbm %s4182_s4, 32 }
0x1fb6   :  { %p3689_p1 = scmp.ne.s32.totalorder %s4182_s4, %s3688_s6  ;;  %p3692_p2 = scmp.lt.u32.totalorder %s3688_s6, %s4182_s4 }
0x1fb8   :  { %p3694_p3 = pnand %p3692_p2, %p3689_p1 }
0x1fba   :  { %3697 = shalt.err (!%p3694_p3)
}
0x1fbb   :  { %2917 = dma.vmem_to_hbm [thread:$0]  %s2915_s28, 32, %s4182_s4, [#allocation4]  }
0x1fbc   :  { %3702 = dma.done.wait [#allocation4], 32  }
0x1fbd   :  { %3703 = vsyncadd [#allocation4], 4294967264 }
0x1fbe   :  { %2921 = vsyncpa [#allocation3], 1 }
0x1fbf   :  { %2922 = vsyncpa [#allocation6], 1 }
0x1fc0   :  { %2923 = vsyncpa [#allocation4], 1 }

</bundles_post_ra>
